<compile_context>
chip_gen: v6e
topology: v6e:2x2x1
jax: 0.10.0
libtpu: 0.0.40
codegen_flags: <defaults>
</compile_context>

<pallas_src>
import functools
import math

import jax
import jax.numpy as jnp
import numpy as np
from jax.experimental import pallas as pl
from jax.experimental.pallas import tpu as pltpu

CONV_KERNELS = (256, 128, 64, 32, 16, 8, 4, 2)   # per-block stage-1 kernel sizes
K1 = 24                                          # stage-2/3 kernel size
HP = jax.lax.Precision.HIGHEST


def _round_up(x, m):
    return ((x + m - 1) // m) * m


def _full_spec(shape):
    nd = len(shape)
    return pl.BlockSpec(shape, lambda i, _nd=nd: (0,) * _nd)


# -----------------------------------------------------------------------------
# Kernel 1: block-batched conv-as-matmul (+bias, ReLU).  grid=(8,) "parallel".
# -----------------------------------------------------------------------------
def _bconv_relu_kernel(x_ref, w_ref, b_ref, o_ref):
    y = jnp.dot(x_ref[...], w_ref[...], preferred_element_type=jnp.float32) + b_ref[...]
    o_ref[...] = jnp.maximum(y, 0.0)


def batched_conv_relu(patches, w, b):
    nb, M, K = patches.shape
    N = w.shape[2]
    return pl.pallas_call(
        _bconv_relu_kernel,
        out_shape=jax.ShapeDtypeStruct((nb, M, N), jnp.float32),
        grid=(nb,),
        in_specs=[pl.BlockSpec((None, M, K), lambda i: (i, 0, 0)),
                  pl.BlockSpec((None, K, N), lambda i: (i, 0, 0)),
                  pl.BlockSpec((None, 1, N), lambda i: (i, 0, 0))],
        out_specs=pl.BlockSpec((None, M, N), lambda i: (i, 0, 0)),
        compiler_params=pltpu.CompilerParams(dimension_semantics=("parallel",)),
    )(patches, w, b)


# -----------------------------------------------------------------------------
# Kernel 2: block-batched conv-as-matmul + ReLU, summed over the 8 blocks
# in-kernel (output resident accumulator, grid=(8,) "arbitrary").
# -----------------------------------------------------------------------------
def _bconv_relu_sum_kernel(x_ref, w_ref, b_ref, o_ref):
    @pl.when(pl.program_id(0) == 0)
    def _init():
        o_ref[...] = jnp.zeros_like(o_ref)

    y = jnp.dot(x_ref[...], w_ref[...], preferred_element_type=jnp.float32) + b_ref[...]
    o_ref[...] += jnp.maximum(y, 0.0)


def batched_conv_relu_sum(patches, w, b):
    nb, M, K = patches.shape
    N = w.shape[2]
    return pl.pallas_call(
        _bconv_relu_sum_kernel,
        out_shape=jax.ShapeDtypeStruct((M, N), jnp.float32),
        grid=(nb,),
        in_specs=[pl.BlockSpec((None, M, K), lambda i: (i, 0, 0)),
                  pl.BlockSpec((None, K, N), lambda i: (i, 0, 0)),
                  pl.BlockSpec((None, 1, N), lambda i: (i, 0, 0))],
        out_specs=pl.BlockSpec((M, N), lambda i: (0, 0)),
        compiler_params=pltpu.CompilerParams(dimension_semantics=("arbitrary",)),
    )(patches, w, b)


# -----------------------------------------------------------------------------
# Kernel 3: single-tile matmul + bias (fused QKV projection, lane-dense N=128).
# -----------------------------------------------------------------------------
def _matmul_bias_kernel(x_ref, w_ref, b_ref, o_ref):
    o_ref[...] = jnp.dot(x_ref[...], w_ref[...],
                         preferred_element_type=jnp.float32) + b_ref[...]


def matmul_bias(x, w, b):
    M, K = x.shape
    N = w.shape[1]
    return pl.pallas_call(
        _matmul_bias_kernel,
        out_shape=jax.ShapeDtypeStruct((M, N), jnp.float32),
        grid=(1,),
        in_specs=[_full_spec((M, K)), _full_spec((K, N)), _full_spec((1, N))],
        out_specs=_full_spec((M, N)),
    )(x, w, b)


# -----------------------------------------------------------------------------
# Kernel 4: fused probattn epilogue.
#   proj = attn @ Wo + bo ; x1 = BN1(relu(proj) + res1)            (per-lane affine)
#   h    = relu(F1(flatten(x1)))   via n_seg accumulated (B,32)@(32,d_ff) matmuls
#   out  = BN2(relu(F2(h)).view + x1)  written per l8 row-group
# Everything stays in the (l8*B + b, channel) layout; F1/F2/F weights were permuted
# at init so no transposes are needed inside the kernel.
# -----------------------------------------------------------------------------
def _probattn_epilogue_kernel(attn_ref, res1_ref, wo_ref, bo_ref,
                              s1_ref, t1_ref, w1_ref, b1_ref,
                              w2_ref, b2_ref, s2_ref, t2_ref, o_ref):
    n_seg, _, d_ff = w1_ref.shape
    bsz = attn_ref.shape[0] // n_seg

    proj = jnp.dot(attn_ref[...], wo_ref[...],
                   preferred_element_type=jnp.float32) + bo_ref[...]
    x1 = (jnp.maximum(proj, 0.0) + res1_ref[...]) * s1_ref[...] + t1_ref[...]

    h = jnp.zeros((bsz, d_ff), jnp.float32)
    for l in range(n_seg):                       # static unroll (datanum // 8 steps)
        h = h + jnp.dot(x1[l * bsz:(l + 1) * bsz, :], w1_ref[l],
                        preferred_element_type=jnp.float32)
    h = jnp.maximum(h + b1_ref[...], 0.0)

    for l in range(n_seg):
        g = jnp.dot(h, w2_ref[l], preferred_element_type=jnp.float32) + b2_ref[l]
        y = (jnp.maximum(g, 0.0) + x1[l * bsz:(l + 1) * bsz, :]) * s2_ref[...] + t2_ref[...]
        o_ref[l * bsz:(l + 1) * bsz, :] = y


def probattn_epilogue(attn_t, res1_t, d):
    args = (attn_t, res1_t, d["wo"], d["bo"], d["bn1_s"], d["bn1_t"],
            d["w1r"], d["b1"], d["w2r"], d["b2r"], d["bn2_s"], d["bn2_t"])
    M, C = attn_t.shape
    return pl.pallas_call(
        _probattn_epilogue_kernel,
        out_shape=jax.ShapeDtypeStruct((M, C), jnp.float32),
        grid=(1,),
        in_specs=[_full_spec(a.shape) for a in args],
        out_specs=_full_spec((M, C)),
    )(*args)


# -----------------------------------------------------------------------------
# Kernel 5: final Linear(datanum*4 -> datanum) taken directly from the transposed
# (l8*B + b, channel) layout (row-grouped matmuls against permuted F weights).
# -----------------------------------------------------------------------------
def _final_linear_kernel(x_ref, w_ref, b_ref, o_ref):
    n_seg = w_ref.shape[0]
    bsz = x_ref.shape[0] // n_seg
    acc = jnp.zeros((bsz, w_ref.shape[2]), jnp.float32)
    for l in range(n_seg):
        acc = acc + jnp.dot(x_ref[l * bsz:(l + 1) * bsz, :], w_ref[l],
                            preferred_element_type=jnp.float32)
    o_ref[...] = acc + b_ref[...]


def final_linear(x_t, w_r, b):
    n_seg = w_r.shape[0]
    bsz = x_t.shape[0] // n_seg
    n_out = w_r.shape[2]
    return pl.pallas_call(
        _final_linear_kernel,
        out_shape=jax.ShapeDtypeStruct((bsz, n_out), jnp.float32),
        grid=(1,),
        in_specs=[_full_spec(x_t.shape), _full_spec(w_r.shape), _full_spec(b.shape)],
        out_specs=_full_spec((bsz, n_out)),
    )(x_t, w_r, b)


# -----------------------------------------------------------------------------
# XLA glue: im2col patch extraction (gathers) and the tiny softmax attention.
# -----------------------------------------------------------------------------
def _im2col(x, k, stride=2):
    """PyTorch Conv1d(stride=2, padding=(k-2)//2) patches.
    x: (..., Cin, L) -> ((..., Lout, Cin*k), Lout)."""
    pad = (k - 2) // 2
    L = x.shape[-1]
    lout = (L + 2 * pad - k) // stride + 1
    xp = jnp.pad(x, [(0, 0)] * (x.ndim - 1) + [(pad, pad)])
    idx = jnp.arange(lout)[:, None] * stride + jnp.arange(k)[None, :]
    patches = jnp.moveaxis(xp[..., idx], -2, -3)          # (..., Lout, Cin, k)
    sh = patches.shape
    return patches.reshape(sh[:-2] + (sh[-2] * sh[-1],)), lout


def _dense_attention(qkv, n_seg, bsz, n_heads=8):
    # TODO(synk): ProbSparse top-u sampling of Informer's ProbAttention is not in the
    # spec; dense softmax attention with the same projections/scale is used (the
    # problem is toy-sized: seq len == 2, head dim == 4 -> left to XLA per review).
    d_model = qkv.shape[1] // 3
    dk = d_model // n_heads
    q = qkv[:, :d_model].reshape(n_seg, bsz, n_heads, dk)
    k = qkv[:, d_model:2 * d_model].reshape(n_seg, bsz, n_heads, dk)
    v = qkv[:, 2 * d_model:].reshape(n_seg, bsz, n_heads, dk)
    s = jnp.einsum("lbhd,lchd->lhbc", q, k, precision=HP) / math.sqrt(dk)
    a = jax.nn.softmax(s, axis=-1)
    o = jnp.einsum("lhbc,lchd->lbhd", a, v, precision=HP)
    return o.reshape(n_seg * bsz, d_model)


# -----------------------------------------------------------------------------
# Pallas forward
# -----------------------------------------------------------------------------
def forward_pallas(pp, x, *, datanum, batch):
    B = batch
    n_seg = datanum // 8
    nb = len(CONV_KERNELS)
    kmax = max(CONV_KERNELS)

    # ---- conv stage 1: 8 blocks batched into ONE pallas_call (grid over blocks) ----
    p1 = []
    for k in CONV_KERNELS:
        p, lout1 = _im2col(x, k)                                 # (B, 32, k)
        p1.append(jnp.pad(p.reshape(B * lout1, k), ((0, 0), (0, kmax - k))))
    patches1 = jnp.stack(p1)                                     # (8, B*32, 256)
    y1 = batched_conv_relu(patches1, pp["c1_w"], pp["c1_b"])     # (8, B*32, 128)
    y1 = y1[:, :, :4].reshape(nb, B, lout1, 4).transpose(0, 1, 3, 2)     # (8,B,4,32)

    # ---- conv stage 2 (identical shapes across blocks) ----
    p2, lout2 = _im2col(y1, K1)                                  # (8, B, 16, 96)
    patches2 = jnp.pad(p2.reshape(nb, B * lout2, 4 * K1), ((0, 0), (0, 0), (0, 32)))
    y2 = batched_conv_relu(patches2, pp["c2_w"], pp["c2_b"])     # (8, B*16, 128)
    y2 = y2[:, :, :16].reshape(nb, B, lout2, 16).transpose(0, 1, 3, 2)   # (8,B,16,16)

    # ---- conv stage 3, summed over the 8 blocks in-kernel ----
    p3, lout3 = _im2col(y2, K1)                                  # (8, B, 8, 384)
    patches3 = p3.reshape(nb, B * lout3, 16 * K1)
    ysum = batched_conv_relu_sum(patches3, pp["c3_w"], pp["c3_b"])[:, :32]  # (B*8, 32)

    # to the attention layout: rows = l8*B + b, cols = channel
    x_t = ysum.reshape(B, n_seg, 32).transpose(1, 0, 2).reshape(n_seg * B, 32)

    # ---- 4 probattn blocks: 2 pallas_calls each (fused QKV, fused epilogue) ----
    for d in pp["attn_blocks"]:
        qkv = matmul_bias(x_t, d["wqkv"], d["bqkv"])             # (n_seg*B, 128)
        attn_t = _dense_attention(qkv[:, :96], n_seg, B)         # XLA (tiny)
        x_t = probattn_epilogue(attn_t, x_t, d)                  # (n_seg*B, 32)

    # ---- final Linear(datanum*4 -> datanum) ----
    out = final_linear(x_t, pp["F_wr"], pp["F_b"])[:, :datanum]
    return out[:, None, :]                                       # unsqueeze(1)


# -----------------------------------------------------------------------------
# Init-time weight preprocessing (hoisted out of the jitted forward).
# -----------------------------------------------------------------------------
def preprocess_params(params, datanum, eps=1e-5):
    n_seg = datanum // 8
    d_ff = datanum * 8
    kmax = max(CONV_KERNELS)
    pp = {}

    def conv_wmat(w):                            # (Cout, Cin, k) -> (Cin*k, Cout)
        cout, cin, k = w.shape
        return jnp.transpose(w, (1, 2, 0)).reshape(cin * k, cout)

    def pad_to(a, rows, cols):
        return jnp.pad(a, ((0, rows - a.shape[0]), (0, cols - a.shape[1])))

    w1s, b1s, w2s, b2s, w3s, b3s = [], [], [], [], [], []
    for blk in params["conv_blocks"]:
        w1s.append(pad_to(conv_wmat(blk["w1"]), kmax, 128))
        b1s.append(jnp.pad(blk["b1"], (0, 128 - 4)).reshape(1, 128))
        w2s.append(pad_to(conv_wmat(blk["w2"]), 128, 128))
        b2s.append(jnp.pad(blk["b2"], (0, 128 - 16)).reshape(1, 128))
        w3s.append(pad_to(conv_wmat(blk["w3"]), 384, 128))
        b3s.append(jnp.pad(blk["b3"], (0, 128 - 32)).reshape(1, 128))
    pp["c1_w"], pp["c1_b"] = jnp.stack(w1s), jnp.stack(b1s)
    pp["c2_w"], pp["c2_b"] = jnp.stack(w2s), jnp.stack(b2s)
    pp["c3_w"], pp["c3_b"] = jnp.stack(w3s), jnp.stack(b3s)

    blocks = []
    for p in params["probattn"]:
        d = {}
        wqkv = jnp.concatenate([p["wq"], p["wk"], p["wv"]], axis=1)      # (32, 96)
        bqkv = jnp.concatenate([p["bq"], p["bk"], p["bv"]])              # (96,)
        d["wqkv"] = jnp.pad(wqkv, ((0, 0), (0, 32)))                     # (32, 128)
        d["bqkv"] = jnp.pad(bqkv, (0, 32)).reshape(1, 128)
        d["wo"] = p["wo"]
        d["bo"] = p["bo"].reshape(1, 32)
        s1 = p["bn1"]["gamma"] / jnp.sqrt(p["bn1"]["var"] + eps)
        d["bn1_s"] = s1.reshape(1, 32)
        d["bn1_t"] = (p["bn1"]["beta"] - p["bn1"]["mean"] * s1).reshape(1, 32)
        # F1 rows / F2 cols are indexed by channel*n_seg + l8 (torch.flatten(x,1,2));
        # regroup per l8 so the kernel consumes the (l8*B + b, channel) layout.
        d["w1r"] = jnp.transpose(p["f1_w"].reshape(32, n_seg, d_ff), (1, 0, 2))
        d["b1"] = p["f1_b"].reshape(1, d_ff)
        d["w2r"] = jnp.transpose(p["f2_w"].reshape(d_ff, 32, n_seg), (2, 0, 1))
        d["b2r"] = jnp.transpose(p["f2_b"].reshape(32, n_seg)).reshape(n_seg, 1, 32)
        s2 = p["bn2"]["gamma"] / jnp.sqrt(p["bn2"]["var"] + eps)
        d["bn2_s"] = s2.reshape(1, 32)
        d["bn2_t"] = (p["bn2"]["beta"] - p["bn2"]["mean"] * s2).reshape(1, 32)
        blocks.append(d)
    pp["attn_blocks"] = blocks

    n_out_pad = _round_up(datanum, 128)
    fwr = jnp.transpose(params["F_w"].reshape(32, n_seg, datanum), (1, 0, 2))
    pp["F_wr"] = jnp.pad(fwr, ((0, 0), (0, 0), (0, n_out_pad - datanum)))
    pp["F_b"] = jnp.pad(params["F_b"], (0, n_out_pad - datanum)).reshape(1, n_out_pad)
    return pp


# -----------------------------------------------------------------------------
# Pure-JAX reference (natural layouts, HIGHEST precision) for correctness check.
# -----------------------------------------------------------------------------
def _bn_eval(x, bn, eps=1e-5):
    s = bn["gamma"] / jnp.sqrt(bn["var"] + eps)
    return (x - bn["mean"][None, :, None]) * s[None, :, None] + bn["beta"][None, :, None]


def _conv1d_relu_ref(x, w, b):
    cin, k = w.shape[1], w.shape[2]
    patches, _ = _im2col(x, k)                                   # (B, Lout, Cin*k)
    wmat = jnp.transpose(w, (1, 2, 0)).reshape(cin * k, w.shape[0])
    y = jnp.maximum(jnp.einsum("blk,kc->blc", patches, wmat, precision=HP) + b, 0.0)
    return jnp.transpose(y, (0, 2, 1))


def _probattn_ref(p, x, n_heads=8):
    B, C, L8 = x.shape
    res1 = x
    xt = jnp.transpose(x, (2, 0, 1))                             # (L8, B, C)
    q = jnp.einsum("lbc,cd->lbd", xt, p["wq"], precision=HP) + p["bq"]
    k = jnp.einsum("lbc,cd->lbd", xt, p["wk"], precision=HP) + p["bk"]
    v = jnp.einsum("lbc,cd->lbd", xt, p["wv"], precision=HP) + p["bv"]
    dk = C // n_heads
    q4, k4, v4 = (t.reshape(L8, B, n_heads, dk) for t in (q, k, v))
    s = jnp.einsum("lbhd,lchd->lhbc", q4, k4, precision=HP) / math.sqrt(dk)
    a = jax.nn.softmax(s, axis=-1)
    o = jnp.einsum("lhbc,lchd->lbhd", a, v4, precision=HP).reshape(L8, B, C)
    o = jnp.einsum("lbc,cd->lbd", o, p["wo"], precision=HP) + p["bo"]
    o = jnp.maximum(o, 0.0)                                      # relu(dropout), eval
    x1 = _bn_eval(jnp.transpose(o, (1, 2, 0)) + res1, p["bn1"])
    h = x1.reshape(B, C * L8)
    h = jnp.maximum(jnp.dot(h, p["f1_w"], precision=HP) + p["f1_b"], 0.0)
    h = jnp.maximum(jnp.dot(h, p["f2_w"], precision=HP) + p["f2_b"], 0.0)
    return _bn_eval(h.reshape(B, C, L8) + x1, p["bn2"])


def forward_reference(params, x):
    feats = None
    for blk in params["conv_blocks"]:
        h = _conv1d_relu_ref(x, blk["w1"], blk["b1"])
        h = _conv1d_relu_ref(h, blk["w2"], blk["b2"])
        h = _conv1d_relu_ref(h, blk["w3"], blk["b3"])
        feats = h if feats is None else feats + h
    y = feats
    for p in params["probattn"]:
        y = _probattn_ref(p, y)
    B = y.shape[0]
    out = jnp.dot(y.reshape(B, -1), params["F_w"], precision=HP) + params["F_b"]
    return out[:, None, :]


# -----------------------------------------------------------------------------
# Parameter construction (PyTorch-style uniform fan-in init; BN running stats).
# -----------------------------------------------------------------------------
def _init_linear(key, fan_in, fan_out):
    kw, kb = jax.random.split(key)
    bound = 1.0 / math.sqrt(fan_in)
    w = jax.random.uniform(kw, (fan_in, fan_out), jnp.float32, -bound, bound)
    b = jax.random.uniform(kb, (fan_out,), jnp.float32, -bound, bound)
    return w, b


def _init_conv(key, cin, cout, k):
    kw, kb = jax.random.split(key)
    bound = 1.0 / math.sqrt(cin * k)
    w = jax.random.uniform(kw, (cout, cin, k), jnp.float32, -bound, bound)
    b = jax.random.uniform(kb, (cout,), jnp.float32, -bound, bound)
    return w, b


def _init_bn(c):
    return dict(gamma=jnp.ones((c,), jnp.float32), beta=jnp.zeros((c,), jnp.float32),
                mean=jnp.zeros((c,), jnp.float32), var=jnp.ones((c,), jnp.float32))


def init_params(key, datanum):
    keys = iter(jax.random.split(key, 3 * len(CONV_KERNELS) + 6 * 4 + 1))
    conv_blocks = []
    for k in CONV_KERNELS:
        blk = {}
        blk["w1"], blk["b1"] = _init_conv(next(keys), 1, 4, k)
        blk["w2"], blk["b2"] = _init_conv(next(keys), 4, 16, K1)
        blk["w3"], blk["b3"] = _init_conv(next(keys), 16, 32, K1)
        conv_blocks.append(blk)
    probattn = []
    for _ in range(4):
        p = {}
        p["wq"], p["bq"] = _init_linear(next(keys), 32, 32)
        p["wk"], p["bk"] = _init_linear(next(keys), 32, 32)
        p["wv"], p["bv"] = _init_linear(next(keys), 32, 32)
        p["wo"], p["bo"] = _init_linear(next(keys), 32, 32)
        p["f1_w"], p["f1_b"] = _init_linear(next(keys), datanum * 4, datanum * 8)
        p["f2_w"], p["f2_b"] = _init_linear(next(keys), datanum * 8, datanum * 4)
        p["bn1"] = _init_bn(32)
        p["bn2"] = _init_bn(32)
        probattn.append(p)
    params = dict(conv_blocks=conv_blocks, probattn=probattn)
    params["F_w"], params["F_b"] = _init_linear(next(keys), datanum * 4, datanum)
    return params


if __name__ == "__main__":
    datanum = 64            # input length; conv-stack output length = datanum // 8 = 8
    batch = 2

    key = jax.random.PRNGKey(0)
    k_params, k_x = jax.random.split(key)
    params = init_params(k_params, datanum)
    x = jax.random.normal(k_x, (batch, 1, datanum), dtype=jnp.float32)

    # All weight-side preprocessing runs once here, outside the jitted forward.
    pp = preprocess_params(params, datanum)

    fwd = jax.jit(functools.partial(forward_pallas, datanum=datanum, batch=batch))
    out = jax.block_until_ready(fwd(pp, x))
    assert out.shape == (batch, 1, datanum), out.shape

    ref = jax.block_until_ready(jax.jit(forward_reference)(params, x))
    np.testing.assert_allclose(np.asarray(out), np.asarray(ref), rtol=2e-2, atol=2e-2)

    print("KERNEL_OK")
</pallas_src>

<mosaic_0001>
module attributes {stable_mosaic.version = 11 : i64} {
  func.func @_bconv_relu_kernel(%arg0: i32, %arg1: memref<1x64x256xf32, #tpu.memory_space<vmem>>, %arg2: memref<1x256x128xf32, #tpu.memory_space<vmem>>, %arg3: memref<1x1x128xf32, #tpu.memory_space<vmem>>, %arg4: memref<1x64x128xf32, #tpu.memory_space<vmem>>) attributes {dimension_semantics = [#tpu.dimension_semantics<parallel>], iteration_bounds = array<i64: 8>, scalar_prefetch = 0 : i64, scratch_operands = 0 : i64, tpu.core_type = #tpu.core_type<tc>, window_params = [{transform_indices = @transform_0, window_bounds = array<i64: 1, 64, 256>}, {transform_indices = @transform_1, window_bounds = array<i64: 1, 256, 128>}, {transform_indices = @transform_2, window_bounds = array<i64: 1, 1, 128>}, {transform_indices = @transform_3, window_bounds = array<i64: 1, 64, 128>}]} {
    %c0 = arith.constant 0 : index
    %c0_0 = arith.constant 0 : index
    %c0_1 = arith.constant 0 : index
    %0 = vector.load %arg1[%c0, %c0_0, %c0_1] : memref<1x64x256xf32, #tpu.memory_space<vmem>>, vector<1x64x256xf32>
    %1 = vector.shape_cast %0 : vector<1x64x256xf32> to vector<64x256xf32>
    %c0_2 = arith.constant 0 : index
    %c0_3 = arith.constant 0 : index
    %c0_4 = arith.constant 0 : index
    %2 = vector.load %arg2[%c0_2, %c0_3, %c0_4] : memref<1x256x128xf32, #tpu.memory_space<vmem>>, vector<1x256x128xf32>
    %3 = vector.shape_cast %2 : vector<1x256x128xf32> to vector<256x128xf32>
    %cst = arith.constant dense<0.000000e+00> : vector<64x128xf32>
    %4 = tpu.matmul %1, %3, %cst {dimension_numbers = #tpu.dot_dimension_numbers<[1], [0], [0], [1], [0, 0, 1, 1], [], []>} : vector<64x256xf32>, vector<256x128xf32>, vector<64x128xf32> -> vector<64x128xf32>
    %c0_5 = arith.constant 0 : index
    %c0_6 = arith.constant 0 : index
    %c0_7 = arith.constant 0 : index
    %5 = vector.load %arg3[%c0_5, %c0_6, %c0_7] : memref<1x1x128xf32, #tpu.memory_space<vmem>>, vector<1x1x128xf32>
    %6 = vector.shape_cast %5 : vector<1x1x128xf32> to vector<1x128xf32>
    %7 = vector.broadcast %6 : vector<1x128xf32> to vector<64x128xf32>
    %8 = arith.addf %4, %7 : vector<64x128xf32>
    %cst_8 = arith.constant 0.000000e+00 : f32
    %9 = vector.broadcast %cst_8 : f32 to vector<64x128xf32>
    %10 = arith.maximumf %8, %9 : vector<64x128xf32>
    %c0_9 = arith.constant 0 : index
    %c0_10 = arith.constant 0 : index
    %c0_11 = arith.constant 0 : index
    %11 = vector.load %arg4[%c0_9, %c0_10, %c0_11] : memref<1x64x128xf32, #tpu.memory_space<vmem>>, vector<1x64x128xf32>
    %12 = vector.shape_cast %11 : vector<1x64x128xf32> to vector<64x128xf32>
    %13 = vector.shape_cast %10 : vector<64x128xf32> to vector<1x64x128xf32>
    tpu.vector_store %arg4[%c0_9, %c0_10, %c0_11], %13 {strides = array<i32>} : memref<1x64x128xf32, #tpu.memory_space<vmem>>, vector<1x64x128xf32>,
    return
  }
  func.func @transform_0(%arg0: i32) -> (i32, i32, i32) {
    %c0_i32 = arith.constant 0 : i32
    %c0_i32_0 = arith.constant 0 : i32
    %c0_i32_1 = arith.constant 0 : i32
    return %arg0, %c0_i32, %c0_i32_0 : i32, i32, i32
  }
  func.func @transform_1(%arg0: i32) -> (i32, i32, i32) {
    %c0_i32 = arith.constant 0 : i32
    %c0_i32_0 = arith.constant 0 : i32
    %c0_i32_1 = arith.constant 0 : i32
    return %arg0, %c0_i32, %c0_i32_0 : i32, i32, i32
  }
  func.func @transform_2(%arg0: i32) -> (i32, i32, i32) {
    %c0_i32 = arith.constant 0 : i32
    %c0_i32_0 = arith.constant 0 : i32
    %c0_i32_1 = arith.constant 0 : i32
    return %arg0, %c0_i32, %c0_i32_0 : i32, i32, i32
  }
  func.func @transform_3(%arg0: i32) -> (i32, i32, i32) {
    %c0_i32 = arith.constant 0 : i32
    %c0_i32_0 = arith.constant 0 : i32
    %c0_i32_1 = arith.constant 0 : i32
    return %arg0, %c0_i32, %c0_i32_0 : i32, i32, i32
  }
}

module attributes {stable_mosaic.version = 11 : i64} {
  func.func @_bconv_relu_kernel(%arg0: i32, %arg1: memref<1x32x128xf32, #tpu.memory_space<vmem>>, %arg2: memref<1x128x128xf32, #tpu.memory_space<vmem>>, %arg3: memref<1x1x128xf32, #tpu.memory_space<vmem>>, %arg4: memref<1x32x128xf32, #tpu.memory_space<vmem>>) attributes {dimension_semantics = [#tpu.dimension_semantics<parallel>], iteration_bounds = array<i64: 8>, scalar_prefetch = 0 : i64, scratch_operands = 0 : i64, tpu.core_type = #tpu.core_type<tc>, window_params = [{transform_indices = @transform_0, window_bounds = array<i64: 1, 32, 128>}, {transform_indices = @transform_1, window_bounds = array<i64: 1, 128, 128>}, {transform_indices = @transform_2, window_bounds = array<i64: 1, 1, 128>}, {transform_indices = @transform_3, window_bounds = array<i64: 1, 32, 128>}]} {
    %c0 = arith.constant 0 : index
    %c0_0 = arith.constant 0 : index
    %c0_1 = arith.constant 0 : index
    %0 = vector.load %arg1[%c0, %c0_0, %c0_1] : memref<1x32x128xf32, #tpu.memory_space<vmem>>, vector<1x32x128xf32>
    %1 = vector.shape_cast %0 : vector<1x32x128xf32> to vector<32x128xf32>
    %c0_2 = arith.constant 0 : index
    %c0_3 = arith.constant 0 : index
    %c0_4 = arith.constant 0 : index
    %2 = vector.load %arg2[%c0_2, %c0_3, %c0_4] : memref<1x128x128xf32, #tpu.memory_space<vmem>>, vector<1x128x128xf32>
    %3 = vector.shape_cast %2 : vector<1x128x128xf32> to vector<128x128xf32>
    %cst = arith.constant dense<0.000000e+00> : vector<32x128xf32>
    %4 = tpu.matmul %1, %3, %cst {dimension_numbers = #tpu.dot_dimension_numbers<[1], [0], [0], [1], [0, 0, 1, 1], [], []>} : vector<32x128xf32>, vector<128x128xf32>, vector<32x128xf32> -> vector<32x128xf32>
    %c0_5 = arith.constant 0 : index
    %c0_6 = arith.constant 0 : index
    %c0_7 = arith.constant 0 : index
    %5 = vector.load %arg3[%c0_5, %c0_6, %c0_7] : memref<1x1x128xf32, #tpu.memory_space<vmem>>, vector<1x1x128xf32>
    %6 = vector.shape_cast %5 : vector<1x1x128xf32> to vector<1x128xf32>
    %7 = vector.broadcast %6 : vector<1x128xf32> to vector<32x128xf32>
    %8 = arith.addf %4, %7 : vector<32x128xf32>
    %cst_8 = arith.constant 0.000000e+00 : f32
    %9 = vector.broadcast %cst_8 : f32 to vector<32x128xf32>
    %10 = arith.maximumf %8, %9 : vector<32x128xf32>
    %c0_9 = arith.constant 0 : index
    %c0_10 = arith.constant 0 : index
    %c0_11 = arith.constant 0 : index
    %11 = vector.load %arg4[%c0_9, %c0_10, %c0_11] : memref<1x32x128xf32, #tpu.memory_space<vmem>>, vector<1x32x128xf32>
    %12 = vector.shape_cast %11 : vector<1x32x128xf32> to vector<32x128xf32>
    %13 = vector.shape_cast %10 : vector<32x128xf32> to vector<1x32x128xf32>
    tpu.vector_store %arg4[%c0_9, %c0_10, %c0_11], %13 {strides = array<i32>} : memref<1x32x128xf32, #tpu.memory_space<vmem>>, vector<1x32x128xf32>,
    return
  }
  func.func @transform_0(%arg0: i32) -> (i32, i32, i32) {
    %c0_i32 = arith.constant 0 : i32
    %c0_i32_0 = arith.constant 0 : i32
    %c0_i32_1 = arith.constant 0 : i32
    return %arg0, %c0_i32, %c0_i32_0 : i32, i32, i32
  }
  func.func @transform_1(%arg0: i32) -> (i32, i32, i32) {
    %c0_i32 = arith.constant 0 : i32
    %c0_i32_0 = arith.constant 0 : i32
    %c0_i32_1 = arith.constant 0 : i32
    return %arg0, %c0_i32, %c0_i32_0 : i32, i32, i32
  }
  func.func @transform_2(%arg0: i32) -> (i32, i32, i32) {
    %c0_i32 = arith.constant 0 : i32
    %c0_i32_0 = arith.constant 0 : i32
    %c0_i32_1 = arith.constant 0 : i32
    return %arg0, %c0_i32, %c0_i32_0 : i32, i32, i32
  }
  func.func @transform_3(%arg0: i32) -> (i32, i32, i32) {
    %c0_i32 = arith.constant 0 : i32
    %c0_i32_0 = arith.constant 0 : i32
    %c0_i32_1 = arith.constant 0 : i32
    return %arg0, %c0_i32, %c0_i32_0 : i32, i32, i32
  }
}

module attributes {stable_mosaic.version = 11 : i64} {
  func.func @_bconv_relu_sum_kernel(%arg0: i32, %arg1: memref<1x16x384xf32, #tpu.memory_space<vmem>>, %arg2: memref<1x384x128xf32, #tpu.memory_space<vmem>>, %arg3: memref<1x1x128xf32, #tpu.memory_space<vmem>>, %arg4: memref<16x128xf32, #tpu.memory_space<vmem>>) attributes {dimension_semantics = [#tpu.dimension_semantics<arbitrary>], iteration_bounds = array<i64: 8>, scalar_prefetch = 0 : i64, scratch_operands = 0 : i64, tpu.core_type = #tpu.core_type<tc>, window_params = [{transform_indices = @transform_0, window_bounds = array<i64: 1, 16, 384>}, {transform_indices = @transform_1, window_bounds = array<i64: 1, 384, 128>}, {transform_indices = @transform_2, window_bounds = array<i64: 1, 1, 128>}, {pipeline_mode = #tpu.pipeline_mode<synchronous>, transform_indices = @transform_3, window_bounds = array<i64: 16, 128>}]} {
    %c0_i32 = arith.constant 0 : i32
    %0 = arith.cmpi eq, %arg0, %c0_i32 : i32
    %1 = arith.extui %0 : i1 to i32
    %c0_i32_0 = arith.constant 0 : i32
    %2 = arith.cmpi ne, %1, %c0_i32_0 : i32
    scf.if %2 {
      %cst_14 = arith.constant 0.000000e+00 : f32
      %17 = vector.broadcast %cst_14 : f32 to vector<16x128xf32>
      %c0_15 = arith.constant 0 : index
      %c0_16 = arith.constant 0 : index
      %18 = vector.load %arg4[%c0_15, %c0_16] : memref<16x128xf32, #tpu.memory_space<vmem>>, vector<16x128xf32>
      tpu.vector_store %arg4[%c0_15, %c0_16], %17 {strides = array<i32>} : memref<16x128xf32, #tpu.memory_space<vmem>>, vector<16x128xf32>,
    } else {
    }
    %c0 = arith.constant 0 : index
    %c0_1 = arith.constant 0 : index
    %c0_2 = arith.constant 0 : index
    %3 = vector.load %arg1[%c0, %c0_1, %c0_2] : memref<1x16x384xf32, #tpu.memory_space<vmem>>, vector<1x16x384xf32>
    %4 = vector.shape_cast %3 : vector<1x16x384xf32> to vector<16x384xf32>
    %c0_3 = arith.constant 0 : index
    %c0_4 = arith.constant 0 : index
    %c0_5 = arith.constant 0 : index
    %5 = vector.load %arg2[%c0_3, %c0_4, %c0_5] : memref<1x384x128xf32, #tpu.memory_space<vmem>>, vector<1x384x128xf32>
    %6 = vector.shape_cast %5 : vector<1x384x128xf32> to vector<384x128xf32>
    %cst = arith.constant dense<0.000000e+00> : vector<16x128xf32>
    %7 = tpu.matmul %4, %6, %cst {dimension_numbers = #tpu.dot_dimension_numbers<[1], [0], [0], [1], [0, 0, 1, 1], [], []>} : vector<16x384xf32>, vector<384x128xf32>, vector<16x128xf32> -> vector<16x128xf32>
    %c0_6 = arith.constant 0 : index
    %c0_7 = arith.constant 0 : index
    %c0_8 = arith.constant 0 : index
    %8 = vector.load %arg3[%c0_6, %c0_7, %c0_8] : memref<1x1x128xf32, #tpu.memory_space<vmem>>, vector<1x1x128xf32>
    %9 = vector.shape_cast %8 : vector<1x1x128xf32> to vector<1x128xf32>
    %10 = vector.broadcast %9 : vector<1x128xf32> to vector<16x128xf32>
    %11 = arith.addf %7, %10 : vector<16x128xf32>
    %c0_9 = arith.constant 0 : index
    %c0_10 = arith.constant 0 : index
    %12 = vector.load %arg4[%c0_9, %c0_10] : memref<16x128xf32, #tpu.memory_space<vmem>>, vector<16x128xf32>
    %cst_11 = arith.constant 0.000000e+00 : f32
    %13 = vector.broadcast %cst_11 : f32 to vector<16x128xf32>
    %14 = arith.maximumf %11, %13 : vector<16x128xf32>
    %15 = arith.addf %12, %14 : vector<16x128xf32>
    %c0_12 = arith.constant 0 : index
    %c0_13 = arith.constant 0 : index
    %16 = vector.load %arg4[%c0_12, %c0_13] : memref<16x128xf32, #tpu.memory_space<vmem>>, vector<16x128xf32>
    tpu.vector_store %arg4[%c0_12, %c0_13], %15 {strides = array<i32>} : memref<16x128xf32, #tpu.memory_space<vmem>>, vector<16x128xf32>,
    return
  }
  func.func @transform_0(%arg0: i32) -> (i32, i32, i32) {
    %c0_i32 = arith.constant 0 : i32
    %c0_i32_0 = arith.constant 0 : i32
    %c0_i32_1 = arith.constant 0 : i32
    return %arg0, %c0_i32, %c0_i32_0 : i32, i32, i32
  }
  func.func @transform_1(%arg0: i32) -> (i32, i32, i32) {
    %c0_i32 = arith.constant 0 : i32
    %c0_i32_0 = arith.constant 0 : i32
    %c0_i32_1 = arith.constant 0 : i32
    return %arg0, %c0_i32, %c0_i32_0 : i32, i32, i32
  }
  func.func @transform_2(%arg0: i32) -> (i32, i32, i32) {
    %c0_i32 = arith.constant 0 : i32
    %c0_i32_0 = arith.constant 0 : i32
    %c0_i32_1 = arith.constant 0 : i32
    return %arg0, %c0_i32, %c0_i32_0 : i32, i32, i32
  }
  func.func @transform_3(%arg0: i32) -> (i32, i32) {
    %c0_i32 = arith.constant 0 : i32
    %c0_i32_0 = arith.constant 0 : i32
    %c0_i32_1 = arith.constant 0 : i32
    return %c0_i32, %c0_i32_0 : i32, i32
  }
}

module attributes {stable_mosaic.version = 11 : i64} {
  func.func @_matmul_bias_kernel(%arg0: i32, %arg1: memref<16x32xf32, #tpu.memory_space<vmem>>, %arg2: memref<32x128xf32, #tpu.memory_space<vmem>>, %arg3: memref<1x128xf32, #tpu.memory_space<vmem>>, %arg4: memref<16x128xf32, #tpu.memory_space<vmem>>) attributes {dimension_semantics = [#tpu.dimension_semantics<arbitrary>], iteration_bounds = array<i64: 1>, scalar_prefetch = 0 : i64, scratch_operands = 0 : i64, tpu.core_type = #tpu.core_type<tc>, window_params = [{pipeline_mode = #tpu.pipeline_mode<synchronous>, transform_indices = @transform_0, window_bounds = array<i64: 16, 32>}, {pipeline_mode = #tpu.pipeline_mode<synchronous>, transform_indices = @transform_1, window_bounds = array<i64: 32, 128>}, {pipeline_mode = #tpu.pipeline_mode<synchronous>, transform_indices = @transform_2, window_bounds = array<i64: 1, 128>}, {pipeline_mode = #tpu.pipeline_mode<synchronous>, transform_indices = @transform_3, window_bounds = array<i64: 16, 128>}]} {
    %c0 = arith.constant 0 : index
    %c0_0 = arith.constant 0 : index
    %0 = vector.load %arg1[%c0, %c0_0] : memref<16x32xf32, #tpu.memory_space<vmem>>, vector<16x32xf32>
    %c0_1 = arith.constant 0 : index
    %c0_2 = arith.constant 0 : index
    %1 = vector.load %arg2[%c0_1, %c0_2] : memref<32x128xf32, #tpu.memory_space<vmem>>, vector<32x128xf32>
    %cst = arith.constant dense<0.000000e+00> : vector<16x128xf32>
    %2 = tpu.matmul %0, %1, %cst {dimension_numbers = #tpu.dot_dimension_numbers<[1], [0], [0], [1], [0, 0, 1, 1], [], []>} : vector<16x32xf32>, vector<32x128xf32>, vector<16x128xf32> -> vector<16x128xf32>
    %c0_3 = arith.constant 0 : index
    %c0_4 = arith.constant 0 : index
    %3 = vector.load %arg3[%c0_3, %c0_4] : memref<1x128xf32, #tpu.memory_space<vmem>>, vector<1x128xf32>
    %4 = vector.broadcast %3 : vector<1x128xf32> to vector<16x128xf32>
    %5 = arith.addf %2, %4 : vector<16x128xf32>
    %c0_5 = arith.constant 0 : index
    %c0_6 = arith.constant 0 : index
    %6 = vector.load %arg4[%c0_5, %c0_6] : memref<16x128xf32, #tpu.memory_space<vmem>>, vector<16x128xf32>
    tpu.vector_store %arg4[%c0_5, %c0_6], %5 {strides = array<i32>} : memref<16x128xf32, #tpu.memory_space<vmem>>, vector<16x128xf32>,
    return
  }
  func.func @transform_0(%arg0: i32) -> (i32, i32) {
    %c0_i32 = arith.constant 0 : i32
    %c0_i32_0 = arith.constant 0 : i32
    %c0_i32_1 = arith.constant 0 : i32
    return %c0_i32, %c0_i32_0 : i32, i32
  }
  func.func @transform_1(%arg0: i32) -> (i32, i32) {
    %c0_i32 = arith.constant 0 : i32
    %c0_i32_0 = arith.constant 0 : i32
    %c0_i32_1 = arith.constant 0 : i32
    return %c0_i32, %c0_i32_0 : i32, i32
  }
  func.func @transform_2(%arg0: i32) -> (i32, i32) {
    %c0_i32 = arith.constant 0 : i32
    %c0_i32_0 = arith.constant 0 : i32
    %c0_i32_1 = arith.constant 0 : i32
    return %c0_i32, %c0_i32_0 : i32, i32
  }
  func.func @transform_3(%arg0: i32) -> (i32, i32) {
    %c0_i32 = arith.constant 0 : i32
    %c0_i32_0 = arith.constant 0 : i32
    %c0_i32_1 = arith.constant 0 : i32
    return %c0_i32, %c0_i32_0 : i32, i32
  }
}

module attributes {stable_mosaic.version = 11 : i64} {
  func.func @_probattn_epilogue_kernel(%arg0: i32, %arg1: memref<16x32xf32, #tpu.memory_space<vmem>>, %arg2: memref<16x32xf32, #tpu.memory_space<vmem>>, %arg3: memref<32x32xf32, #tpu.memory_space<vmem>>, %arg4: memref<1x32xf32, #tpu.memory_space<vmem>>, %arg5: memref<1x32xf32, #tpu.memory_space<vmem>>, %arg6: memref<1x32xf32, #tpu.memory_space<vmem>>, %arg7: memref<8x32x512xf32, #tpu.memory_space<vmem>>, %arg8: memref<1x512xf32, #tpu.memory_space<vmem>>, %arg9: memref<8x512x32xf32, #tpu.memory_space<vmem>>, %arg10: memref<8x1x32xf32, #tpu.memory_space<vmem>>, %arg11: memref<1x32xf32, #tpu.memory_space<vmem>>, %arg12: memref<1x32xf32, #tpu.memory_space<vmem>>, %arg13: memref<16x32xf32, #tpu.memory_space<vmem>>) attributes {dimension_semantics = [#tpu.dimension_semantics<arbitrary>], iteration_bounds = array<i64: 1>, scalar_prefetch = 0 : i64, scratch_operands = 0 : i64, tpu.core_type = #tpu.core_type<tc>, window_params = [{pipeline_mode = #tpu.pipeline_mode<synchronous>, transform_indices = @transform_0, window_bounds = array<i64: 16, 32>}, {pipeline_mode = #tpu.pipeline_mode<synchronous>, transform_indices = @transform_1, window_bounds = array<i64: 16, 32>}, {pipeline_mode = #tpu.pipeline_mode<synchronous>, transform_indices = @transform_2, window_bounds = array<i64: 32, 32>}, {pipeline_mode = #tpu.pipeline_mode<synchronous>, transform_indices = @transform_3, window_bounds = array<i64: 1, 32>}, {pipeline_mode = #tpu.pipeline_mode<synchronous>, transform_indices = @transform_4, window_bounds = array<i64: 1, 32>}, {pipeline_mode = #tpu.pipeline_mode<synchronous>, transform_indices = @transform_5, window_bounds = array<i64: 1, 32>}, {pipeline_mode = #tpu.pipeline_mode<synchronous>, transform_indices = @transform_6, window_bounds = array<i64: 8, 32, 512>}, {pipeline_mode = #tpu.pipeline_mode<synchronous>, transform_indices = @transform_7, window_bounds = array<i64: 1, 512>}, {pipeline_mode = #tpu.pipeline_mode<synchronous>, transform_indices = @transform_8, window_bounds = array<i64: 8, 512, 32>}, {pipeline_mode = #tpu.pipeline_mode<synchronous>, transform_indices = @transform_9, window_bounds = array<i64: 8, 1, 32>}, {pipeline_mode = #tpu.pipeline_mode<synchronous>, transform_indices = @transform_10, window_bounds = array<i64: 1, 32>}, {pipeline_mode = #tpu.pipeline_mode<synchronous>, transform_indices = @transform_11, window_bounds = array<i64: 1, 32>}, {pipeline_mode = #tpu.pipeline_mode<synchronous>, transform_indices = @transform_12, window_bounds = array<i64: 16, 32>}]} {
    %c0 = arith.constant 0 : index
    %c0_0 = arith.constant 0 : index
    %0 = vector.load %arg1[%c0, %c0_0] : memref<16x32xf32, #tpu.memory_space<vmem>>, vector<16x32xf32>
    %c0_1 = arith.constant 0 : index
    %c0_2 = arith.constant 0 : index
    %1 = vector.load %arg3[%c0_1, %c0_2] : memref<32x32xf32, #tpu.memory_space<vmem>>, vector<32x32xf32>
    %cst = arith.constant dense<0.000000e+00> : vector<16x32xf32>
    %2 = tpu.matmul %0, %1, %cst {dimension_numbers = #tpu.dot_dimension_numbers<[1], [0], [0], [1], [0, 0, 1, 1], [], []>} : vector<16x32xf32>, vector<32x32xf32>, vector<16x32xf32> -> vector<16x32xf32>
    %c0_3 = arith.constant 0 : index
    %c0_4 = arith.constant 0 : index
    %3 = vector.load %arg4[%c0_3, %c0_4] : memref<1x32xf32, #tpu.memory_space<vmem>>, vector<1x32xf32>
    %4 = vector.broadcast %3 : vector<1x32xf32> to vector<16x32xf32>
    %5 = arith.addf %2, %4 : vector<16x32xf32>
    %cst_5 = arith.constant 0.000000e+00 : f32
    %6 = vector.broadcast %cst_5 : f32 to vector<16x32xf32>
    %7 = arith.maximumf %5, %6 : vector<16x32xf32>
    %c0_6 = arith.constant 0 : index
    %c0_7 = arith.constant 0 : index
    %8 = vector.load %arg2[%c0_6, %c0_7] : memref<16x32xf32, #tpu.memory_space<vmem>>, vector<16x32xf32>
    %9 = arith.addf %7, %8 : vector<16x32xf32>
    %c0_8 = arith.constant 0 : index
    %c0_9 = arith.constant 0 : index
    %10 = vector.load %arg5[%c0_8, %c0_9] : memref<1x32xf32, #tpu.memory_space<vmem>>, vector<1x32xf32>
    %11 = vector.broadcast %10 : vector<1x32xf32> to vector<16x32xf32>
    %12 = arith.mulf %9, %11 : vector<16x32xf32>
    %c0_10 = arith.constant 0 : index
    %c0_11 = arith.constant 0 : index
    %13 = vector.load %arg6[%c0_10, %c0_11] : memref<1x32xf32, #tpu.memory_space<vmem>>, vector<1x32xf32>
    %14 = vector.broadcast %13 : vector<1x32xf32> to vector<16x32xf32>
    %15 = arith.addf %12, %14 : vector<16x32xf32>
    %cst_12 = arith.constant 0.000000e+00 : f32
    %16 = vector.broadcast %cst_12 : f32 to vector<2x512xf32>
    %17 = vector.extract_strided_slice %15 {offsets = [0, 0], sizes = [2, 32], strides = [1, 1]} : vector<16x32xf32> to vector<2x32xf32>
    %c0_13 = arith.constant 0 : index
    %c0_14 = arith.constant 0 : index
    %c0_15 = arith.constant 0 : index
    %18 = vector.load %arg7[%c0_13, %c0_14, %c0_15] : memref<8x32x512xf32, #tpu.memory_space<vmem>>, vector<1x32x512xf32>
    %19 = vector.shape_cast %18 : vector<1x32x512xf32> to vector<32x512xf32>
    %cst_16 = arith.constant dense<0.000000e+00> : vector<2x512xf32>
    %20 = tpu.matmul %17, %19, %cst_16 {dimension_numbers = #tpu.dot_dimension_numbers<[1], [0], [0], [1], [0, 0, 1, 1], [], []>} : vector<2x32xf32>, vector<32x512xf32>, vector<2x512xf32> -> vector<2x512xf32>
    %21 = arith.addf %16, %20 : vector<2x512xf32>
    %22 = vector.extract_strided_slice %15 {offsets = [2, 0], sizes = [2, 32], strides = [1, 1]} : vector<16x32xf32> to vector<2x32xf32>
    %c1 = arith.constant 1 : index
    %c0_17 = arith.constant 0 : index
    %c0_18 = arith.constant 0 : index
    %23 = vector.load %arg7[%c1, %c0_17, %c0_18] : memref<8x32x512xf32, #tpu.memory_space<vmem>>, vector<1x32x512xf32>
    %24 = vector.shape_cast %23 : vector<1x32x512xf32> to vector<32x512xf32>
    %cst_19 = arith.constant dense<0.000000e+00> : vector<2x512xf32>
    %25 = tpu.matmul %22, %24, %cst_19 {dimension_numbers = #tpu.dot_dimension_numbers<[1], [0], [0], [1], [0, 0, 1, 1], [], []>} : vector<2x32xf32>, vector<32x512xf32>, vector<2x512xf32> -> vector<2x512xf32>
    %26 = arith.addf %21, %25 : vector<2x512xf32>
    %27 = vector.extract_strided_slice %15 {offsets = [4, 0], sizes = [2, 32], strides = [1, 1]} : vector<16x32xf32> to vector<2x32xf32>
    %c2 = arith.constant 2 : index
    %c0_20 = arith.constant 0 : index
    %c0_21 = arith.constant 0 : index
    %28 = vector.load %arg7[%c2, %c0_20, %c0_21] : memref<8x32x512xf32, #tpu.memory_space<vmem>>, vector<1x32x512xf32>
    %29 = vector.shape_cast %28 : vector<1x32x512xf32> to vector<32x512xf32>
    %cst_22 = arith.constant dense<0.000000e+00> : vector<2x512xf32>
    %30 = tpu.matmul %27, %29, %cst_22 {dimension_numbers = #tpu.dot_dimension_numbers<[1], [0], [0], [1], [0, 0, 1, 1], [], []>} : vector<2x32xf32>, vector<32x512xf32>, vector<2x512xf32> -> vector<2x512xf32>
    %31 = arith.addf %26, %30 : vector<2x512xf32>
    %32 = vector.extract_strided_slice %15 {offsets = [6, 0], sizes = [2, 32], strides = [1, 1]} : vector<16x32xf32> to vector<2x32xf32>
    %c3 = arith.constant 3 : index
    %c0_23 = arith.constant 0 : index
    %c0_24 = arith.constant 0 : index
    %33 = vector.load %arg7[%c3, %c0_23, %c0_24] : memref<8x32x512xf32, #tpu.memory_space<vmem>>, vector<1x32x512xf32>
    %34 = vector.shape_cast %33 : vector<1x32x512xf32> to vector<32x512xf32>
    %cst_25 = arith.constant dense<0.000000e+00> : vector<2x512xf32>
    %35 = tpu.matmul %32, %34, %cst_25 {dimension_numbers = #tpu.dot_dimension_numbers<[1], [0], [0], [1], [0, 0, 1, 1], [], []>} : vector<2x32xf32>, vector<32x512xf32>, vector<2x512xf32> -> vector<2x512xf32>
    %36 = arith.addf %31, %35 : vector<2x512xf32>
    %37 = vector.extract_strided_slice %15 {offsets = [8, 0], sizes = [2, 32], strides = [1, 1]} : vector<16x32xf32> to vector<2x32xf32>
    %c4 = arith.constant 4 : index
    %c0_26 = arith.constant 0 : index
    %c0_27 = arith.constant 0 : index
    %38 = vector.load %arg7[%c4, %c0_26, %c0_27] : memref<8x32x512xf32, #tpu.memory_space<vmem>>, vector<1x32x512xf32>
    %39 = vector.shape_cast %38 : vector<1x32x512xf32> to vector<32x512xf32>
    %cst_28 = arith.constant dense<0.000000e+00> : vector<2x512xf32>
    %40 = tpu.matmul %37, %39, %cst_28 {dimension_numbers = #tpu.dot_dimension_numbers<[1], [0], [0], [1], [0, 0, 1, 1], [], []>} : vector<2x32xf32>, vector<32x512xf32>, vector<2x512xf32> -> vector<2x512xf32>
    %41 = arith.addf %36, %40 : vector<2x512xf32>
    %42 = vector.extract_strided_slice %15 {offsets = [10, 0], sizes = [2, 32], strides = [1, 1]} : vector<16x32xf32> to vector<2x32xf32>
    %c5 = arith.constant 5 : index
    %c0_29 = arith.constant 0 : index
    %c0_30 = arith.constant 0 : index
    %43 = vector.load %arg7[%c5, %c0_29, %c0_30] : memref<8x32x512xf32, #tpu.memory_space<vmem>>, vector<1x32x512xf32>
    %44 = vector.shape_cast %43 : vector<1x32x512xf32> to vector<32x512xf32>
    %cst_31 = arith.constant dense<0.000000e+00> : vector<2x512xf32>
    %45 = tpu.matmul %42, %44, %cst_31 {dimension_numbers = #tpu.dot_dimension_numbers<[1], [0], [0], [1], [0, 0, 1, 1], [], []>} : vector<2x32xf32>, vector<32x512xf32>, vector<2x512xf32> -> vector<2x512xf32>
    %46 = arith.addf %41, %45 : vector<2x512xf32>
    %47 = vector.extract_strided_slice %15 {offsets = [12, 0], sizes = [2, 32], strides = [1, 1]} : vector<16x32xf32> to vector<2x32xf32>
    %c6 = arith.constant 6 : index
    %c0_32 = arith.constant 0 : index
    %c0_33 = arith.constant 0 : index
    %48 = vector.load %arg7[%c6, %c0_32, %c0_33] : memref<8x32x512xf32, #tpu.memory_space<vmem>>, vector<1x32x512xf32>
    %49 = vector.shape_cast %48 : vector<1x32x512xf32> to vector<32x512xf32>
    %cst_34 = arith.constant dense<0.000000e+00> : vector<2x512xf32>
    %50 = tpu.matmul %47, %49, %cst_34 {dimension_numbers = #tpu.dot_dimension_numbers<[1], [0], [0], [1], [0, 0, 1, 1], [], []>} : vector<2x32xf32>, vector<32x512xf32>, vector<2x512xf32> -> vector<2x512xf32>
    %51 = arith.addf %46, %50 : vector<2x512xf32>
    %52 = vector.extract_strided_slice %15 {offsets = [14, 0], sizes = [2, 32], strides = [1, 1]} : vector<16x32xf32> to vector<2x32xf32>
    %c7 = arith.constant 7 : index
    %c0_35 = arith.constant 0 : index
    %c0_36 = arith.constant 0 : index
    %53 = vector.load %arg7[%c7, %c0_35, %c0_36] : memref<8x32x512xf32, #tpu.memory_space<vmem>>, vector<1x32x512xf32>
    %54 = vector.shape_cast %53 : vector<1x32x512xf32> to vector<32x512xf32>
    %cst_37 = arith.constant dense<0.000000e+00> : vector<2x512xf32>
    %55 = tpu.matmul %52, %54, %cst_37 {dimension_numbers = #tpu.dot_dimension_numbers<[1], [0], [0], [1], [0, 0, 1, 1], [], []>} : vector<2x32xf32>, vector<32x512xf32>, vector<2x512xf32> -> vector<2x512xf32>
    %56 = arith.addf %51, %55 : vector<2x512xf32>
    %c0_38 = arith.constant 0 : index
    %c0_39 = arith.constant 0 : index
    %57 = vector.load %arg8[%c0_38, %c0_39] : memref<1x512xf32, #tpu.memory_space<vmem>>, vector<1x512xf32>
    %58 = vector.broadcast %57 : vector<1x512xf32> to vector<2x512xf32>
    %59 = arith.addf %56, %58 : vector<2x512xf32>
    %cst_40 = arith.constant 0.000000e+00 : f32
    %60 = vector.broadcast %cst_40 : f32 to vector<2x512xf32>
    %61 = arith.maximumf %59, %60 : vector<2x512xf32>
    %c0_41 = arith.constant 0 : index
    %c0_42 = arith.constant 0 : index
    %c0_43 = arith.constant 0 : index
    %62 = vector.load %arg9[%c0_41, %c0_42, %c0_43] : memref<8x512x32xf32, #tpu.memory_space<vmem>>, vector<1x512x32xf32>
    %63 = vector.shape_cast %62 : vector<1x512x32xf32> to vector<512x32xf32>
    %cst_44 = arith.constant dense<0.000000e+00> : vector<2x32xf32>
    %64 = tpu.matmul %61, %63, %cst_44 {dimension_numbers = #tpu.dot_dimension_numbers<[1], [0], [0], [1], [0, 0, 1, 1], [], []>} : vector<2x512xf32>, vector<512x32xf32>, vector<2x32xf32> -> vector<2x32xf32>
    %c0_45 = arith.constant 0 : index
    %c0_46 = arith.constant 0 : index
    %c0_47 = arith.constant 0 : index
    %65 = vector.load %arg10[%c0_45, %c0_46, %c0_47] : memref<8x1x32xf32, #tpu.memory_space<vmem>>, vector<1x1x32xf32>
    %66 = vector.shape_cast %65 : vector<1x1x32xf32> to vector<1x32xf32>
    %67 = vector.broadcast %66 : vector<1x32xf32> to vector<2x32xf32>
    %68 = arith.addf %64, %67 : vector<2x32xf32>
    %cst_48 = arith.constant 0.000000e+00 : f32
    %69 = vector.broadcast %cst_48 : f32 to vector<2x32xf32>
    %70 = arith.maximumf %68, %69 : vector<2x32xf32>
    %71 = vector.extract_strided_slice %15 {offsets = [0, 0], sizes = [2, 32], strides = [1, 1]} : vector<16x32xf32> to vector<2x32xf32>
    %72 = arith.addf %70, %71 : vector<2x32xf32>
    %c0_49 = arith.constant 0 : index
    %c0_50 = arith.constant 0 : index
    %73 = vector.load %arg11[%c0_49, %c0_50] : memref<1x32xf32, #tpu.memory_space<vmem>>, vector<1x32xf32>
    %74 = vector.broadcast %73 : vector<1x32xf32> to vector<2x32xf32>
    %75 = arith.mulf %72, %74 : vector<2x32xf32>
    %c0_51 = arith.constant 0 : index
    %c0_52 = arith.constant 0 : index
    %76 = vector.load %arg12[%c0_51, %c0_52] : memref<1x32xf32, #tpu.memory_space<vmem>>, vector<1x32xf32>
    %77 = vector.broadcast %76 : vector<1x32xf32> to vector<2x32xf32>
    %78 = arith.addf %75, %77 : vector<2x32xf32>
    %c0_53 = arith.constant 0 : index
    %c0_54 = arith.constant 0 : index
    %79 = vector.load %arg13[%c0_53, %c0_54] : memref<16x32xf32, #tpu.memory_space<vmem>>, vector<2x32xf32>
    tpu.vector_store %arg13[%c0_53, %c0_54], %78 {strides = array<i32>} : memref<16x32xf32, #tpu.memory_space<vmem>>, vector<2x32xf32>,
    %c1_55 = arith.constant 1 : index
    %c0_56 = arith.constant 0 : index
    %c0_57 = arith.constant 0 : index
    %80 = vector.load %arg9[%c1_55, %c0_56, %c0_57] : memref<8x512x32xf32, #tpu.memory_space<vmem>>, vector<1x512x32xf32>
    %81 = vector.shape_cast %80 : vector<1x512x32xf32> to vector<512x32xf32>
    %cst_58 = arith.constant dense<0.000000e+00> : vector<2x32xf32>
    %82 = tpu.matmul %61, %81, %cst_58 {dimension_numbers = #tpu.dot_dimension_numbers<[1], [0], [0], [1], [0, 0, 1, 1], [], []>} : vector<2x512xf32>, vector<512x32xf32>, vector<2x32xf32> -> vector<2x32xf32>
    %c1_59 = arith.constant 1 : index
    %c0_60 = arith.constant 0 : index
    %c0_61 = arith.constant 0 : index
    %83 = vector.load %arg10[%c1_59, %c0_60, %c0_61] : memref<8x1x32xf32, #tpu.memory_space<vmem>>, vector<1x1x32xf32>
    %84 = vector.shape_cast %83 : vector<1x1x32xf32> to vector<1x32xf32>
    %85 = vector.broadcast %84 : vector<1x32xf32> to vector<2x32xf32>
    %86 = arith.addf %82, %85 : vector<2x32xf32>
    %cst_62 = arith.constant 0.000000e+00 : f32
    %87 = vector.broadcast %cst_62 : f32 to vector<2x32xf32>
    %88 = arith.maximumf %86, %87 : vector<2x32xf32>
    %89 = vector.extract_strided_slice %15 {offsets = [2, 0], sizes = [2, 32], strides = [1, 1]} : vector<16x32xf32> to vector<2x32xf32>
    %90 = arith.addf %88, %89 : vector<2x32xf32>
    %c0_63 = arith.constant 0 : index
    %c0_64 = arith.constant 0 : index
    %91 = vector.load %arg11[%c0_63, %c0_64] : memref<1x32xf32, #tpu.memory_space<vmem>>, vector<1x32xf32>
    %92 = vector.broadcast %91 : vector<1x32xf32> to vector<2x32xf32>
    %93 = arith.mulf %90, %92 : vector<2x32xf32>
    %c0_65 = arith.constant 0 : index
    %c0_66 = arith.constant 0 : index
    %94 = vector.load %arg12[%c0_65, %c0_66] : memref<1x32xf32, #tpu.memory_space<vmem>>, vector<1x32xf32>
    %95 = vector.broadcast %94 : vector<1x32xf32> to vector<2x32xf32>
    %96 = arith.addf %93, %95 : vector<2x32xf32>
    %c2_67 = arith.constant 2 : index
    %c0_68 = arith.constant 0 : index
    %97 = vector.load %arg13[%c2_67, %c0_68] : memref<16x32xf32, #tpu.memory_space<vmem>>, vector<2x32xf32>
    tpu.vector_store %arg13[%c2_67, %c0_68], %96 {strides = array<i32>} : memref<16x32xf32, #tpu.memory_space<vmem>>, vector<2x32xf32>,
    %c2_69 = arith.constant 2 : index
    %c0_70 = arith.constant 0 : index
    %c0_71 = arith.constant 0 : index
    %98 = vector.load %arg9[%c2_69, %c0_70, %c0_71] : memref<8x512x32xf32, #tpu.memory_space<vmem>>, vector<1x512x32xf32>
    %99 = vector.shape_cast %98 : vector<1x512x32xf32> to vector<512x32xf32>
    %cst_72 = arith.constant dense<0.000000e+00> : vector<2x32xf32>
    %100 = tpu.matmul %61, %99, %cst_72 {dimension_numbers = #tpu.dot_dimension_numbers<[1], [0], [0], [1], [0, 0, 1, 1], [], []>} : vector<2x512xf32>, vector<512x32xf32>, vector<2x32xf32> -> vector<2x32xf32>
    %c2_73 = arith.constant 2 : index
    %c0_74 = arith.constant 0 : index
    %c0_75 = arith.constant 0 : index
    %101 = vector.load %arg10[%c2_73, %c0_74, %c0_75] : memref<8x1x32xf32, #tpu.memory_space<vmem>>, vector<1x1x32xf32>
    %102 = vector.shape_cast %101 : vector<1x1x32xf32> to vector<1x32xf32>
    %103 = vector.broadcast %102 : vector<1x32xf32> to vector<2x32xf32>
    %104 = arith.addf %100, %103 : vector<2x32xf32>
    %cst_76 = arith.constant 0.000000e+00 : f32
    %105 = vector.broadcast %cst_76 : f32 to vector<2x32xf32>
    %106 = arith.maximumf %104, %105 : vector<2x32xf32>
    %107 = vector.extract_strided_slice %15 {offsets = [4, 0], sizes = [2, 32], strides = [1, 1]} : vector<16x32xf32> to vector<2x32xf32>
    %108 = arith.addf %106, %107 : vector<2x32xf32>
    %c0_77 = arith.constant 0 : index
    %c0_78 = arith.constant 0 : index
    %109 = vector.load %arg11[%c0_77, %c0_78] : memref<1x32xf32, #tpu.memory_space<vmem>>, vector<1x32xf32>
    %110 = vector.broadcast %109 : vector<1x32xf32> to vector<2x32xf32>
    %111 = arith.mulf %108, %110 : vector<2x32xf32>
    %c0_79 = arith.constant 0 : index
    %c0_80 = arith.constant 0 : index
    %112 = vector.load %arg12[%c0_79, %c0_80] : memref<1x32xf32, #tpu.memory_space<vmem>>, vector<1x32xf32>
    %113 = vector.broadcast %112 : vector<1x32xf32> to vector<2x32xf32>
    %114 = arith.addf %111, %113 : vector<2x32xf32>
    %c4_81 = arith.constant 4 : index
    %c0_82 = arith.constant 0 : index
    %115 = vector.load %arg13[%c4_81, %c0_82] : memref<16x32xf32, #tpu.memory_space<vmem>>, vector<2x32xf32>
    tpu.vector_store %arg13[%c4_81, %c0_82], %114 {strides = array<i32>} : memref<16x32xf32, #tpu.memory_space<vmem>>, vector<2x32xf32>,
    %c3_83 = arith.constant 3 : index
    %c0_84 = arith.constant 0 : index
    %c0_85 = arith.constant 0 : index
    %116 = vector.load %arg9[%c3_83, %c0_84, %c0_85] : memref<8x512x32xf32, #tpu.memory_space<vmem>>, vector<1x512x32xf32>
    %117 = vector.shape_cast %116 : vector<1x512x32xf32> to vector<512x32xf32>
    %cst_86 = arith.constant dense<0.000000e+00> : vector<2x32xf32>
    %118 = tpu.matmul %61, %117, %cst_86 {dimension_numbers = #tpu.dot_dimension_numbers<[1], [0], [0], [1], [0, 0, 1, 1], [], []>} : vector<2x512xf32>, vector<512x32xf32>, vector<2x32xf32> -> vector<2x32xf32>
    %c3_87 = arith.constant 3 : index
    %c0_88 = arith.constant 0 : index
    %c0_89 = arith.constant 0 : index
    %119 = vector.load %arg10[%c3_87, %c0_88, %c0_89] : memref<8x1x32xf32, #tpu.memory_space<vmem>>, vector<1x1x32xf32>
    %120 = vector.shape_cast %119 : vector<1x1x32xf32> to vector<1x32xf32>
    %121 = vector.broadcast %120 : vector<1x32xf32> to vector<2x32xf32>
    %122 = arith.addf %118, %121 : vector<2x32xf32>
    %cst_90 = arith.constant 0.000000e+00 : f32
    %123 = vector.broadcast %cst_90 : f32 to vector<2x32xf32>
    %124 = arith.maximumf %122, %123 : vector<2x32xf32>
    %125 = vector.extract_strided_slice %15 {offsets = [6, 0], sizes = [2, 32], strides = [1, 1]} : vector<16x32xf32> to vector<2x32xf32>
    %126 = arith.addf %124, %125 : vector<2x32xf32>
    %c0_91 = arith.constant 0 : index
    %c0_92 = arith.constant 0 : index
    %127 = vector.load %arg11[%c0_91, %c0_92] : memref<1x32xf32, #tpu.memory_space<vmem>>, vector<1x32xf32>
    %128 = vector.broadcast %127 : vector<1x32xf32> to vector<2x32xf32>
    %129 = arith.mulf %126, %128 : vector<2x32xf32>
    %c0_93 = arith.constant 0 : index
    %c0_94 = arith.constant 0 : index
    %130 = vector.load %arg12[%c0_93, %c0_94] : memref<1x32xf32, #tpu.memory_space<vmem>>, vector<1x32xf32>
    %131 = vector.broadcast %130 : vector<1x32xf32> to vector<2x32xf32>
    %132 = arith.addf %129, %131 : vector<2x32xf32>
    %c6_95 = arith.constant 6 : index
    %c0_96 = arith.constant 0 : index
    %133 = vector.load %arg13[%c6_95, %c0_96] : memref<16x32xf32, #tpu.memory_space<vmem>>, vector<2x32xf32>
    tpu.vector_store %arg13[%c6_95, %c0_96], %132 {strides = array<i32>} : memref<16x32xf32, #tpu.memory_space<vmem>>, vector<2x32xf32>,
    %c4_97 = arith.constant 4 : index
    %c0_98 = arith.constant 0 : index
    %c0_99 = arith.constant 0 : index
    %134 = vector.load %arg9[%c4_97, %c0_98, %c0_99] : memref<8x512x32xf32, #tpu.memory_space<vmem>>, vector<1x512x32xf32>
    %135 = vector.shape_cast %134 : vector<1x512x32xf32> to vector<512x32xf32>
    %cst_100 = arith.constant dense<0.000000e+00> : vector<2x32xf32>
    %136 = tpu.matmul %61, %135, %cst_100 {dimension_numbers = #tpu.dot_dimension_numbers<[1], [0], [0], [1], [0, 0, 1, 1], [], []>} : vector<2x512xf32>, vector<512x32xf32>, vector<2x32xf32> -> vector<2x32xf32>
    %c4_101 = arith.constant 4 : index
    %c0_102 = arith.constant 0 : index
    %c0_103 = arith.constant 0 : index
    %137 = vector.load %arg10[%c4_101, %c0_102, %c0_103] : memref<8x1x32xf32, #tpu.memory_space<vmem>>, vector<1x1x32xf32>
    %138 = vector.shape_cast %137 : vector<1x1x32xf32> to vector<1x32xf32>
    %139 = vector.broadcast %138 : vector<1x32xf32> to vector<2x32xf32>
    %140 = arith.addf %136, %139 : vector<2x32xf32>
    %cst_104 = arith.constant 0.000000e+00 : f32
    %141 = vector.broadcast %cst_104 : f32 to vector<2x32xf32>
    %142 = arith.maximumf %140, %141 : vector<2x32xf32>
    %143 = vector.extract_strided_slice %15 {offsets = [8, 0], sizes = [2, 32], strides = [1, 1]} : vector<16x32xf32> to vector<2x32xf32>
    %144 = arith.addf %142, %143 : vector<2x32xf32>
    %c0_105 = arith.constant 0 : index
    %c0_106 = arith.constant 0 : index
    %145 = vector.load %arg11[%c0_105, %c0_106] : memref<1x32xf32, #tpu.memory_space<vmem>>, vector<1x32xf32>
    %146 = vector.broadcast %145 : vector<1x32xf32> to vector<2x32xf32>
    %147 = arith.mulf %144, %146 : vector<2x32xf32>
    %c0_107 = arith.constant 0 : index
    %c0_108 = arith.constant 0 : index
    %148 = vector.load %arg12[%c0_107, %c0_108] : memref<1x32xf32, #tpu.memory_space<vmem>>, vector<1x32xf32>
    %149 = vector.broadcast %148 : vector<1x32xf32> to vector<2x32xf32>
    %150 = arith.addf %147, %149 : vector<2x32xf32>
    %c8 = arith.constant 8 : index
    %c0_109 = arith.constant 0 : index
    %151 = vector.load %arg13[%c8, %c0_109] : memref<16x32xf32, #tpu.memory_space<vmem>>, vector<2x32xf32>
    tpu.vector_store %arg13[%c8, %c0_109], %150 {strides = array<i32>} : memref<16x32xf32, #tpu.memory_space<vmem>>, vector<2x32xf32>,
    %c5_110 = arith.constant 5 : index
    %c0_111 = arith.constant 0 : index
    %c0_112 = arith.constant 0 : index
    %152 = vector.load %arg9[%c5_110, %c0_111, %c0_112] : memref<8x512x32xf32, #tpu.memory_space<vmem>>, vector<1x512x32xf32>
    %153 = vector.shape_cast %152 : vector<1x512x32xf32> to vector<512x32xf32>
    %cst_113 = arith.constant dense<0.000000e+00> : vector<2x32xf32>
    %154 = tpu.matmul %61, %153, %cst_113 {dimension_numbers = #tpu.dot_dimension_numbers<[1], [0], [0], [1], [0, 0, 1, 1], [], []>} : vector<2x512xf32>, vector<512x32xf32>, vector<2x32xf32> -> vector<2x32xf32>
    %c5_114 = arith.constant 5 : index
    %c0_115 = arith.constant 0 : index
    %c0_116 = arith.constant 0 : index
    %155 = vector.load %arg10[%c5_114, %c0_115, %c0_116] : memref<8x1x32xf32, #tpu.memory_space<vmem>>, vector<1x1x32xf32>
    %156 = vector.shape_cast %155 : vector<1x1x32xf32> to vector<1x32xf32>
    %157 = vector.broadcast %156 : vector<1x32xf32> to vector<2x32xf32>
    %158 = arith.addf %154, %157 : vector<2x32xf32>
    %cst_117 = arith.constant 0.000000e+00 : f32
    %159 = vector.broadcast %cst_117 : f32 to vector<2x32xf32>
    %160 = arith.maximumf %158, %159 : vector<2x32xf32>
    %161 = vector.extract_strided_slice %15 {offsets = [10, 0], sizes = [2, 32], strides = [1, 1]} : vector<16x32xf32> to vector<2x32xf32>
    %162 = arith.addf %160, %161 : vector<2x32xf32>
    %c0_118 = arith.constant 0 : index
    %c0_119 = arith.constant 0 : index
    %163 = vector.load %arg11[%c0_118, %c0_119] : memref<1x32xf32, #tpu.memory_space<vmem>>, vector<1x32xf32>
    %164 = vector.broadcast %163 : vector<1x32xf32> to vector<2x32xf32>
    %165 = arith.mulf %162, %164 : vector<2x32xf32>
    %c0_120 = arith.constant 0 : index
    %c0_121 = arith.constant 0 : index
    %166 = vector.load %arg12[%c0_120, %c0_121] : memref<1x32xf32, #tpu.memory_space<vmem>>, vector<1x32xf32>
    %167 = vector.broadcast %166 : vector<1x32xf32> to vector<2x32xf32>
    %168 = arith.addf %165, %167 : vector<2x32xf32>
    %c10 = arith.constant 10 : index
    %c0_122 = arith.constant 0 : index
    %169 = vector.load %arg13[%c10, %c0_122] : memref<16x32xf32, #tpu.memory_space<vmem>>, vector<2x32xf32>
    tpu.vector_store %arg13[%c10, %c0_122], %168 {strides = array<i32>} : memref<16x32xf32, #tpu.memory_space<vmem>>, vector<2x32xf32>,
    %c6_123 = arith.constant 6 : index
    %c0_124 = arith.constant 0 : index
    %c0_125 = arith.constant 0 : index
    %170 = vector.load %arg9[%c6_123, %c0_124, %c0_125] : memref<8x512x32xf32, #tpu.memory_space<vmem>>, vector<1x512x32xf32>
    %171 = vector.shape_cast %170 : vector<1x512x32xf32> to vector<512x32xf32>
    %cst_126 = arith.constant dense<0.000000e+00> : vector<2x32xf32>
    %172 = tpu.matmul %61, %171, %cst_126 {dimension_numbers = #tpu.dot_dimension_numbers<[1], [0], [0], [1], [0, 0, 1, 1], [], []>} : vector<2x512xf32>, vector<512x32xf32>, vector<2x32xf32> -> vector<2x32xf32>
    %c6_127 = arith.constant 6 : index
    %c0_128 = arith.constant 0 : index
    %c0_129 = arith.constant 0 : index
    %173 = vector.load %arg10[%c6_127, %c0_128, %c0_129] : memref<8x1x32xf32, #tpu.memory_space<vmem>>, vector<1x1x32xf32>
    %174 = vector.shape_cast %173 : vector<1x1x32xf32> to vector<1x32xf32>
    %175 = vector.broadcast %174 : vector<1x32xf32> to vector<2x32xf32>
    %176 = arith.addf %172, %175 : vector<2x32xf32>
    %cst_130 = arith.constant 0.000000e+00 : f32
    %177 = vector.broadcast %cst_130 : f32 to vector<2x32xf32>
    %178 = arith.maximumf %176, %177 : vector<2x32xf32>
    %179 = vector.extract_strided_slice %15 {offsets = [12, 0], sizes = [2, 32], strides = [1, 1]} : vector<16x32xf32> to vector<2x32xf32>
    %180 = arith.addf %178, %179 : vector<2x32xf32>
    %c0_131 = arith.constant 0 : index
    %c0_132 = arith.constant 0 : index
    %181 = vector.load %arg11[%c0_131, %c0_132] : memref<1x32xf32, #tpu.memory_space<vmem>>, vector<1x32xf32>
    %182 = vector.broadcast %181 : vector<1x32xf32> to vector<2x32xf32>
    %183 = arith.mulf %180, %182 : vector<2x32xf32>
    %c0_133 = arith.constant 0 : index
    %c0_134 = arith.constant 0 : index
    %184 = vector.load %arg12[%c0_133, %c0_134] : memref<1x32xf32, #tpu.memory_space<vmem>>, vector<1x32xf32>
    %185 = vector.broadcast %184 : vector<1x32xf32> to vector<2x32xf32>
    %186 = arith.addf %183, %185 : vector<2x32xf32>
    %c12 = arith.constant 12 : index
    %c0_135 = arith.constant 0 : index
    %187 = vector.load %arg13[%c12, %c0_135] : memref<16x32xf32, #tpu.memory_space<vmem>>, vector<2x32xf32>
    tpu.vector_store %arg13[%c12, %c0_135], %186 {strides = array<i32>} : memref<16x32xf32, #tpu.memory_space<vmem>>, vector<2x32xf32>,
    %c7_136 = arith.constant 7 : index
    %c0_137 = arith.constant 0 : index
    %c0_138 = arith.constant 0 : index
    %188 = vector.load %arg9[%c7_136, %c0_137, %c0_138] : memref<8x512x32xf32, #tpu.memory_space<vmem>>, vector<1x512x32xf32>
    %189 = vector.shape_cast %188 : vector<1x512x32xf32> to vector<512x32xf32>
    %cst_139 = arith.constant dense<0.000000e+00> : vector<2x32xf32>
    %190 = tpu.matmul %61, %189, %cst_139 {dimension_numbers = #tpu.dot_dimension_numbers<[1], [0], [0], [1], [0, 0, 1, 1], [], []>} : vector<2x512xf32>, vector<512x32xf32>, vector<2x32xf32> -> vector<2x32xf32>
    %c7_140 = arith.constant 7 : index
    %c0_141 = arith.constant 0 : index
    %c0_142 = arith.constant 0 : index
    %191 = vector.load %arg10[%c7_140, %c0_141, %c0_142] : memref<8x1x32xf32, #tpu.memory_space<vmem>>, vector<1x1x32xf32>
    %192 = vector.shape_cast %191 : vector<1x1x32xf32> to vector<1x32xf32>
    %193 = vector.broadcast %192 : vector<1x32xf32> to vector<2x32xf32>
    %194 = arith.addf %190, %193 : vector<2x32xf32>
    %cst_143 = arith.constant 0.000000e+00 : f32
    %195 = vector.broadcast %cst_143 : f32 to vector<2x32xf32>
    %196 = arith.maximumf %194, %195 : vector<2x32xf32>
    %197 = vector.extract_strided_slice %15 {offsets = [14, 0], sizes = [2, 32], strides = [1, 1]} : vector<16x32xf32> to vector<2x32xf32>
    %198 = arith.addf %196, %197 : vector<2x32xf32>
    %c0_144 = arith.constant 0 : index
    %c0_145 = arith.constant 0 : index
    %199 = vector.load %arg11[%c0_144, %c0_145] : memref<1x32xf32, #tpu.memory_space<vmem>>, vector<1x32xf32>
    %200 = vector.broadcast %199 : vector<1x32xf32> to vector<2x32xf32>
    %201 = arith.mulf %198, %200 : vector<2x32xf32>
    %c0_146 = arith.constant 0 : index
    %c0_147 = arith.constant 0 : index
    %202 = vector.load %arg12[%c0_146, %c0_147] : memref<1x32xf32, #tpu.memory_space<vmem>>, vector<1x32xf32>
    %203 = vector.broadcast %202 : vector<1x32xf32> to vector<2x32xf32>
    %204 = arith.addf %201, %203 : vector<2x32xf32>
    %c14 = arith.constant 14 : index
    %c0_148 = arith.constant 0 : index
    %205 = vector.load %arg13[%c14, %c0_148] : memref<16x32xf32, #tpu.memory_space<vmem>>, vector<2x32xf32>
    tpu.vector_store %arg13[%c14, %c0_148], %204 {strides = array<i32>} : memref<16x32xf32, #tpu.memory_space<vmem>>, vector<2x32xf32>,
    return
  }
  func.func @transform_0(%arg0: i32) -> (i32, i32) {
    %c0_i32 = arith.constant 0 : i32
    %c0_i32_0 = arith.constant 0 : i32
    %c0_i32_1 = arith.constant 0 : i32
    return %c0_i32, %c0_i32_0 : i32, i32
  }
  func.func @transform_1(%arg0: i32) -> (i32, i32) {
    %c0_i32 = arith.constant 0 : i32
    %c0_i32_0 = arith.constant 0 : i32
    %c0_i32_1 = arith.constant 0 : i32
    return %c0_i32, %c0_i32_0 : i32, i32
  }
  func.func @transform_2(%arg0: i32) -> (i32, i32) {
    %c0_i32 = arith.constant 0 : i32
    %c0_i32_0 = arith.constant 0 : i32
    %c0_i32_1 = arith.constant 0 : i32
    return %c0_i32, %c0_i32_0 : i32, i32
  }
  func.func @transform_3(%arg0: i32) -> (i32, i32) {
    %c0_i32 = arith.constant 0 : i32
    %c0_i32_0 = arith.constant 0 : i32
    %c0_i32_1 = arith.constant 0 : i32
    return %c0_i32, %c0_i32_0 : i32, i32
  }
  func.func @transform_4(%arg0: i32) -> (i32, i32) {
    %c0_i32 = arith.constant 0 : i32
    %c0_i32_0 = arith.constant 0 : i32
    %c0_i32_1 = arith.constant 0 : i32
    return %c0_i32, %c0_i32_0 : i32, i32
  }
  func.func @transform_5(%arg0: i32) -> (i32, i32) {
    %c0_i32 = arith.constant 0 : i32
    %c0_i32_0 = arith.constant 0 : i32
    %c0_i32_1 = arith.constant 0 : i32
    return %c0_i32, %c0_i32_0 : i32, i32
  }
  func.func @transform_6(%arg0: i32) -> (i32, i32, i32) {
    %c0_i32 = arith.constant 0 : i32
    %c0_i32_0 = arith.constant 0 : i32
    %c0_i32_1 = arith.constant 0 : i32
    %c0_i32_2 = arith.constant 0 : i32
    return %c0_i32, %c0_i32_0, %c0_i32_1 : i32, i32, i32
  }
  func.func @transform_7(%arg0: i32) -> (i32, i32) {
    %c0_i32 = arith.constant 0 : i32
    %c0_i32_0 = arith.constant 0 : i32
    %c0_i32_1 = arith.constant 0 : i32
    return %c0_i32, %c0_i32_0 : i32, i32
  }
  func.func @transform_8(%arg0: i32) -> (i32, i32, i32) {
    %c0_i32 = arith.constant 0 : i32
    %c0_i32_0 = arith.constant 0 : i32
    %c0_i32_1 = arith.constant 0 : i32
    %c0_i32_2 = arith.constant 0 : i32
    return %c0_i32, %c0_i32_0, %c0_i32_1 : i32, i32, i32
  }
  func.func @transform_9(%arg0: i32) -> (i32, i32, i32) {
    %c0_i32 = arith.constant 0 : i32
    %c0_i32_0 = arith.constant 0 : i32
    %c0_i32_1 = arith.constant 0 : i32
    %c0_i32_2 = arith.constant 0 : i32
    return %c0_i32, %c0_i32_0, %c0_i32_1 : i32, i32, i32
  }
  func.func @transform_10(%arg0: i32) -> (i32, i32) {
    %c0_i32 = arith.constant 0 : i32
    %c0_i32_0 = arith.constant 0 : i32
    %c0_i32_1 = arith.constant 0 : i32
    return %c0_i32, %c0_i32_0 : i32, i32
  }
  func.func @transform_11(%arg0: i32) -> (i32, i32) {
    %c0_i32 = arith.constant 0 : i32
    %c0_i32_0 = arith.constant 0 : i32
    %c0_i32_1 = arith.constant 0 : i32
    return %c0_i32, %c0_i32_0 : i32, i32
  }
  func.func @transform_12(%arg0: i32) -> (i32, i32) {
    %c0_i32 = arith.constant 0 : i32
    %c0_i32_0 = arith.constant 0 : i32
    %c0_i32_1 = arith.constant 0 : i32
    return %c0_i32, %c0_i32_0 : i32, i32
  }
}

module attributes {stable_mosaic.version = 11 : i64} {
  func.func @_final_linear_kernel(%arg0: i32, %arg1: memref<16x32xf32, #tpu.memory_space<vmem>>, %arg2: memref<8x32x128xf32, #tpu.memory_space<vmem>>, %arg3: memref<1x128xf32, #tpu.memory_space<vmem>>, %arg4: memref<2x128xf32, #tpu.memory_space<vmem>>) attributes {dimension_semantics = [#tpu.dimension_semantics<arbitrary>], iteration_bounds = array<i64: 1>, scalar_prefetch = 0 : i64, scratch_operands = 0 : i64, tpu.core_type = #tpu.core_type<tc>, window_params = [{pipeline_mode = #tpu.pipeline_mode<synchronous>, transform_indices = @transform_0, window_bounds = array<i64: 16, 32>}, {pipeline_mode = #tpu.pipeline_mode<synchronous>, transform_indices = @transform_1, window_bounds = array<i64: 8, 32, 128>}, {pipeline_mode = #tpu.pipeline_mode<synchronous>, transform_indices = @transform_2, window_bounds = array<i64: 1, 128>}, {pipeline_mode = #tpu.pipeline_mode<synchronous>, transform_indices = @transform_3, window_bounds = array<i64: 2, 128>}]} {
    %cst = arith.constant 0.000000e+00 : f32
    %0 = vector.broadcast %cst : f32 to vector<2x128xf32>
    %c0 = arith.constant 0 : index
    %c0_0 = arith.constant 0 : index
    %1 = vector.load %arg1[%c0, %c0_0] : memref<16x32xf32, #tpu.memory_space<vmem>>, vector<2x32xf32>
    %c0_1 = arith.constant 0 : index
    %c0_2 = arith.constant 0 : index
    %c0_3 = arith.constant 0 : index
    %2 = vector.load %arg2[%c0_1, %c0_2, %c0_3] : memref<8x32x128xf32, #tpu.memory_space<vmem>>, vector<1x32x128xf32>
    %3 = vector.shape_cast %2 : vector<1x32x128xf32> to vector<32x128xf32>
    %cst_4 = arith.constant dense<0.000000e+00> : vector<2x128xf32>
    %4 = tpu.matmul %1, %3, %cst_4 {dimension_numbers = #tpu.dot_dimension_numbers<[1], [0], [0], [1], [0, 0, 1, 1], [], []>} : vector<2x32xf32>, vector<32x128xf32>, vector<2x128xf32> -> vector<2x128xf32>
    %5 = arith.addf %0, %4 : vector<2x128xf32>
    %c2 = arith.constant 2 : index
    %c0_5 = arith.constant 0 : index
    %6 = vector.load %arg1[%c2, %c0_5] : memref<16x32xf32, #tpu.memory_space<vmem>>, vector<2x32xf32>
    %c1 = arith.constant 1 : index
    %c0_6 = arith.constant 0 : index
    %c0_7 = arith.constant 0 : index
    %7 = vector.load %arg2[%c1, %c0_6, %c0_7] : memref<8x32x128xf32, #tpu.memory_space<vmem>>, vector<1x32x128xf32>
    %8 = vector.shape_cast %7 : vector<1x32x128xf32> to vector<32x128xf32>
    %cst_8 = arith.constant dense<0.000000e+00> : vector<2x128xf32>
    %9 = tpu.matmul %6, %8, %cst_8 {dimension_numbers = #tpu.dot_dimension_numbers<[1], [0], [0], [1], [0, 0, 1, 1], [], []>} : vector<2x32xf32>, vector<32x128xf32>, vector<2x128xf32> -> vector<2x128xf32>
    %10 = arith.addf %5, %9 : vector<2x128xf32>
    %c4 = arith.constant 4 : index
    %c0_9 = arith.constant 0 : index
    %11 = vector.load %arg1[%c4, %c0_9] : memref<16x32xf32, #tpu.memory_space<vmem>>, vector<2x32xf32>
    %c2_10 = arith.constant 2 : index
    %c0_11 = arith.constant 0 : index
    %c0_12 = arith.constant 0 : index
    %12 = vector.load %arg2[%c2_10, %c0_11, %c0_12] : memref<8x32x128xf32, #tpu.memory_space<vmem>>, vector<1x32x128xf32>
    %13 = vector.shape_cast %12 : vector<1x32x128xf32> to vector<32x128xf32>
    %cst_13 = arith.constant dense<0.000000e+00> : vector<2x128xf32>
    %14 = tpu.matmul %11, %13, %cst_13 {dimension_numbers = #tpu.dot_dimension_numbers<[1], [0], [0], [1], [0, 0, 1, 1], [], []>} : vector<2x32xf32>, vector<32x128xf32>, vector<2x128xf32> -> vector<2x128xf32>
    %15 = arith.addf %10, %14 : vector<2x128xf32>
    %c6 = arith.constant 6 : index
    %c0_14 = arith.constant 0 : index
    %16 = vector.load %arg1[%c6, %c0_14] : memref<16x32xf32, #tpu.memory_space<vmem>>, vector<2x32xf32>
    %c3 = arith.constant 3 : index
    %c0_15 = arith.constant 0 : index
    %c0_16 = arith.constant 0 : index
    %17 = vector.load %arg2[%c3, %c0_15, %c0_16] : memref<8x32x128xf32, #tpu.memory_space<vmem>>, vector<1x32x128xf32>
    %18 = vector.shape_cast %17 : vector<1x32x128xf32> to vector<32x128xf32>
    %cst_17 = arith.constant dense<0.000000e+00> : vector<2x128xf32>
    %19 = tpu.matmul %16, %18, %cst_17 {dimension_numbers = #tpu.dot_dimension_numbers<[1], [0], [0], [1], [0, 0, 1, 1], [], []>} : vector<2x32xf32>, vector<32x128xf32>, vector<2x128xf32> -> vector<2x128xf32>
    %20 = arith.addf %15, %19 : vector<2x128xf32>
    %c8 = arith.constant 8 : index
    %c0_18 = arith.constant 0 : index
    %21 = vector.load %arg1[%c8, %c0_18] : memref<16x32xf32, #tpu.memory_space<vmem>>, vector<2x32xf32>
    %c4_19 = arith.constant 4 : index
    %c0_20 = arith.constant 0 : index
    %c0_21 = arith.constant 0 : index
    %22 = vector.load %arg2[%c4_19, %c0_20, %c0_21] : memref<8x32x128xf32, #tpu.memory_space<vmem>>, vector<1x32x128xf32>
    %23 = vector.shape_cast %22 : vector<1x32x128xf32> to vector<32x128xf32>
    %cst_22 = arith.constant dense<0.000000e+00> : vector<2x128xf32>
    %24 = tpu.matmul %21, %23, %cst_22 {dimension_numbers = #tpu.dot_dimension_numbers<[1], [0], [0], [1], [0, 0, 1, 1], [], []>} : vector<2x32xf32>, vector<32x128xf32>, vector<2x128xf32> -> vector<2x128xf32>
    %25 = arith.addf %20, %24 : vector<2x128xf32>
    %c10 = arith.constant 10 : index
    %c0_23 = arith.constant 0 : index
    %26 = vector.load %arg1[%c10, %c0_23] : memref<16x32xf32, #tpu.memory_space<vmem>>, vector<2x32xf32>
    %c5 = arith.constant 5 : index
    %c0_24 = arith.constant 0 : index
    %c0_25 = arith.constant 0 : index
    %27 = vector.load %arg2[%c5, %c0_24, %c0_25] : memref<8x32x128xf32, #tpu.memory_space<vmem>>, vector<1x32x128xf32>
    %28 = vector.shape_cast %27 : vector<1x32x128xf32> to vector<32x128xf32>
    %cst_26 = arith.constant dense<0.000000e+00> : vector<2x128xf32>
    %29 = tpu.matmul %26, %28, %cst_26 {dimension_numbers = #tpu.dot_dimension_numbers<[1], [0], [0], [1], [0, 0, 1, 1], [], []>} : vector<2x32xf32>, vector<32x128xf32>, vector<2x128xf32> -> vector<2x128xf32>
    %30 = arith.addf %25, %29 : vector<2x128xf32>
    %c12 = arith.constant 12 : index
    %c0_27 = arith.constant 0 : index
    %31 = vector.load %arg1[%c12, %c0_27] : memref<16x32xf32, #tpu.memory_space<vmem>>, vector<2x32xf32>
    %c6_28 = arith.constant 6 : index
    %c0_29 = arith.constant 0 : index
    %c0_30 = arith.constant 0 : index
    %32 = vector.load %arg2[%c6_28, %c0_29, %c0_30] : memref<8x32x128xf32, #tpu.memory_space<vmem>>, vector<1x32x128xf32>
    %33 = vector.shape_cast %32 : vector<1x32x128xf32> to vector<32x128xf32>
    %cst_31 = arith.constant dense<0.000000e+00> : vector<2x128xf32>
    %34 = tpu.matmul %31, %33, %cst_31 {dimension_numbers = #tpu.dot_dimension_numbers<[1], [0], [0], [1], [0, 0, 1, 1], [], []>} : vector<2x32xf32>, vector<32x128xf32>, vector<2x128xf32> -> vector<2x128xf32>
    %35 = arith.addf %30, %34 : vector<2x128xf32>
    %c14 = arith.constant 14 : index
    %c0_32 = arith.constant 0 : index
    %36 = vector.load %arg1[%c14, %c0_32] : memref<16x32xf32, #tpu.memory_space<vmem>>, vector<2x32xf32>
    %c7 = arith.constant 7 : index
    %c0_33 = arith.constant 0 : index
    %c0_34 = arith.constant 0 : index
    %37 = vector.load %arg2[%c7, %c0_33, %c0_34] : memref<8x32x128xf32, #tpu.memory_space<vmem>>, vector<1x32x128xf32>
    %38 = vector.shape_cast %37 : vector<1x32x128xf32> to vector<32x128xf32>
    %cst_35 = arith.constant dense<0.000000e+00> : vector<2x128xf32>
    %39 = tpu.matmul %36, %38, %cst_35 {dimension_numbers = #tpu.dot_dimension_numbers<[1], [0], [0], [1], [0, 0, 1, 1], [], []>} : vector<2x32xf32>, vector<32x128xf32>, vector<2x128xf32> -> vector<2x128xf32>
    %40 = arith.addf %35, %39 : vector<2x128xf32>
    %c0_36 = arith.constant 0 : index
    %c0_37 = arith.constant 0 : index
    %41 = vector.load %arg3[%c0_36, %c0_37] : memref<1x128xf32, #tpu.memory_space<vmem>>, vector<1x128xf32>
    %42 = vector.broadcast %41 : vector<1x128xf32> to vector<2x128xf32>
    %43 = arith.addf %40, %42 : vector<2x128xf32>
    %c0_38 = arith.constant 0 : index
    %c0_39 = arith.constant 0 : index
    %44 = vector.load %arg4[%c0_38, %c0_39] : memref<2x128xf32, #tpu.memory_space<vmem>>, vector<2x128xf32>
    tpu.vector_store %arg4[%c0_38, %c0_39], %43 {strides = array<i32>} : memref<2x128xf32, #tpu.memory_space<vmem>>, vector<2x128xf32>,
    return
  }
  func.func @transform_0(%arg0: i32) -> (i32, i32) {
    %c0_i32 = arith.constant 0 : i32
    %c0_i32_0 = arith.constant 0 : i32
    %c0_i32_1 = arith.constant 0 : i32
    return %c0_i32, %c0_i32_0 : i32, i32
  }
  func.func @transform_1(%arg0: i32) -> (i32, i32, i32) {
    %c0_i32 = arith.constant 0 : i32
    %c0_i32_0 = arith.constant 0 : i32
    %c0_i32_1 = arith.constant 0 : i32
    %c0_i32_2 = arith.constant 0 : i32
    return %c0_i32, %c0_i32_0, %c0_i32_1 : i32, i32, i32
  }
  func.func @transform_2(%arg0: i32) -> (i32, i32) {
    %c0_i32 = arith.constant 0 : i32
    %c0_i32_0 = arith.constant 0 : i32
    %c0_i32_1 = arith.constant 0 : i32
    return %c0_i32, %c0_i32_0 : i32, i32
  }
  func.func @transform_3(%arg0: i32) -> (i32, i32) {
    %c0_i32 = arith.constant 0 : i32
    %c0_i32_0 = arith.constant 0 : i32
    %c0_i32_1 = arith.constant 0 : i32
    return %c0_i32, %c0_i32_0 : i32, i32
  }
}

</mosaic_0001>

<bundles_post_ra>
// kernel: forward_pallas.12
= control target key start
LH: loop header
LB: loop body
LE: loop exit
PB: predicated region body
PF: predicated region fallthrough
CT: control target
= control target key end

     0   :  { %s598_s12 = smov 0   ;;  %s689_s0 = inlined_call_operand.vmem [shape: f32[8,64,256], index: 0, kind: input, shape index: {}]   ;;  %s690_s1 = inlined_call_operand.vmem [shape: f32[8,256,128], index: 1, kind: input, shape index: {}]   ;;  %s691_s2 = inlined_call_operand.vmem [shape: f32[8,1,128], index: 2, kind: input, shape index: {}]   ;;  %s692_s3 = inlined_call_operand.vmem [shape: f32[8,64,128], index: 3, kind: output, shape index: {}]  }
   0x1 LB: > { %s457_s13 = sadd.s32 4294967295, %s576_s12   ;;  %p461_p0 = scmp.ge.s32.totalorder %s576_s12, 1  ;;  %s576_s12 = sphi %s598_s12, %s13_s12  }
   0x2   : > { %p155_p1 = scmp.lt.s32.totalorder %s576_s12, 9 }
   0x4   : > { %p156_p2 = pnand %p461_p0, %p155_p1 }
   0x5   : > { %p187_p3 = scmp.lt.s32.totalorder (!%p156_p2), %s457_s13, 7 }
   0x6   : > { %159 = sbr.rel (%p156_p2) target bundleno = 262 (0x106), region = 32 }
   0xb   : > { %s694_s13 = smov (!%p187_p3, %s457_s13), 7 }
   0xc   : > { %s472_s14 = sshll.u32 %s694_s13, 8  ;;  %s471_s18 = sshll.u32 %s694_s13, 7 }
   0xd   : > { %s612_s17 = scalar_lea.vmem %s690_s1, %s472_s14  ;;  %s648_s21 = scalar_lea.vmem %s689_s0, %s471_s18 }
   0xe   : > { %v252_v0 = vld [vmem:[%s612_s17 + $0xf8] sm:$0xff]  ;;  %v251_v2 = vld [vmem:[%s612_s17 + $0xf0] sm:$0xff]  ;;  %v250_v4 = vld [vmem:[%s612_s17 + $0xe8] sm:$0xff]  ;;  %s199_s24 = scalar_lea.vmem %s691_s2, %s694_s13  ;;  %s473_s25 = sshll.u32 %s694_s13, 6 }
   0xf   : > { %v236_v1 = vld [vmem:[%s612_s17 + $0x78] sm:$0xff]  ;;  %474 = vmatprep.subr.mxu0 %v252_v0  ;;  %530 = vmatprep.subr.mxu1 %v252_v0  ;;  %v235_v3 = vld [vmem:[%s612_s17 + $0x70] sm:$0xff]  ;;  %v234_v5 = vld [vmem:[%s612_s17 + $0x68] sm:$0xff]  ;;  %s676_s28 = scalar_lea.vmem %s692_s3, %s473_s25 }
  0x10   : > { %475 = vmatpush3.msra.mxu0 %v236_v1  ;;  %546 = vmatpush3.msra.mxu1 %v236_v1  ;;  %v249_v6 = vld [vmem:[%s612_s17 + $0xe0] sm:$0xff]  ;;  %v248_v8 = vld [vmem:[%s612_s17 + $0xd8] sm:$0xff]  ;;  %v247_v10 = vld [vmem:[%s612_s17 + $0xd0] sm:$0xff] }
  0x11   : > { %476 = vmatprep.subr.mxu0 %v251_v2  ;;  %531 = vmatprep.subr.mxu1 %v251_v2  ;;  %v233_v7 = vld [vmem:[%s612_s17 + $0x60] sm:$0xff]  ;;  %v232_v9 = vld [vmem:[%s612_s17 + $0x58] sm:$0xff]  ;;  %v231_v11 = vld [vmem:[%s612_s17 + $0x50] sm:$0xff] }
  0x12   : > { %477 = vmatpush3.msra.mxu0 %v235_v3  ;;  %547 = vmatpush3.msra.mxu1 %v235_v3  ;;  %v246_v12 = vld [vmem:[%s612_s17 + $0xc8] sm:$0xff]  ;;  %v245_v14 = vld [vmem:[%s612_s17 + $0xc0] sm:$0xff]  ;;  %v244_v16 = vld [vmem:[%s612_s17 + $0xb8] sm:$0xff] }
  0x13   : > { %478 = vmatprep.subr.mxu0 %v250_v4  ;;  %532 = vmatprep.subr.mxu1 %v250_v4  ;;  %v230_v13 = vld [vmem:[%s612_s17 + $0x48] sm:$0xff]  ;;  %v229_v15 = vld [vmem:[%s612_s17 + $0x40] sm:$0xff]  ;;  %v228_v17 = vld [vmem:[%s612_s17 + $0x38] sm:$0xff] }
  0x14   : > { %479 = vmatpush3.msra.mxu0 %v234_v5  ;;  %548 = vmatpush3.msra.mxu1 %v234_v5  ;;  %v243_v18 = vld [vmem:[%s612_s17 + $0xb0] sm:$0xff]  ;;  %v242_v20 = vld [vmem:[%s612_s17 + $0xa8] sm:$0xff]  ;;  %v241_v22 = vld [vmem:[%s612_s17 + $0xa0] sm:$0xff] }
  0x15   : > { %480 = vmatprep.subr.mxu0 %v249_v6  ;;  %533 = vmatprep.subr.mxu1 %v249_v6  ;;  %v227_v19 = vld [vmem:[%s612_s17 + $0x30] sm:$0xff]  ;;  %v226_v21 = vld [vmem:[%s612_s17 + $0x28] sm:$0xff]  ;;  %v225_v23 = vld [vmem:[%s612_s17 + $0x20] sm:$0xff] }
  0x16   : > { %481 = vmatpush3.msra.mxu0 %v233_v7  ;;  %549 = vmatpush3.msra.mxu1 %v233_v7  ;;  %v240_v24 = vld [vmem:[%s612_s17 + $0x98] sm:$0xff]  ;;  %v239_v26 = vld [vmem:[%s612_s17 + $0x90] sm:$0xff]  ;;  %v238_v28 = vld [vmem:[%s612_s17 + $0x88] sm:$0xff] }
  0x17   : > { %482 = vmatprep.subr.mxu0 %v248_v8  ;;  %534 = vmatprep.subr.mxu1 %v248_v8  ;;  %v224_v25 = vld [vmem:[%s612_s17 + $0x18] sm:$0xff]  ;;  %v223_v27 = vld [vmem:[%s612_s17 + $0x10] sm:$0xff]  ;;  %v222_v29 = vld [vmem:[%s612_s17 + $0x8] sm:$0xff] }
  0x18   : > { %483 = vmatpush3.msra.mxu0 %v232_v9  ;;  %550 = vmatpush3.msra.mxu1 %v232_v9  ;;  %v237_v30 = vld [vmem:[%s612_s17 + $0x80] sm:$0xff]  ;;  %v206_v32 = vld [vmem:[%s648_s21 + $0x8] sm:$0xff]  ;;  %v208_v36 = vld [vmem:[%s648_s21 + $0x18] sm:$0xff] }
  0x19   : > { %484 = vmatprep.subr.mxu0 %v247_v10  ;;  %535 = vmatprep.subr.mxu1 %v247_v10  ;;  %v221_v31 = vld [vmem:[%s612_s17] sm:$0xff]  ;;  %v214_v33 = vld [vmem:[%s648_s21 + $0x48] sm:$0xff]  ;;  %v216_v37 = vld [vmem:[%s648_s21 + $0x58] sm:$0xff] }
  0x1a   : > { %485 = vmatpush3.msra.mxu0 %v231_v11  ;;  %551 = vmatpush3.msra.mxu1 %v231_v11  ;;  %v205_v34 = vld [vmem:[%s648_s21] sm:$0xff]  ;;  %v207_v38 = vld [vmem:[%s648_s21 + $0x10] sm:$0xff]  ;;  %v210_v40 = vld [vmem:[%s648_s21 + $0x28] sm:$0xff] }
  0x1b   : > { %486 = vmatprep.subr.mxu0 %v246_v12  ;;  %536 = vmatprep.subr.mxu1 %v246_v12  ;;  %v213_v35 = vld [vmem:[%s648_s21 + $0x40] sm:$0xff]  ;;  %v215_v39 = vld [vmem:[%s648_s21 + $0x50] sm:$0xff]  ;;  %v218_v41 = vld [vmem:[%s648_s21 + $0x68] sm:$0xff] }
  0x1c   : > { %487 = vmatpush3.msra.mxu0 %v230_v13  ;;  %552 = vmatpush3.msra.mxu1 %v230_v13  ;;  %v209_v42 = vld [vmem:[%s648_s21 + $0x20] sm:$0xff]  ;;  %v212_v44 = vld [vmem:[%s648_s21 + $0x38] sm:$0xff]  ;;  %v211_v46 = vld [vmem:[%s648_s21 + $0x30] sm:$0xff] }
  0x1d   : > { %488 = vmatprep.subr.mxu0 %v245_v14  ;;  %537 = vmatprep.subr.mxu1 %v245_v14  ;;  %v217_v43 = vld [vmem:[%s648_s21 + $0x60] sm:$0xff]  ;;  %v220_v45 = vld [vmem:[%s648_s21 + $0x78] sm:$0xff]  ;;  %v219_v47 = vld [vmem:[%s648_s21 + $0x70] sm:$0xff] }
  0x1e   : > { %489 = vmatpush3.msra.mxu0 %v229_v15  ;;  %553 = vmatpush3.msra.mxu1 %v229_v15  ;;  %v468_v50 = vld [vmem:[%s199_s24] ss:$0 sm:$0xff] }
  0x1f   : > { %490 = vmatprep.subr.mxu0 %v244_v16  ;;  %538 = vmatprep.subr.mxu1 %v244_v16 }
  0x20   : > { %491 = vmatpush3.msra.mxu0 %v228_v17  ;;  %554 = vmatpush3.msra.mxu1 %v228_v17 }
  0x21   : > { %492 = vmatprep.subr.mxu0 %v243_v18  ;;  %539 = vmatprep.subr.mxu1 %v243_v18 }
  0x22   : > { %493 = vmatpush3.msra.mxu0 %v227_v19  ;;  %555 = vmatpush3.msra.mxu1 %v227_v19 }
  0x23   : > { %494 = vmatprep.subr.mxu0 %v242_v20  ;;  %540 = vmatprep.subr.mxu1 %v242_v20 }
  0x24   : > { %495 = vmatpush3.msra.mxu0 %v226_v21  ;;  %556 = vmatpush3.msra.mxu1 %v226_v21 }
  0x25   : > { %496 = vmatprep.subr.mxu0 %v241_v22  ;;  %541 = vmatprep.subr.mxu1 %v241_v22 }
  0x26   : > { %497 = vmatpush3.msra.mxu0 %v225_v23  ;;  %557 = vmatpush3.msra.mxu1 %v225_v23 }
  0x27   : > { %498 = vmatprep.subr.mxu0 %v240_v24  ;;  %542 = vmatprep.subr.mxu1 %v240_v24 }
  0x28   : > { %499 = vmatpush3.msra.mxu0 %v224_v25  ;;  %558 = vmatpush3.msra.mxu1 %v224_v25 }
  0x29   : > { %500 = vmatprep.subr.mxu0 %v239_v26  ;;  %543 = vmatprep.subr.mxu1 %v239_v26 }
  0x2a   : > { %501 = vmatpush3.msra.mxu0 %v223_v27  ;;  %559 = vmatpush3.msra.mxu1 %v223_v27 }
  0x2b   : > { %502 = vmatprep.subr.mxu0 %v238_v28  ;;  %544 = vmatprep.subr.mxu1 %v238_v28 }
  0x2c   : > { %503 = vmatpush3.msra.mxu0 %v222_v29  ;;  %560 = vmatpush3.msra.mxu1 %v222_v29 }
  0x2d   : > { %504 = vmatprep.subr.mxu0 %v237_v30  ;;  %545 = vmatprep.subr.mxu1 %v237_v30 }
  0x2e   : > { %505 = vmatpush3.msra.mxu0 %v221_v31  ;;  %561 = vmatpush3.msra.mxu1 %v221_v31 }
  0x2f   : > { %324 = vmatprep.mubr.f32.mxu0 %v206_v32  ;;  %344 = vmatprep.mubr.f32.mxu1 %v214_v33 }
  0x30   : > { %325 = vmatmul.mubr.f32.vlgmr.msra.gmra.mxu0 %v205_v34  ;;  %345 = vmatmul.mubr.f32.vlgmr.msra.gmra.mxu1 %v213_v35 }
  0x31   : > { %329 = vmatprep.mubr.f32.mxu0 %v208_v36  ;;  %349 = vmatprep.mubr.f32.mxu1 %v216_v37 }
  0x34   : > { %330 = vmatmul.mubr.f32.gmra.mxu0 %v207_v38  ;;  %350 = vmatmul.mubr.f32.gmra.mxu1 %v215_v39 }
  0x35   : > { %334 = vmatprep.mubr.f32.mxu0 %v210_v40  ;;  %354 = vmatprep.mubr.f32.mxu1 %v218_v41 }
  0x38   : > { %335 = vmatmul.mubr.f32.gmra.mxu0 %v209_v42  ;;  %355 = vmatmul.mubr.f32.gmra.mxu1 %v217_v43 }
  0x39   : > { %339 = vmatprep.mubr.f32.mxu0 %v212_v44  ;;  %359 = vmatprep.mubr.f32.mxu1 %v220_v45 }
  0x3c   : > { %340 = vmatmul.mubr.f32.gmra.mxu0 %v211_v46  ;;  %360 = vmatmul.mubr.f32.gmra.mxu1 %v219_v47 }
  0xf0   : > { %v506_v48 = vpop.f32.mrf.mxu0  ;;  %v518_v49 = vpop.f32.mrf.mxu1 }
  0xf2   : > { %v507_v51 = vpop.f32.mrf.mxu0  ;;  %v519_v52 = vpop.f32.mrf.mxu1 }
  0xf3   : > { %v508_v53 = vadd.f32 %v507_v51, %v506_v48  ;;  %v520_v54 = vadd.f32 %v519_v52, %v518_v49 }
  0xf4   : > { %v509_v55 = vpop.f32.mrf.mxu0  ;;  %v521_v56 = vpop.f32.mrf.mxu1 }
  0xf5   : > { %v327_v57 = vadd.f32 %v508_v53, %v468_v50  ;;  %v347_v58 = vadd.f32 %v520_v54, %v468_v50 }
  0xf6   : > { %v510_v59 = vpop.f32.mrf.mxu0  ;;  %v522_v60 = vpop.f32.mrf.mxu1 }
  0xf7   : > { %v365_v61 = vmax.f32 %v327_v57, 0.0  ;;  %v369_v62 = vmax.f32 %v347_v58, 0.0  ;;  %v511_v63 = vadd.f32 %v510_v59, %v509_v55  ;;  %v523_v0 = vadd.f32 %v522_v60, %v521_v56 }
  0xf8   : > { %v512_v1 = vpop.f32.mrf.mxu0  ;;  %v524_v2 = vpop.f32.mrf.mxu1 }
  0xf9   : > { %373 = vst [vmem:[%s676_s28] sm:$0xff] %v365_v61  ;;  %377 = vst [vmem:[%s676_s28 + $0x20] sm:$0xff] %v369_v62  ;;  %v332_v3 = vadd.f32 %v511_v63, %v468_v50  ;;  %v352_v4 = vadd.f32 %v523_v0, %v468_v50 }
  0xfa   : > { %v513_v5 = vpop.f32.mrf.mxu0  ;;  %v525_v6 = vpop.f32.mrf.mxu1 }
  0xfb   : > { %v366_v7 = vmax.f32 %v332_v3, 0.0  ;;  %v370_v8 = vmax.f32 %v352_v4, 0.0  ;;  %v514_v9 = vadd.f32 %v513_v5, %v512_v1  ;;  %v526_v10 = vadd.f32 %v525_v6, %v524_v2 }
  0xfc   : > { %v515_v11 = vpop.f32.mrf.mxu0  ;;  %v527_v12 = vpop.f32.mrf.mxu1 }
  0xfd   : > { %374 = vst [vmem:[%s676_s28 + $0x8] sm:$0xff] %v366_v7  ;;  %378 = vst [vmem:[%s676_s28 + $0x28] sm:$0xff] %v370_v8  ;;  %v337_v13 = vadd.f32 %v514_v9, %v468_v50  ;;  %v357_v14 = vadd.f32 %v526_v10, %v468_v50 }
  0xfe   : > { %v516_v15 = vpop.f32.mrf.mxu0  ;;  %v528_v16 = vpop.f32.mrf.mxu1 }
  0xff   : > { %v367_v17 = vmax.f32 %v337_v13, 0.0  ;;  %v371_v18 = vmax.f32 %v357_v14, 0.0  ;;  %v517_v19 = vadd.f32 %v516_v15, %v515_v11  ;;  %v529_v20 = vadd.f32 %v528_v16, %v527_v12 }
 0x101   : > { %375 = vst [vmem:[%s676_s28 + $0x10] sm:$0xff] %v367_v17  ;;  %379 = vst [vmem:[%s676_s28 + $0x30] sm:$0xff] %v371_v18  ;;  %v342_v21 = vadd.f32 %v517_v19, %v468_v50  ;;  %v362_v22 = vadd.f32 %v529_v20, %v468_v50 }
 0x103   : > { %v368_v23 = vmax.f32 %v342_v21, 0.0  ;;  %v372_v24 = vmax.f32 %v362_v22, 0.0 }
 0x105   : > { %376 = vst [vmem:[%s676_s28 + $0x18] sm:$0xff] %v368_v23  ;;  %380 = vst [vmem:[%s676_s28 + $0x38] sm:$0xff] %v372_v24 }
 0x106 PF: > { %s13_s12 = sadd.s32 1, %s576_s12  }
 0x107   : > { %p10_p4 = scmp.ge.s32.totalorder %s13_s12, 10  }
 0x109   :  { %12 = sbr.rel (!%p10_p4) target bundleno = 1 (0x1), region = 68 }

// kernel: forward_pallas.13
= control target key start
LH: loop header
LB: loop body
LE: loop exit
PB: predicated region body
PF: predicated region fallthrough
CT: control target
= control target key end

     0   :  { %s544_s12 = smov 0   ;;  %s594_s0 = inlined_call_operand.vmem [shape: f32[8,32,128], index: 0, kind: input, shape index: {}]   ;;  %s595_s1 = inlined_call_operand.vmem [shape: f32[8,128,128], index: 1, kind: input, shape index: {}]   ;;  %s596_s2 = inlined_call_operand.vmem [shape: f32[8,1,128], index: 2, kind: input, shape index: {}]   ;;  %s597_s3 = inlined_call_operand.vmem [shape: f32[8,32,128], index: 3, kind: output, shape index: {}]  }
   0x1 LB: > { %s401_s13 = sadd.s32 4294967295, %s522_s12   ;;  %p405_p0 = scmp.ge.s32.totalorder %s522_s12, 1  ;;  %s522_s12 = sphi %s544_s12, %s13_s12  }
   0x2   : > { %p155_p1 = scmp.lt.s32.totalorder %s522_s12, 9 }
   0x4   : > { %p156_p2 = pnand %p405_p0, %p155_p1 }
   0x5   : > { %p187_p3 = scmp.lt.s32.totalorder (!%p156_p2), %s401_s13, 7 }
   0x6   : > { %159 = sbr.rel (%p156_p2) target bundleno = 248 (0xf8), region = 32 }
   0xb   : > { %s599_s13 = smov (!%p187_p3, %s401_s13), 7 }
   0xc   : > { %s416_s14 = sshll.u32 %s599_s13, 7  ;;  %s415_s18 = sshll.u32 %s599_s13, 5 }
   0xd   : > { %s558_s17 = scalar_lea.vmem %s595_s1, %s416_s14  ;;  %s191_s21 = scalar_lea.vmem %s594_s0, %s415_s18 }
   0xe   : > { %v224_v0 = vld [vmem:[%s558_s17 + $0x78] sm:$0xff]  ;;  %v223_v1 = vld [vmem:[%s558_s17 + $0x70] sm:$0xff]  ;;  %v222_v2 = vld [vmem:[%s558_s17 + $0x68] sm:$0xff]  ;;  %s199_s24 = scalar_lea.vmem %s596_s2, %s599_s13  ;;  %s204_s27 = scalar_lea.vmem %s597_s3, %s415_s18 }
   0xf   : > { %438 = vmatprep.subr.mxu0 %v224_v0  ;;  %476 = vmatprep.subr.mxu1 %v224_v0  ;;  %v221_v3 = vld [vmem:[%s558_s17 + $0x60] sm:$0xff]  ;;  %v220_v4 = vld [vmem:[%s558_s17 + $0x58] sm:$0xff]  ;;  %v219_v5 = vld [vmem:[%s558_s17 + $0x50] sm:$0xff] }
  0x10   : > { %439 = vmatpush3.msra.mxu0 %v224_v0  ;;  %492 = vmatpush3.msra.mxu1 %v224_v0  ;;  %v218_v6 = vld [vmem:[%s558_s17 + $0x48] sm:$0xff]  ;;  %v217_v7 = vld [vmem:[%s558_s17 + $0x40] sm:$0xff]  ;;  %v216_v8 = vld [vmem:[%s558_s17 + $0x38] sm:$0xff] }
  0x11   : > { %440 = vmatprep.subr.mxu0 %v223_v1  ;;  %477 = vmatprep.subr.mxu1 %v223_v1  ;;  %v215_v9 = vld [vmem:[%s558_s17 + $0x30] sm:$0xff]  ;;  %v214_v10 = vld [vmem:[%s558_s17 + $0x28] sm:$0xff]  ;;  %v213_v11 = vld [vmem:[%s558_s17 + $0x20] sm:$0xff] }
  0x12   : > { %441 = vmatpush3.msra.mxu0 %v223_v1  ;;  %493 = vmatpush3.msra.mxu1 %v223_v1  ;;  %v212_v12 = vld [vmem:[%s558_s17 + $0x18] sm:$0xff]  ;;  %v211_v13 = vld [vmem:[%s558_s17 + $0x10] sm:$0xff]  ;;  %v210_v14 = vld [vmem:[%s558_s17 + $0x8] sm:$0xff] }
  0x13   : > { %442 = vmatprep.subr.mxu0 %v222_v2  ;;  %478 = vmatprep.subr.mxu1 %v222_v2  ;;  %v209_v15 = vld [vmem:[%s558_s17] sm:$0xff]  ;;  %v207_v17 = vld [vmem:[%s191_s21 + $0x10] sm:$0xff]  ;;  %v206_v18 = vld [vmem:[%s191_s21 + $0x8] sm:$0xff] }
  0x14   : > { %443 = vmatpush3.msra.mxu0 %v222_v2  ;;  %494 = vmatpush3.msra.mxu1 %v222_v2  ;;  %v205_v16 = vld [vmem:[%s191_s21] sm:$0xff]  ;;  %v208_v19 = vld [vmem:[%s191_s21 + $0x18] sm:$0xff] }
  0x15   : > { %444 = vmatprep.subr.mxu0 %v221_v3  ;;  %479 = vmatprep.subr.mxu1 %v221_v3  ;;  %v412_v20 = vld [vmem:[%s199_s24] ss:$0 sm:$0xff] }
  0x16   : > { %445 = vmatpush3.msra.mxu0 %v221_v3  ;;  %495 = vmatpush3.msra.mxu1 %v221_v3 }
  0x17   : > { %446 = vmatprep.subr.mxu0 %v220_v4  ;;  %480 = vmatprep.subr.mxu1 %v220_v4 }
  0x18   : > { %447 = vmatpush3.msra.mxu0 %v220_v4  ;;  %496 = vmatpush3.msra.mxu1 %v220_v4 }
  0x19   : > { %448 = vmatprep.subr.mxu0 %v219_v5  ;;  %481 = vmatprep.subr.mxu1 %v219_v5 }
  0x1a   : > { %449 = vmatpush3.msra.mxu0 %v219_v5  ;;  %497 = vmatpush3.msra.mxu1 %v219_v5 }
  0x1b   : > { %450 = vmatprep.subr.mxu0 %v218_v6  ;;  %482 = vmatprep.subr.mxu1 %v218_v6 }
  0x1c   : > { %451 = vmatpush3.msra.mxu0 %v218_v6  ;;  %498 = vmatpush3.msra.mxu1 %v218_v6 }
  0x1d   : > { %452 = vmatprep.subr.mxu0 %v217_v7  ;;  %483 = vmatprep.subr.mxu1 %v217_v7 }
  0x1e   : > { %453 = vmatpush3.msra.mxu0 %v217_v7  ;;  %499 = vmatpush3.msra.mxu1 %v217_v7 }
  0x1f   : > { %454 = vmatprep.subr.mxu0 %v216_v8  ;;  %484 = vmatprep.subr.mxu1 %v216_v8 }
  0x20   : > { %455 = vmatpush3.msra.mxu0 %v216_v8  ;;  %500 = vmatpush3.msra.mxu1 %v216_v8 }
  0x21   : > { %456 = vmatprep.subr.mxu0 %v215_v9  ;;  %485 = vmatprep.subr.mxu1 %v215_v9 }
  0x22   : > { %457 = vmatpush3.msra.mxu0 %v215_v9  ;;  %501 = vmatpush3.msra.mxu1 %v215_v9 }
  0x23   : > { %458 = vmatprep.subr.mxu0 %v214_v10  ;;  %486 = vmatprep.subr.mxu1 %v214_v10 }
  0x24   : > { %459 = vmatpush3.msra.mxu0 %v214_v10  ;;  %502 = vmatpush3.msra.mxu1 %v214_v10 }
  0x25   : > { %460 = vmatprep.subr.mxu0 %v213_v11  ;;  %487 = vmatprep.subr.mxu1 %v213_v11 }
  0x26   : > { %461 = vmatpush3.msra.mxu0 %v213_v11  ;;  %503 = vmatpush3.msra.mxu1 %v213_v11 }
  0x27   : > { %462 = vmatprep.subr.mxu0 %v212_v12  ;;  %488 = vmatprep.subr.mxu1 %v212_v12 }
  0x28   : > { %463 = vmatpush3.msra.mxu0 %v212_v12  ;;  %504 = vmatpush3.msra.mxu1 %v212_v12 }
  0x29   : > { %464 = vmatprep.subr.mxu0 %v211_v13  ;;  %489 = vmatprep.subr.mxu1 %v211_v13 }
  0x2a   : > { %465 = vmatpush3.msra.mxu0 %v211_v13  ;;  %505 = vmatpush3.msra.mxu1 %v211_v13 }
  0x2b   : > { %466 = vmatprep.subr.mxu0 %v210_v14  ;;  %490 = vmatprep.subr.mxu1 %v210_v14 }
  0x2c   : > { %467 = vmatpush3.msra.mxu0 %v210_v14  ;;  %506 = vmatpush3.msra.mxu1 %v210_v14 }
  0x2d   : > { %468 = vmatprep.subr.mxu0 %v209_v15  ;;  %491 = vmatprep.subr.mxu1 %v209_v15 }
  0x2e   : > { %469 = vmatpush3.msra.mxu0 %v209_v15  ;;  %507 = vmatpush3.msra.mxu1 %v209_v15 }
  0x2f   : > { %470 = vmatprep.mubr.f32.mxu0 %v205_v16  ;;  %473 = vmatprep.mubr.f32.mxu1 %v207_v17 }
  0x30   : > { %471 = vmatmul.mubr.f32.vlgmr.msra.gmra.mxu0 %v206_v18  ;;  %474 = vmatmul.mubr.f32.vlgmr.msra.gmra.mxu1 %v208_v19 }
  0xf0   : > { %v472_v21 = vpop.f32.mrf.mxu0  ;;  %v475_v22 = vpop.f32.mrf.mxu1 }
  0xf1   : > { %v304_v23 = vadd.f32 %v472_v21, %v412_v20  ;;  %v314_v24 = vadd.f32 %v475_v22, %v412_v20 }
  0xf2   : > { %v298_v25 = vpop.f32.mrf.mxu0  ;;  %v308_v26 = vpop.f32.mrf.mxu1 }
  0xf3   : > { %v318_v27 = vmax.f32 %v304_v23, 0.0  ;;  %v320_v28 = vmax.f32 %v314_v24, 0.0  ;;  %v299_v29 = vadd.f32 %v412_v20, %v298_v25  ;;  %v309_v30 = vadd.f32 %v412_v20, %v308_v26 }
  0xf5   : > { %322 = vst [vmem:[%s204_s27 + $0x8] sm:$0xff] %v318_v27  ;;  %324 = vst [vmem:[%s204_s27 + $0x18] sm:$0xff] %v320_v28  ;;  %v317_v31 = vmax.f32 %v299_v29, 0.0  ;;  %v319_v32 = vmax.f32 %v309_v30, 0.0 }
  0xf7   : > { %321 = vst [vmem:[%s204_s27] sm:$0xff] %v317_v31  ;;  %323 = vst [vmem:[%s204_s27 + $0x10] sm:$0xff] %v319_v32 }
  0xf8 PF: > { %s13_s12 = sadd.s32 1, %s522_s12  }
  0xf9   : > { %p10_p4 = scmp.ge.s32.totalorder %s13_s12, 10  }
  0xfb   :  { %12 = sbr.rel (!%p10_p4) target bundleno = 1 (0x1), region = 68 }

// kernel: forward_pallas.14
= control target key start
LH: loop header
LB: loop body
LE: loop exit
PB: predicated region body
PF: predicated region fallthrough
CT: control target
= control target key end

     0   :  { %s605_s12 = smov 0   ;;  %s711_s0 = inlined_call_operand.vmem [shape: f32[8,16,384], index: 0, kind: input, shape index: {}]   ;;  %s712_s1 = inlined_call_operand.vmem [shape: f32[8,384,128], index: 1, kind: input, shape index: {}]   ;;  %s713_s2 = inlined_call_operand.vmem [shape: f32[8,1,128], index: 2, kind: input, shape index: {}]   ;;  %s714_s3 = inlined_call_operand.vmem [shape: f32[16,128], index: 3, kind: output, shape index: {}]  }
   0x1 LB: > { %s464_s13 = sadd.s32 4294967295, %s582_s12   ;;  %p467_p0 = scmp.ge.s32.totalorder %s582_s12, 1  ;;  %s582_s12 = sphi %s605_s12, %s13_s12  }
   0x2   : > { %p150_p1 = scmp.lt.s32.totalorder %s582_s12, 9 }
   0x4   : > { %p151_p2 = pnand %p467_p0, %p150_p1 }
   0x5   : > { %p177_p3 = scmp.lt.s32.totalorder (!%p151_p2), %s464_s13, 7  ;;  %p470_p4 = scmp.ne.s32.totalorder (!%p151_p2), %s464_s13, 0 }
   0x6   : > { %154 = sbr.rel (%p151_p2) target bundleno = 262 (0x106), region = 32 }
   0xb   : > { %s613_s14 = scalar_select %p177_p3, %s464_s13, 7 }
   0xc   : > { %193 = sbr.rel (%p470_p4) target bundleno = 19 (0x13), region = 36 }
   0xd   : > { %s565_s15 = smul.u32 48, %s613_s14  ;;  %s189_s18 = scalar_lea.vmem %s713_s2, %s613_s14 }
   0xe   : > { %s566_s19 = smul.u32 384, %s613_s14 }
   0xf   : > { %s624_s22 = scalar_lea.vmem %s711_s0, %s565_s15 }
  0x10   : > { %s629_s25 = scalar_lea.vmem %s712_s1, %s566_s19 }
  0x11   : > { %v584_v0 = vmov 0.0  }
  0x12   : > { %194 = vst [vmem:[%s714_s3] sm:$0xff] %v584_v0  ;;  %195 = vst [vmem:[%s714_s3 + $0x8] sm:$0xff] %v584_v0 }
  0x13 PF: > { %v233_v1 = vld [vmem:[%s629_s25 + $0xf8] sm:$0xff]  ;;  %v232_v3 = vld [vmem:[%s629_s25 + $0xf0] sm:$0xff]  ;;  %v231_v6 = vld [vmem:[%s629_s25 + $0xe8] sm:$0xff] }
  0x14   : > { %v217_v2 = vld [vmem:[%s629_s25 + $0x78] sm:$0xff]  ;;  %474 = vmatprep.subr.mxu0 %v233_v1  ;;  %v216_v4 = vld [vmem:[%s629_s25 + $0x70] sm:$0xff]  ;;  %v215_v8 = vld [vmem:[%s629_s25 + $0x68] sm:$0xff] }
  0x15   : > { %v249_v5 = vld [vmem:[%s629_s25 + $0x178] sm:$0xff]  ;;  %475 = vmatpush3.msra.mxu0 %v217_v2  ;;  %v248_v7 = vld [vmem:[%s629_s25 + $0x170] sm:$0xff]  ;;  %v247_v9 = vld [vmem:[%s629_s25 + $0x168] sm:$0xff] }
  0x16   : > { %530 = vmatprep.subr.mxu1 %v249_v5  ;;  %476 = vmatprep.subr.mxu0 %v232_v3  ;;  %v230_v10 = vld [vmem:[%s629_s25 + $0xe0] sm:$0xff]  ;;  %v229_v13 = vld [vmem:[%s629_s25 + $0xd8] sm:$0xff]  ;;  %v228_v16 = vld [vmem:[%s629_s25 + $0xd0] sm:$0xff] }
  0x17   : > { %531 = vmatpush3.msra.mxu1 %v249_v5  ;;  %477 = vmatpush3.msra.mxu0 %v216_v4  ;;  %v214_v11 = vld [vmem:[%s629_s25 + $0x60] sm:$0xff]  ;;  %v213_v14 = vld [vmem:[%s629_s25 + $0x58] sm:$0xff]  ;;  %v212_v17 = vld [vmem:[%s629_s25 + $0x50] sm:$0xff] }
  0x18   : > { %532 = vmatprep.subr.mxu1 %v248_v7  ;;  %478 = vmatprep.subr.mxu0 %v231_v6  ;;  %v246_v12 = vld [vmem:[%s629_s25 + $0x160] sm:$0xff]  ;;  %v245_v15 = vld [vmem:[%s629_s25 + $0x158] sm:$0xff]  ;;  %v244_v18 = vld [vmem:[%s629_s25 + $0x150] sm:$0xff] }
  0x19   : > { %533 = vmatpush3.msra.mxu1 %v248_v7  ;;  %479 = vmatpush3.msra.mxu0 %v215_v8  ;;  %v227_v19 = vld [vmem:[%s629_s25 + $0xc8] sm:$0xff]  ;;  %v226_v22 = vld [vmem:[%s629_s25 + $0xc0] sm:$0xff]  ;;  %v225_v25 = vld [vmem:[%s629_s25 + $0xb8] sm:$0xff] }
  0x1a   : > { %534 = vmatprep.subr.mxu1 %v247_v9  ;;  %480 = vmatprep.subr.mxu0 %v230_v10  ;;  %v211_v20 = vld [vmem:[%s629_s25 + $0x48] sm:$0xff]  ;;  %v210_v23 = vld [vmem:[%s629_s25 + $0x40] sm:$0xff]  ;;  %v209_v26 = vld [vmem:[%s629_s25 + $0x38] sm:$0xff] }
  0x1b   : > { %535 = vmatpush3.msra.mxu1 %v247_v9  ;;  %481 = vmatpush3.msra.mxu0 %v214_v11  ;;  %v243_v21 = vld [vmem:[%s629_s25 + $0x148] sm:$0xff]  ;;  %v242_v24 = vld [vmem:[%s629_s25 + $0x140] sm:$0xff]  ;;  %v241_v27 = vld [vmem:[%s629_s25 + $0x138] sm:$0xff] }
  0x1c   : > { %536 = vmatprep.subr.mxu1 %v246_v12  ;;  %482 = vmatprep.subr.mxu0 %v229_v13  ;;  %v224_v28 = vld [vmem:[%s629_s25 + $0xb0] sm:$0xff]  ;;  %v223_v31 = vld [vmem:[%s629_s25 + $0xa8] sm:$0xff]  ;;  %v222_v34 = vld [vmem:[%s629_s25 + $0xa0] sm:$0xff] }
  0x1d   : > { %537 = vmatpush3.msra.mxu1 %v246_v12  ;;  %483 = vmatpush3.msra.mxu0 %v213_v14  ;;  %v208_v29 = vld [vmem:[%s629_s25 + $0x30] sm:$0xff]  ;;  %v207_v32 = vld [vmem:[%s629_s25 + $0x28] sm:$0xff]  ;;  %v206_v35 = vld [vmem:[%s629_s25 + $0x20] sm:$0xff] }
  0x1e   : > { %538 = vmatprep.subr.mxu1 %v245_v15  ;;  %484 = vmatprep.subr.mxu0 %v228_v16  ;;  %v240_v30 = vld [vmem:[%s629_s25 + $0x130] sm:$0xff]  ;;  %v239_v33 = vld [vmem:[%s629_s25 + $0x128] sm:$0xff]  ;;  %v238_v36 = vld [vmem:[%s629_s25 + $0x120] sm:$0xff] }
  0x1f   : > { %539 = vmatpush3.msra.mxu1 %v245_v15  ;;  %485 = vmatpush3.msra.mxu0 %v212_v17  ;;  %v221_v37 = vld [vmem:[%s629_s25 + $0x98] sm:$0xff]  ;;  %v220_v40 = vld [vmem:[%s629_s25 + $0x90] sm:$0xff]  ;;  %v219_v43 = vld [vmem:[%s629_s25 + $0x88] sm:$0xff] }
  0x20   : > { %540 = vmatprep.subr.mxu1 %v244_v18  ;;  %486 = vmatprep.subr.mxu0 %v227_v19  ;;  %v205_v38 = vld [vmem:[%s629_s25 + $0x18] sm:$0xff]  ;;  %v204_v41 = vld [vmem:[%s629_s25 + $0x10] sm:$0xff]  ;;  %v197_v44 = vld [vmem:[%s624_s22 + $0x8] sm:$0xff] }
  0x21   : > { %541 = vmatpush3.msra.mxu1 %v244_v18  ;;  %487 = vmatpush3.msra.mxu0 %v211_v20  ;;  %v237_v39 = vld [vmem:[%s629_s25 + $0x118] sm:$0xff]  ;;  %v236_v42 = vld [vmem:[%s629_s25 + $0x110] sm:$0xff]  ;;  %v203_v45 = vld [vmem:[%s629_s25 + $0x8] sm:$0xff] }
  0x22   : > { %542 = vmatprep.subr.mxu1 %v243_v21  ;;  %488 = vmatprep.subr.mxu0 %v226_v22  ;;  %v218_v46 = vld [vmem:[%s629_s25 + $0x80] sm:$0xff]  ;;  %v235_v47 = vld [vmem:[%s629_s25 + $0x108] sm:$0xff]  ;;  %v198_v52 = vld [vmem:[%s624_s22 + $0x10] sm:$0xff] }
  0x23   : > { %543 = vmatpush3.msra.mxu1 %v243_v21  ;;  %489 = vmatpush3.msra.mxu0 %v210_v23  ;;  %v202_v48 = vld [vmem:[%s629_s25] sm:$0xff]  ;;  %v201_v53 = vld [vmem:[%s624_s22 + $0x28] sm:$0xff]  ;;  %v199_v54 = vld [vmem:[%s624_s22 + $0x18] sm:$0xff] }
  0x24   : > { %544 = vmatprep.subr.mxu1 %v242_v24  ;;  %490 = vmatprep.subr.mxu0 %v225_v25  ;;  %v196_v49 = vld [vmem:[%s624_s22] sm:$0xff]  ;;  %v408_v7 = vld [vmem:[%s714_s3 + $0x8] sm:$0xff] }
  0x25   : > { %545 = vmatpush3.msra.mxu1 %v242_v24  ;;  %491 = vmatpush3.msra.mxu0 %v209_v26  ;;  %v234_v50 = vld [vmem:[%s629_s25 + $0x100] sm:$0xff] }
  0x26   : > { %546 = vmatprep.subr.mxu1 %v241_v27  ;;  %492 = vmatprep.subr.mxu0 %v224_v28  ;;  %v200_v51 = vld [vmem:[%s624_s22 + $0x20] sm:$0xff] }
  0x27   : > { %547 = vmatpush3.msra.mxu1 %v241_v27  ;;  %493 = vmatpush3.msra.mxu0 %v208_v29  ;;  %v471_v57 = vld [vmem:[%s189_s18] ss:$0 sm:$0xff] }
  0x28   : > { %548 = vmatprep.subr.mxu1 %v240_v30  ;;  %494 = vmatprep.subr.mxu0 %v223_v31  ;;  %v407_v2 = vld [vmem:[%s714_s3] sm:$0xff] }
  0x29   : > { %549 = vmatpush3.msra.mxu1 %v240_v30  ;;  %495 = vmatpush3.msra.mxu0 %v207_v32 }
  0x2a   : > { %550 = vmatprep.subr.mxu1 %v239_v33  ;;  %496 = vmatprep.subr.mxu0 %v222_v34 }
  0x2b   : > { %551 = vmatpush3.msra.mxu1 %v239_v33  ;;  %497 = vmatpush3.msra.mxu0 %v206_v35 }
  0x2c   : > { %552 = vmatprep.subr.mxu1 %v238_v36  ;;  %498 = vmatprep.subr.mxu0 %v221_v37 }
  0x2d   : > { %553 = vmatpush3.msra.mxu1 %v238_v36  ;;  %499 = vmatpush3.msra.mxu0 %v205_v38 }
  0x2e   : > { %554 = vmatprep.subr.mxu1 %v237_v39  ;;  %500 = vmatprep.subr.mxu0 %v220_v40 }
  0x2f   : > { %555 = vmatpush3.msra.mxu1 %v237_v39  ;;  %501 = vmatpush3.msra.mxu0 %v204_v41 }
  0x30   : > { %556 = vmatprep.subr.mxu1 %v236_v42  ;;  %502 = vmatprep.subr.mxu0 %v219_v43 }
  0x31   : > { %321 = vmatprep.mubr.f32.mxu0 %v197_v44  ;;  %503 = vmatpush3.msra.mxu0 %v203_v45 }
  0x32   : > { %557 = vmatpush3.msra.mxu1 %v236_v42  ;;  %504 = vmatprep.subr.mxu0 %v218_v46 }
  0x33   : > { %558 = vmatprep.subr.mxu1 %v235_v47  ;;  %505 = vmatpush3.msra.mxu0 %v202_v48 }
  0x34   : > { %559 = vmatpush3.msra.mxu1 %v235_v47  ;;  %322 = vmatmul.mubr.f32.vlgmr.msra.gmra.mxu0 %v196_v49 }
  0x35   : > { %560 = vmatprep.subr.mxu1 %v234_v50  ;;  %326 = vmatprep.mubr.f32.mxu0 %v200_v51 }
  0x36   : > { %561 = vmatpush3.msra.mxu1 %v234_v50  ;;  %562 = vmatprep.mubr.f32.mxu1 %v198_v52 }
  0x37   : > { %563 = vmatmul.mubr.f32.vlgmr.msra.gmra.mxu1 %v201_v53 }
  0x38   : > { %327 = vmatmul.mubr.f32.gmra.mxu0 %v199_v54 }
  0xf4   : > { %v506_v55 = vpop.f32.mrf.mxu0 }
  0xf6   : > { %v507_v56 = vpop.f32.mrf.mxu0 }
  0xf7   : > { %v508_v58 = vadd.f32 %v507_v56, %v506_v55  ;;  %v564_v59 = vpop.f32.mrf.mxu1 }
  0xf8   : > { %v509_v60 = vpop.f32.mrf.mxu0 }
  0xf9   : > { %v324_v61 = vadd.f32 %v508_v58, %v471_v57  ;;  %v398_v62 = vpop.f32.mrf.mxu1 }
  0xfa   : > { %v510_v63 = vpop.f32.mrf.mxu0 }
  0xfb   : > { %v511_v0 = vadd.f32 %v510_v63, %v509_v60  ;;  %v399_v1 = vadd.f32 %v398_v62, %v324_v61 }
  0xfd   : > { %v329_v3 = vadd.f32 %v511_v0, %v471_v57  ;;  %v409_v4 = vmax.f32 %v399_v1, 0.0 }
  0xff   : > { %v404_v5 = vadd.f32 %v564_v59, %v329_v3  ;;  %v411_v6 = vadd.f32 %v409_v4, %v407_v2 }
 0x101   : > { %v410_v8 = vmax.f32 %v404_v5, 0.0  ;;  %413 = vst [vmem:[%s714_s3] sm:$0xff] %v411_v6 }
 0x103   : > { %v412_v9 = vadd.f32 %v410_v8, %v408_v7 }
 0x105   : > { %414 = vst [vmem:[%s714_s3 + $0x8] sm:$0xff] %v412_v9 }
 0x106 PF: > { %s13_s12 = sadd.s32 1, %s582_s12  }
 0x107   : > { %p10_p5 = scmp.ge.s32.totalorder %s13_s12, 10  }
 0x109   :  { %12 = sbr.rel (!%p10_p5) target bundleno = 1 (0x1), region = 68 }

// kernel: forward_pallas.15
= control target key start
LH: loop header
LB: loop body
LE: loop exit
PB: predicated region body
PF: predicated region fallthrough
CT: control target
= control target key end

     0   :  { %vm27_vm0 = vcmask 261120   ;;  %s184_s1 = inlined_call_operand.vmem [shape: f32[32,128], index: 1, kind: input, shape index: {}]   ;;  %s185_s0 = inlined_call_operand.vmem [shape: f32[16,32], index: 0, kind: input, shape index: {}]   ;;  %s186_s2 = inlined_call_operand.vmem [shape: f32[1,128], index: 2, kind: input, shape index: {}]   ;;  %s187_s3 = inlined_call_operand.vmem [shape: f32[16,128], index: 3, kind: output, shape index: {}]  }
   0x1   :  { %v19_v0 = vld [vmem:[%s184_s1 + $0x18] sm:$0xff]  ;;  %v18_v1 = vld [vmem:[%s184_s1 + $0x10] sm:$0xff]  ;;  %v14_v2 = vld [vmem:[%s185_s0] sm:$0xff] }
   0x2   :  { %124 = vmatprep.subr.mxu0 %v19_v0  ;;  %v17_v3 = vld [vmem:[%s184_s1 + $0x8] sm:$0xff]  ;;  %132 = vmatprep.mubr.msk.f32.mxu0 %vm27_vm0, %v14_v2  ;;  %v16_v4 = vld [vmem:[%s184_s1] sm:$0xff] }
   0x3   :  { %125 = vmatpush3.msra.mxu0 %v19_v0  ;;  %v15_v5 = vld [vmem:[%s185_s0 + $0x8] sm:$0xff]  ;;  %v115_v6 = vld [vmem:[%s186_s2] ss:$0 sm:$0xff] }
   0x4   :  { %126 = vmatprep.subr.mxu0 %v18_v1 }
   0x5   :  { %127 = vmatpush3.msra.mxu0 %v18_v1 }
   0x6   :  { %128 = vmatprep.subr.mxu0 %v17_v3 }
   0x7   :  { %129 = vmatpush3.msra.mxu0 %v17_v3 }
   0x8   :  { %130 = vmatprep.subr.mxu0 %v16_v4 }
   0x9   :  { %131 = vmatpush3.msra.mxu0 %v16_v4 }
   0xa   :  { %133 = vmatmul.mubr.msk.f32.vlgmr.msra.gmra.mxu0 %vm27_vm0, %v15_v5 }
  0xca   :  { %v134_v7 = vpop.f32.mrf.mxu0 }
  0xcb   :  { %v106_v8 = vadd.f32 %v134_v7, %v115_v6 }
  0xcc   :  { %v100_v9 = vpop.f32.mrf.mxu0 }
  0xcd   :  { %110 = vst [vmem:[%s187_s3 + $0x8] sm:$0xff] %v106_v8  ;;  %v101_v10 = vadd.f32 %v115_v6, %v100_v9 }
  0xcf   :  { %109 = vst [vmem:[%s187_s3] sm:$0xff] %v101_v10 }

// kernel: forward_pallas.16
= control target key start
LH: loop header
LB: loop body
LE: loop exit
PB: predicated region body
PF: predicated region fallthrough
CT: control target
= control target key end

     0   :  { %vm54_vm0 = vcmask 261120   ;;  %v4564_v24 = vmov 0.0   ;;  %vm1738_vm1 = vcmask 254976   ;;  %s6803_s2 = inlined_call_operand.vmem [shape: f32[32,32], index: 2, kind: input, shape index: {}]   ;;  %s6804_s0 = inlined_call_operand.vmem [shape: f32[16,32], index: 0, kind: input, shape index: {}]   ;;  %s6805_s6 = inlined_call_operand.vmem [shape: f32[8,32,512], index: 6, kind: input, shape index: {}]   ;;  %s6806_s3 = inlined_call_operand.vmem [shape: f32[1,32], index: 3, kind: input, shape index: {}]   ;;  %s6807_s1 = inlined_call_operand.vmem [shape: f32[16,32], index: 1, kind: input, shape index: {}]   ;;  %s6808_s4 = inlined_call_operand.vmem [shape: f32[1,32], index: 4, kind: input, shape index: {}]   ;;  %s6809_s5 = inlined_call_operand.vmem [shape: f32[1,32], index: 5, kind: input, shape index: {}]   ;;  %s6810_s8 = inlined_call_operand.vmem [shape: f32[8,512,32], index: 8, kind: input, shape index: {}]   ;;  %s6811_s7 = inlined_call_operand.vmem [shape: f32[1,512], index: 7, kind: input, shape index: {}]   ;;  %s6812_s9 = inlined_call_operand.vmem [shape: f32[8,1,32], index: 9, kind: input, shape index: {}]   ;;  %s6813_s10 = inlined_call_operand.vmem [shape: f32[1,32], index: 10, kind: input, shape index: {}]   ;;  %s6814_s11 = inlined_call_operand.vmem [shape: f32[1,32], index: 11, kind: input, shape index: {}]   ;;  %s6815_s12 = inlined_call_operand.vmem [shape: f32[16,32], index: 12, kind: output, shape index: {}]  }
   0x1   :  { %v46_v0 = vld [vmem:[%s6803_s2 + $0x18] sm:$0xff]  ;;  %v45_v1 = vld [vmem:[%s6803_s2 + $0x10] sm:$0xff]  ;;  %v41_v2 = vld [vmem:[%s6804_s0] sm:$0xff]  ;;  %261 = vmatprep.mubr.f32.mxu1 %v4564_v24 }
   0x2   :  { %4552 = vmatprep.subr.mxu0 %v46_v0  ;;  %v44_v3 = vld [vmem:[%s6803_s2 + $0x8] sm:$0xff]  ;;  %4560 = vmatprep.mubr.msk.f32.mxu0 %vm54_vm0, %v41_v2  ;;  %v43_v4 = vld [vmem:[%s6803_s2] sm:$0xff]  ;;  %v3394_v7 = vld [vmem:[%s6805_s6 + $0xf8] sm:$0xff] }
   0x3   :  { %4553 = vmatpush3.msra.mxu0 %v46_v0  ;;  %v42_v5 = vld [vmem:[%s6804_s0 + $0x8] sm:$0xff]  ;;  %v3391_v8 = vld [vmem:[%s6805_s6 + $0xe0] sm:$0xff]  ;;  %v3393_v9 = vld [vmem:[%s6805_s6 + $0xf0] sm:$0xff] }
   0x4   :  { %4554 = vmatprep.subr.mxu0 %v45_v1  ;;  %v3392_v6 = vld [vmem:[%s6805_s6 + $0xe8] sm:$0xff]  ;;  %v3390_v11 = vld [vmem:[%s6805_s6 + $0xd8] sm:$0xff]  ;;  %v3387_v12 = vld [vmem:[%s6805_s6 + $0xc0] sm:$0xff] }
   0x5   :  { %4555 = vmatpush3.msra.mxu0 %v45_v1  ;;  %221 = vmatprep.subr.mxu1 %v3392_v6  ;;  %v3388_v10 = vld [vmem:[%s6805_s6 + $0xc8] sm:$0xff]  ;;  %v3389_v13 = vld [vmem:[%s6805_s6 + $0xd0] sm:$0xff]  ;;  %v3386_v15 = vld [vmem:[%s6805_s6 + $0xb8] sm:$0xff] }
   0x6   :  { %4556 = vmatprep.subr.mxu0 %v44_v3  ;;  %222 = vmatpush1.msra.mxu1 %v3391_v8  ;;  %v3384_v14 = vld [vmem:[%s6805_s6 + $0xa8] sm:$0xff]  ;;  %v3383_v16 = vld [vmem:[%s6805_s6 + $0xa0] sm:$0xff]  ;;  %v3385_v17 = vld [vmem:[%s6805_s6 + $0xb0] sm:$0xff] }
   0x7   :  { %4557 = vmatpush3.msra.mxu0 %v44_v3  ;;  %223 = vmatprep.subr.mxu1 %v3388_v10  ;;  %v3380_v18 = vld [vmem:[%s6805_s6 + $0x88] sm:$0xff]  ;;  %v3382_v19 = vld [vmem:[%s6805_s6 + $0x98] sm:$0xff]  ;;  %v3379_v20 = vld [vmem:[%s6805_s6 + $0x80] sm:$0xff] }
   0x8   :  { %4558 = vmatprep.subr.mxu0 %v43_v4  ;;  %224 = vmatpush1.msra.mxu1 %v3387_v12  ;;  %v3381_v21 = vld [vmem:[%s6805_s6 + $0x90] sm:$0xff]  ;;  %v173_v22 = vld [vmem:[%s6805_s6 + $0x68] sm:$0xff]  ;;  %v175_v23 = vld [vmem:[%s6805_s6 + $0x78] sm:$0xff] }
   0x9   :  { %4559 = vmatpush3.msra.mxu0 %v43_v4  ;;  %225 = vmatprep.subr.mxu1 %v3384_v14  ;;  %v4711_v26 = vld [vmem:[%s6806_s3] ss:$0 sm:$0xff]  ;;  %v174_v38 = vld [vmem:[%s6805_s6 + $0x70] sm:$0xff]  ;;  %v169_v39 = vld [vmem:[%s6805_s6 + $0x48] sm:$0xff] }
   0xa   :  { %4561 = vmatmul.mubr.msk.f32.vlgmr.msra.gmra.mxu0 %vm54_vm0, %v42_v5  ;;  %292 = vmatprep.subr.mxu0 %v3394_v7  ;;  %v138_v29 = vld [vmem:[%s6807_s1] sm:$0xff]  ;;  %v171_v40 = vld [vmem:[%s6805_s6 + $0x58] sm:$0xff]  ;;  %v170_v42 = vld [vmem:[%s6805_s6 + $0x50] sm:$0xff] }
   0xb   :  { %293 = vmatpush1.msra.mxu0 %v3393_v9  ;;  %226 = vmatpush1.msra.mxu1 %v3383_v16  ;;  %v4720_v32 = vld [vmem:[%s6808_s4] ss:$0 sm:$0xff]  ;;  %v165_v43 = vld [vmem:[%s6805_s6 + $0x28] sm:$0xff]  ;;  %v167_v44 = vld [vmem:[%s6805_s6 + $0x38] sm:$0xff] }
   0xc   :  { %294 = vmatprep.subr.mxu0 %v3390_v11  ;;  %227 = vmatprep.subr.mxu1 %v3380_v18  ;;  %v4726_v34 = vld [vmem:[%s6809_s5] ss:$0 sm:$0xff]  ;;  %v166_v46 = vld [vmem:[%s6805_s6 + $0x30] sm:$0xff]  ;;  %v161_v47 = vld [vmem:[%s6805_s6 + $0x8] sm:$0xff] }
   0xd   :  { %295 = vmatpush1.msra.mxu0 %v3389_v13  ;;  %228 = vmatpush1.msra.mxu1 %v3379_v20  ;;  %v172_v37 = vld [vmem:[%s6805_s6 + $0x60] sm:$0xff]  ;;  %v163_v48 = vld [vmem:[%s6805_s6 + $0x18] sm:$0xff]  ;;  %v162_v50 = vld [vmem:[%s6805_s6 + $0x10] sm:$0xff] }
   0xe   :  { %296 = vmatprep.subr.mxu0 %v3386_v15  ;;  %332 = vmatprep.mubr.f32.mxu0 %v4564_v24  ;;  %v168_v41 = vld [vmem:[%s6805_s6 + $0x40] sm:$0xff]  ;;  %v3412_v51 = vld [vmem:[%s6805_s6 + $0x168] sm:$0xff]  ;;  %v3414_v52 = vld [vmem:[%s6805_s6 + $0x178] sm:$0xff] }
   0xf   :  { %297 = vmatpush1.msra.mxu0 %v3385_v17  ;;  %365 = vmatprep.subr.mxu1 %v173_v22  ;;  %v164_v45 = vld [vmem:[%s6805_s6 + $0x20] sm:$0xff]  ;;  %v3413_v54 = vld [vmem:[%s6805_s6 + $0x170] sm:$0xff]  ;;  %v3408_v55 = vld [vmem:[%s6805_s6 + $0x148] sm:$0xff] }
  0x10   :  { %298 = vmatprep.subr.mxu0 %v3382_v19  ;;  %v160_v49 = vld [vmem:[%s6805_s6] sm:$0xff]  ;;  %v3410_v56 = vld [vmem:[%s6805_s6 + $0x158] sm:$0xff]  ;;  %v3409_v58 = vld [vmem:[%s6805_s6 + $0x150] sm:$0xff] }
  0x11   :  { %299 = vmatpush1.msra.mxu0 %v3381_v21  ;;  %v3411_v53 = vld [vmem:[%s6805_s6 + $0x160] sm:$0xff]  ;;  %v3404_v59 = vld [vmem:[%s6805_s6 + $0x128] sm:$0xff]  ;;  %v3406_v60 = vld [vmem:[%s6805_s6 + $0x138] sm:$0xff] }
  0x12   :  { %436 = vmatprep.subr.mxu0 %v175_v23  ;;  %v3407_v57 = vld [vmem:[%s6805_s6 + $0x140] sm:$0xff]  ;;  %v3405_v62 = vld [vmem:[%s6805_s6 + $0x130] sm:$0xff]  ;;  %v3400_v63 = vld [vmem:[%s6805_s6 + $0x108] sm:$0xff] }
  0x13   :  { %v3403_v61 = vld [vmem:[%s6805_s6 + $0x120] sm:$0xff]  ;;  %v3402_v0 = vld [vmem:[%s6805_s6 + $0x118] sm:$0xff]  ;;  %v3401_v2 = vld [vmem:[%s6805_s6 + $0x110] sm:$0xff] }
  0x14   :  { %v3399_v1 = vld [vmem:[%s6805_s6 + $0x100] sm:$0xff]  ;;  %v3430_v4 = vld [vmem:[%s6805_s6 + $0x1e8] sm:$0xff]  ;;  %v3432_v5 = vld [vmem:[%s6805_s6 + $0x1f8] sm:$0xff] }
  0x15   :  { %v3429_v6 = vld [vmem:[%s6805_s6 + $0x1e0] sm:$0xff]  ;;  %v3431_v7 = vld [vmem:[%s6805_s6 + $0x1f0] sm:$0xff]  ;;  %v3426_v8 = vld [vmem:[%s6805_s6 + $0x1c8] sm:$0xff] }
  0x16   :  { %v3428_v9 = vld [vmem:[%s6805_s6 + $0x1d8] sm:$0xff]  ;;  %v3425_v10 = vld [vmem:[%s6805_s6 + $0x1c0] sm:$0xff]  ;;  %v3427_v11 = vld [vmem:[%s6805_s6 + $0x1d0] sm:$0xff] }
  0x17   :  { %v3422_v13 = vld [vmem:[%s6805_s6 + $0x1a8] sm:$0xff]  ;;  %v3424_v14 = vld [vmem:[%s6805_s6 + $0x1b8] sm:$0xff]  ;;  %v3421_v15 = vld [vmem:[%s6805_s6 + $0x1a0] sm:$0xff] }
  0x18   :  { %v3423_v16 = vld [vmem:[%s6805_s6 + $0x1b0] sm:$0xff]  ;;  %v3418_v17 = vld [vmem:[%s6805_s6 + $0x188] sm:$0xff]  ;;  %v3420_v18 = vld [vmem:[%s6805_s6 + $0x198] sm:$0xff] }
  0x19   :  { %v3417_v19 = vld [vmem:[%s6805_s6 + $0x180] sm:$0xff]  ;;  %v3419_v21 = vld [vmem:[%s6805_s6 + $0x190] sm:$0xff]  ;;  %v139_v22 = vld [vmem:[%s6807_s1 + $0x8] sm:$0xff] }
  0xca   :  { %v4706_v25 = vpop.f32.mrf.mxu0 }
  0xcb   :  { %v133_v12 = vadd.f32 %v4706_v25, %v4711_v26  ;;  %v3448_v25 = vld [vmem:[%s6805_s6 + $0x268] sm:$0xff] }
  0xcc   :  { %v127_v27 = vpop.f32.mrf.mxu0 }
  0xcd   :  { %v128_v28 = vadd.f32 %v4711_v26, %v127_v27  ;;  %v137_v20 = vmax.f32 %v133_v12, 0.0  ;;  %v3450_v26 = vld [vmem:[%s6805_s6 + $0x278] sm:$0xff]  ;;  %v3447_v27 = vld [vmem:[%s6805_s6 + $0x260] sm:$0xff]  ;;  %v3472_v12 = vld [vmem:[%s6805_s6 + $0x308] sm:$0xff] }
  0xcf   :  { %v136_v30 = vmax.f32 %v128_v28, 0.0  ;;  %v3449_v28 = vld [vmem:[%s6805_s6 + $0x270] sm:$0xff] }
  0xd1   :  { %v140_v31 = vadd.f32 %v138_v29, %v136_v30  ;;  %v141_v29 = vadd.f32 %v139_v22, %v137_v20  ;;  %v3444_v30 = vld [vmem:[%s6805_s6 + $0x248] sm:$0xff]  ;;  %v3503_v20 = vld [vmem:[%s6805_s6 + $0x3f0] sm:$0xff]  ;;  %v3500_v22 = vld [vmem:[%s6805_s6 + $0x3d8] sm:$0xff] }
  0xd3   :  { %v149_v33 = vmul.f32 %v4720_v32, %v140_v31  ;;  %v3446_v31 = vld [vmem:[%s6805_s6 + $0x258] sm:$0xff] }
  0xd5   :  { %v4729_v35 = vadd.f32 %v4726_v34, %v149_v33  ;;  %v3443_v33 = vld [vmem:[%s6805_s6 + $0x240] sm:$0xff] }
  0xd7   :  { %v4732_v36 = vrot.slane %v4729_v35, 2  ;;  %v4836_v3 = vrot.slane %v4729_v35, 4  ;;  %v4898_v23 = vrot.slane %v4729_v35, 6 }
  0xd9   :  { %3395 = vmatmul.mubr.msk.f32.vlgmr.msra.gmra.mxu1 %vm54_vm0, %v4732_v36  ;;  %3396 = vmatmul.mubr.msk.f32.vlgmr.msra.gmra.mxu0 %vm54_vm0, %v4732_v36 }
  0xda   :  { %366 = vmatpush1.msra.mxu1 %v172_v37  ;;  %437 = vmatpush1.msra.mxu0 %v174_v38  ;;  %v3445_v37 = vld [vmem:[%s6805_s6 + $0x250] sm:$0xff]  ;;  %v3440_v38 = vld [vmem:[%s6805_s6 + $0x228] sm:$0xff] }
  0xdb   :  { %367 = vmatprep.subr.mxu1 %v169_v39  ;;  %438 = vmatprep.subr.mxu0 %v171_v40  ;;  %v3442_v39 = vld [vmem:[%s6805_s6 + $0x238] sm:$0xff]  ;;  %v3439_v40 = vld [vmem:[%s6805_s6 + $0x220] sm:$0xff] }
  0xdc   :  { %368 = vmatpush1.msra.mxu1 %v168_v41  ;;  %439 = vmatpush1.msra.mxu0 %v170_v42  ;;  %v3441_v41 = vld [vmem:[%s6805_s6 + $0x230] sm:$0xff]  ;;  %v150_v42 = vmul.f32 %v4720_v32, %v141_v29  ;;  %v3493_v29 = vld [vmem:[%s6805_s6 + $0x3a0] sm:$0xff] }
  0xdd   :  { %369 = vmatprep.subr.mxu1 %v165_v43  ;;  %440 = vmatprep.subr.mxu0 %v167_v44  ;;  %v3436_v43 = vld [vmem:[%s6805_s6 + $0x208] sm:$0xff]  ;;  %v3438_v44 = vld [vmem:[%s6805_s6 + $0x218] sm:$0xff]  ;;  %v3437_v32 = vld [vmem:[%s6805_s6 + $0x210] sm:$0xff] }
  0xde   :  { %370 = vmatpush1.msra.mxu1 %v164_v45  ;;  %441 = vmatpush1.msra.mxu0 %v166_v46  ;;  %v3435_v45 = vld [vmem:[%s6805_s6 + $0x200] sm:$0xff]  ;;  %v4955_v46 = vadd.f32 %v4726_v34, %v150_v42  ;;  %v3467_v34 = vld [vmem:[%s6805_s6 + $0x2f0] sm:$0xff]  ;;  %v1556_v42 = vld [vmem:[%s6810_s8 + $0x178] sm:$0xff] }
  0xdf   :  { %371 = vmatprep.subr.mxu1 %v161_v47  ;;  %442 = vmatprep.subr.mxu0 %v163_v48  ;;  %v3466_v47 = vld [vmem:[%s6805_s6 + $0x2e8] sm:$0xff]  ;;  %v3468_v48 = vld [vmem:[%s6805_s6 + $0x2f8] sm:$0xff] }
  0xe0   :  { %372 = vmatpush1.msra.mxu1 %v160_v49  ;;  %405 = vmatprep.mubr.f32.mxu1 %v4564_v24  ;;  %v3465_v49 = vld [vmem:[%s6805_s6 + $0x2e0] sm:$0xff] }
  0xe1   :  { %443 = vmatpush1.msra.mxu0 %v162_v50  ;;  %476 = vmatprep.mubr.f32.mxu0 %v4564_v24  ;;  %v3462_v50 = vld [vmem:[%s6805_s6 + $0x2c8] sm:$0xff] }
  0xe2   :  { %3397 = vmatmul.mubr.msk.f32.vlgmr.msra.gmra.mxu1 %vm54_vm0, %v4729_v35  ;;  %3398 = vmatmul.mubr.msk.f32.vlgmr.msra.gmra.mxu0 %vm54_vm0, %v4729_v35 }
  0xe3   :  { %527 = vmatprep.subr.mxu1 %v3412_v51  ;;  %598 = vmatprep.subr.mxu0 %v3414_v52  ;;  %v3464_v51 = vld [vmem:[%s6805_s6 + $0x2d8] sm:$0xff]  ;;  %v3461_v52 = vld [vmem:[%s6805_s6 + $0x2c0] sm:$0xff] }
  0xe4   :  { %528 = vmatpush1.msra.mxu1 %v3411_v53  ;;  %599 = vmatpush1.msra.mxu0 %v3413_v54  ;;  %v3463_v53 = vld [vmem:[%s6805_s6 + $0x2d0] sm:$0xff]  ;;  %v3458_v54 = vld [vmem:[%s6805_s6 + $0x2a8] sm:$0xff] }
  0xe5   :  { %529 = vmatprep.subr.mxu1 %v3408_v55  ;;  %600 = vmatprep.subr.mxu0 %v3410_v56  ;;  %v3460_v55 = vld [vmem:[%s6805_s6 + $0x2b8] sm:$0xff]  ;;  %v3457_v56 = vld [vmem:[%s6805_s6 + $0x2a0] sm:$0xff] }
  0xe6   :  { %530 = vmatpush1.msra.mxu1 %v3407_v57  ;;  %601 = vmatpush1.msra.mxu0 %v3409_v58  ;;  %v3459_v57 = vld [vmem:[%s6805_s6 + $0x2b0] sm:$0xff]  ;;  %v3454_v58 = vld [vmem:[%s6805_s6 + $0x288] sm:$0xff] }
  0xe7   :  { %531 = vmatprep.subr.mxu1 %v3404_v59  ;;  %602 = vmatprep.subr.mxu0 %v3406_v60  ;;  %v3456_v59 = vld [vmem:[%s6805_s6 + $0x298] sm:$0xff]  ;;  %v3453_v60 = vld [vmem:[%s6805_s6 + $0x280] sm:$0xff] }
  0xe8   :  { %532 = vmatpush1.msra.mxu1 %v3403_v61  ;;  %603 = vmatpush1.msra.mxu0 %v3405_v62  ;;  %v3455_v61 = vld [vmem:[%s6805_s6 + $0x290] sm:$0xff]  ;;  %v5013_v62 = vrot.slane %v4955_v46, 2 }
  0xe9   :  { %533 = vmatprep.subr.mxu1 %v3400_v63  ;;  %604 = vmatprep.subr.mxu0 %v3402_v0  ;;  %v3484_v63 = vld [vmem:[%s6805_s6 + $0x368] sm:$0xff]  ;;  %v3486_v0 = vld [vmem:[%s6805_s6 + $0x378] sm:$0xff] }
  0xea   :  { %534 = vmatpush1.msra.mxu1 %v3399_v1  ;;  %567 = vmatprep.mubr.f32.mxu1 %v4564_v24  ;;  %v3483_v1 = vld [vmem:[%s6805_s6 + $0x360] sm:$0xff] }
  0xeb   :  { %605 = vmatpush1.msra.mxu0 %v3401_v2  ;;  %638 = vmatprep.mubr.f32.mxu0 %v4564_v24  ;;  %v3485_v2 = vld [vmem:[%s6805_s6 + $0x370] sm:$0xff] }
  0xec   :  { %3415 = vmatmul.mubr.msk.f32.vlgmr.msra.gmra.mxu1 %vm54_vm0, %v4836_v3  ;;  %3416 = vmatmul.mubr.msk.f32.vlgmr.msra.gmra.mxu0 %vm54_vm0, %v4836_v3 }
  0xed   :  { %693 = vmatprep.subr.mxu1 %v3430_v4  ;;  %764 = vmatprep.subr.mxu0 %v3432_v5  ;;  %v3480_v4 = vld [vmem:[%s6805_s6 + $0x348] sm:$0xff]  ;;  %v3482_v5 = vld [vmem:[%s6805_s6 + $0x358] sm:$0xff] }
  0xee   :  { %694 = vmatpush1.msra.mxu1 %v3429_v6  ;;  %765 = vmatpush1.msra.mxu0 %v3431_v7  ;;  %v3479_v6 = vld [vmem:[%s6805_s6 + $0x340] sm:$0xff]  ;;  %v3481_v7 = vld [vmem:[%s6805_s6 + $0x350] sm:$0xff] }
  0xef   :  { %695 = vmatprep.subr.mxu1 %v3426_v8  ;;  %766 = vmatprep.subr.mxu0 %v3428_v9  ;;  %v3476_v8 = vld [vmem:[%s6805_s6 + $0x328] sm:$0xff]  ;;  %v3478_v9 = vld [vmem:[%s6805_s6 + $0x338] sm:$0xff] }
  0xf0   :  { %696 = vmatpush1.msra.mxu1 %v3425_v10  ;;  %767 = vmatpush1.msra.mxu0 %v3427_v11  ;;  %v3475_v10 = vld [vmem:[%s6805_s6 + $0x320] sm:$0xff]  ;;  %v3477_v11 = vld [vmem:[%s6805_s6 + $0x330] sm:$0xff] }
  0xf1   :  { %697 = vmatprep.subr.mxu1 %v3422_v13  ;;  %768 = vmatprep.subr.mxu0 %v3424_v14  ;;  %v3474_v13 = vld [vmem:[%s6805_s6 + $0x318] sm:$0xff]  ;;  %v3471_v14 = vld [vmem:[%s6805_s6 + $0x300] sm:$0xff] }
  0xf2   :  { %698 = vmatpush1.msra.mxu1 %v3421_v15  ;;  %769 = vmatpush1.msra.mxu0 %v3423_v16  ;;  %v3473_v15 = vld [vmem:[%s6805_s6 + $0x310] sm:$0xff]  ;;  %v5070_v16 = vrot.slane %v4955_v46, 4 }
  0xf3   :  { %699 = vmatprep.subr.mxu1 %v3418_v17  ;;  %770 = vmatprep.subr.mxu0 %v3420_v18  ;;  %v3502_v17 = vld [vmem:[%s6805_s6 + $0x3e8] sm:$0xff]  ;;  %v3504_v18 = vld [vmem:[%s6805_s6 + $0x3f8] sm:$0xff] }
  0xf4   :  { %700 = vmatpush1.msra.mxu1 %v3417_v19  ;;  %733 = vmatprep.mubr.f32.mxu1 %v4564_v24  ;;  %v3501_v19 = vld [vmem:[%s6805_s6 + $0x3e0] sm:$0xff] }
  0xf5   :  { %771 = vmatpush1.msra.mxu0 %v3419_v21  ;;  %804 = vmatprep.mubr.f32.mxu0 %v4564_v24  ;;  %v3498_v21 = vld [vmem:[%s6805_s6 + $0x3c8] sm:$0xff] }
  0xf6   :  { %3433 = vmatmul.mubr.msk.f32.vlgmr.msra.gmra.mxu1 %vm54_vm0, %v4898_v23  ;;  %3434 = vmatmul.mubr.msk.f32.vlgmr.msra.gmra.mxu0 %vm54_vm0, %v4898_v23 }
  0xf7   :  { %859 = vmatprep.subr.mxu1 %v3448_v25  ;;  %930 = vmatprep.subr.mxu0 %v3450_v26  ;;  %v3497_v25 = vld [vmem:[%s6805_s6 + $0x3c0] sm:$0xff]  ;;  %v3499_v26 = vld [vmem:[%s6805_s6 + $0x3d0] sm:$0xff] }
  0xf8   :  { %860 = vmatpush1.msra.mxu1 %v3447_v27  ;;  %931 = vmatpush1.msra.mxu0 %v3449_v28  ;;  %v3494_v27 = vld [vmem:[%s6805_s6 + $0x3a8] sm:$0xff]  ;;  %v3496_v28 = vld [vmem:[%s6805_s6 + $0x3b8] sm:$0xff] }
  0xf9   :  { %861 = vmatprep.subr.mxu1 %v3444_v30  ;;  %932 = vmatprep.subr.mxu0 %v3446_v31  ;;  %v3495_v30 = vld [vmem:[%s6805_s6 + $0x3b0] sm:$0xff]  ;;  %v3490_v31 = vld [vmem:[%s6805_s6 + $0x388] sm:$0xff] }
  0xfa   :  { %862 = vmatpush1.msra.mxu1 %v3443_v33  ;;  %933 = vmatpush1.msra.mxu0 %v3445_v37  ;;  %v3492_v33 = vld [vmem:[%s6805_s6 + $0x398] sm:$0xff]  ;;  %v3489_v37 = vld [vmem:[%s6805_s6 + $0x380] sm:$0xff] }
  0xfb   :  { %863 = vmatprep.subr.mxu1 %v3440_v38  ;;  %934 = vmatprep.subr.mxu0 %v3442_v39  ;;  %v3491_v38 = vld [vmem:[%s6805_s6 + $0x390] sm:$0xff]  ;;  %v5127_v39 = vrot.slane %v4955_v46, 6 }
  0xfc   :  { %864 = vmatpush1.msra.mxu1 %v3439_v40  ;;  %935 = vmatpush1.msra.mxu0 %v3441_v41  ;;  %v1540_v40 = vld [vmem:[%s6810_s8 + $0xf8] sm:$0xff] }
  0xfd   :  { %865 = vmatprep.subr.mxu1 %v3436_v43  ;;  %936 = vmatprep.subr.mxu0 %v3438_v44  ;;  %v1572_v41 = vld [vmem:[%s6810_s8 + $0x1f8] sm:$0xff]  ;;  %v1539_v43 = vld [vmem:[%s6810_s8 + $0xf0] sm:$0xff] }
  0xfe   :  { %866 = vmatpush1.msra.mxu1 %v3435_v45  ;;  %899 = vmatprep.mubr.f32.mxu1 %v4564_v24  ;;  %v1571_v44 = vld [vmem:[%s6810_s8 + $0x1f0] sm:$0xff] }
  0xff   :  { %937 = vmatpush1.msra.mxu0 %v3437_v32  ;;  %970 = vmatprep.mubr.f32.mxu0 %v4564_v24  ;;  %v1523_v45 = vld [vmem:[%s6810_s8 + $0x70] sm:$0xff] }
 0x100   :  { %3451 = vmatmul.mubr.msk.f32.vlgmr.msra.gmra.mxu1 %vm54_vm0, %v4955_v46  ;;  %3452 = vmatmul.mubr.msk.f32.vlgmr.msra.gmra.mxu0 %vm54_vm0, %v4955_v46  ;;  %v1555_v32 = vld [vmem:[%s6810_s8 + $0x170] sm:$0xff] }
 0x101   :  { %1025 = vmatprep.subr.mxu1 %v3466_v47  ;;  %1096 = vmatprep.subr.mxu0 %v3468_v48  ;;  %v1538_v47 = vld [vmem:[%s6810_s8 + $0xe8] sm:$0xff] }
 0x102   :  { %1026 = vmatpush1.msra.mxu1 %v3465_v49  ;;  %1097 = vmatpush1.msra.mxu0 %v3467_v34  ;;  %v1570_v48 = vld [vmem:[%s6810_s8 + $0x1e8] sm:$0xff] }
 0x103   :  { %1027 = vmatprep.subr.mxu1 %v3462_v50  ;;  %1098 = vmatprep.subr.mxu0 %v3464_v51  ;;  %v1522_v49 = vld [vmem:[%s6810_s8 + $0x68] sm:$0xff]  ;;  %v1537_v50 = vld [vmem:[%s6810_s8 + $0xe0] sm:$0xff] }
 0x104   :  { %1028 = vmatpush1.msra.mxu1 %v3461_v52  ;;  %1099 = vmatpush1.msra.mxu0 %v3463_v53  ;;  %v1554_v34 = vld [vmem:[%s6810_s8 + $0x168] sm:$0xff]  ;;  %v1569_v51 = vld [vmem:[%s6810_s8 + $0x1e0] sm:$0xff] }
 0x105   :  { %1029 = vmatprep.subr.mxu1 %v3458_v54  ;;  %1100 = vmatprep.subr.mxu0 %v3460_v55  ;;  %v1521_v52 = vld [vmem:[%s6810_s8 + $0x60] sm:$0xff]  ;;  %v1536_v54 = vld [vmem:[%s6810_s8 + $0xd8] sm:$0xff] }
 0x106   :  { %1030 = vmatpush1.msra.mxu1 %v3457_v56  ;;  %1101 = vmatpush1.msra.mxu0 %v3459_v57  ;;  %v1553_v53 = vld [vmem:[%s6810_s8 + $0x160] sm:$0xff]  ;;  %v1568_v55 = vld [vmem:[%s6810_s8 + $0x1d8] sm:$0xff] }
 0x107   :  { %1031 = vmatprep.subr.mxu1 %v3454_v58  ;;  %1102 = vmatprep.subr.mxu0 %v3456_v59  ;;  %v1520_v56 = vld [vmem:[%s6810_s8 + $0x58] sm:$0xff]  ;;  %v1535_v58 = vld [vmem:[%s6810_s8 + $0xd0] sm:$0xff] }
 0x108   :  { %1032 = vmatpush1.msra.mxu1 %v3453_v60  ;;  %1065 = vmatprep.mubr.f32.mxu1 %v4564_v24  ;;  %v1552_v57 = vld [vmem:[%s6810_s8 + $0x158] sm:$0xff]  ;;  %v1567_v59 = vld [vmem:[%s6810_s8 + $0x1d0] sm:$0xff] }
 0x109   :  { %1103 = vmatpush1.msra.mxu0 %v3455_v61  ;;  %1136 = vmatprep.mubr.f32.mxu0 %v4564_v24  ;;  %v1519_v60 = vld [vmem:[%s6810_s8 + $0x50] sm:$0xff] }
 0x10a   :  { %3469 = vmatmul.mubr.msk.f32.vlgmr.msra.gmra.mxu1 %vm54_vm0, %v5013_v62  ;;  %3470 = vmatmul.mubr.msk.f32.vlgmr.msra.gmra.mxu0 %vm54_vm0, %v5013_v62  ;;  %v1551_v61 = vld [vmem:[%s6810_s8 + $0x150] sm:$0xff] }
 0x10b   :  { %1191 = vmatprep.subr.mxu1 %v3484_v63  ;;  %1262 = vmatprep.subr.mxu0 %v3486_v0  ;;  %v1534_v63 = vld [vmem:[%s6810_s8 + $0xc8] sm:$0xff] }
 0x10c   :  { %1192 = vmatpush1.msra.mxu1 %v3483_v1  ;;  %1263 = vmatpush1.msra.mxu0 %v3485_v2  ;;  %v1566_v0 = vld [vmem:[%s6810_s8 + $0x1c8] sm:$0xff] }
 0x10d   :  { %1193 = vmatprep.subr.mxu1 %v3480_v4  ;;  %1264 = vmatprep.subr.mxu0 %v3482_v5  ;;  %v1518_v1 = vld [vmem:[%s6810_s8 + $0x48] sm:$0xff]  ;;  %v1533_v4 = vld [vmem:[%s6810_s8 + $0xc0] sm:$0xff] }
 0x10e   :  { %1194 = vmatpush1.msra.mxu1 %v3479_v6  ;;  %1265 = vmatpush1.msra.mxu0 %v3481_v7  ;;  %v1550_v2 = vld [vmem:[%s6810_s8 + $0x148] sm:$0xff]  ;;  %v1565_v5 = vld [vmem:[%s6810_s8 + $0x1c0] sm:$0xff] }
 0x10f   :  { %1195 = vmatprep.subr.mxu1 %v3476_v8  ;;  %1266 = vmatprep.subr.mxu0 %v3478_v9  ;;  %v1517_v6 = vld [vmem:[%s6810_s8 + $0x40] sm:$0xff]  ;;  %v1532_v8 = vld [vmem:[%s6810_s8 + $0xb8] sm:$0xff] }
 0x110   :  { %1196 = vmatpush1.msra.mxu1 %v3475_v10  ;;  %1267 = vmatpush1.msra.mxu0 %v3477_v11  ;;  %v1549_v7 = vld [vmem:[%s6810_s8 + $0x140] sm:$0xff]  ;;  %v1564_v9 = vld [vmem:[%s6810_s8 + $0x1b8] sm:$0xff] }
 0x111   :  { %1197 = vmatprep.subr.mxu1 %v3472_v12  ;;  %1268 = vmatprep.subr.mxu0 %v3474_v13  ;;  %v1516_v10 = vld [vmem:[%s6810_s8 + $0x38] sm:$0xff]  ;;  %v1531_v12 = vld [vmem:[%s6810_s8 + $0xb0] sm:$0xff] }
 0x112   :  { %1198 = vmatpush1.msra.mxu1 %v3471_v14  ;;  %1231 = vmatprep.mubr.f32.mxu1 %v4564_v24  ;;  %v1548_v11 = vld [vmem:[%s6810_s8 + $0x138] sm:$0xff]  ;;  %v1563_v13 = vld [vmem:[%s6810_s8 + $0x1b0] sm:$0xff] }
 0x113   :  { %1269 = vmatpush1.msra.mxu0 %v3473_v15  ;;  %1302 = vmatprep.mubr.f32.mxu0 %v4564_v24  ;;  %v1515_v14 = vld [vmem:[%s6810_s8 + $0x30] sm:$0xff] }
 0x114   :  { %3487 = vmatmul.mubr.msk.f32.vlgmr.msra.gmra.mxu1 %vm54_vm0, %v5070_v16  ;;  %3488 = vmatmul.mubr.msk.f32.vlgmr.msra.gmra.mxu0 %vm54_vm0, %v5070_v16  ;;  %v1547_v15 = vld [vmem:[%s6810_s8 + $0x130] sm:$0xff] }
 0x115   :  { %1357 = vmatprep.subr.mxu1 %v3502_v17  ;;  %1428 = vmatprep.subr.mxu0 %v3504_v18  ;;  %v1530_v17 = vld [vmem:[%s6810_s8 + $0xa8] sm:$0xff] }
 0x116   :  { %1358 = vmatpush1.msra.mxu1 %v3501_v19  ;;  %1429 = vmatpush1.msra.mxu0 %v3503_v20  ;;  %v1562_v18 = vld [vmem:[%s6810_s8 + $0x1a8] sm:$0xff] }
 0x117   :  { %1359 = vmatprep.subr.mxu1 %v3498_v21  ;;  %1430 = vmatprep.subr.mxu0 %v3500_v22  ;;  %v1514_v19 = vld [vmem:[%s6810_s8 + $0x28] sm:$0xff]  ;;  %v1529_v21 = vld [vmem:[%s6810_s8 + $0xa0] sm:$0xff] }
 0x118   :  { %1360 = vmatpush1.msra.mxu1 %v3497_v25  ;;  %1431 = vmatpush1.msra.mxu0 %v3499_v26  ;;  %v1546_v20 = vld [vmem:[%s6810_s8 + $0x128] sm:$0xff]  ;;  %v1561_v22 = vld [vmem:[%s6810_s8 + $0x1a0] sm:$0xff] }
 0x119   :  { %1361 = vmatprep.subr.mxu1 %v3494_v27  ;;  %1432 = vmatprep.subr.mxu0 %v3496_v28  ;;  %v1513_v25 = vld [vmem:[%s6810_s8 + $0x20] sm:$0xff]  ;;  %v1528_v27 = vld [vmem:[%s6810_s8 + $0x98] sm:$0xff] }
 0x11a   :  { %1362 = vmatpush1.msra.mxu1 %v3493_v29  ;;  %1433 = vmatpush1.msra.mxu0 %v3495_v30  ;;  %v1545_v26 = vld [vmem:[%s6810_s8 + $0x120] sm:$0xff]  ;;  %v1560_v28 = vld [vmem:[%s6810_s8 + $0x198] sm:$0xff] }
 0x11b   :  { %1363 = vmatprep.subr.mxu1 %v3490_v31  ;;  %1434 = vmatprep.subr.mxu0 %v3492_v33  ;;  %v1512_v29 = vld [vmem:[%s6810_s8 + $0x18] sm:$0xff]  ;;  %v1527_v31 = vld [vmem:[%s6810_s8 + $0x90] sm:$0xff] }
 0x11c   :  { %1364 = vmatpush1.msra.mxu1 %v3489_v37  ;;  %1397 = vmatprep.mubr.f32.mxu1 %v4564_v24  ;;  %v1544_v30 = vld [vmem:[%s6810_s8 + $0x118] sm:$0xff]  ;;  %v1559_v33 = vld [vmem:[%s6810_s8 + $0x190] sm:$0xff] }
 0x11d   :  { %1435 = vmatpush1.msra.mxu0 %v3491_v38  ;;  %1468 = vmatprep.mubr.f32.mxu0 %v4564_v24  ;;  %v1524_v24 = vld [vmem:[%s6810_s8 + $0x78] sm:$0xff]  ;;  %v1511_v37 = vld [vmem:[%s6810_s8 + $0x10] sm:$0xff] }
 0x11e   :  { %3505 = vmatmul.mubr.msk.f32.vlgmr.msra.gmra.mxu1 %vm54_vm0, %v5127_v39  ;;  %3506 = vmatmul.mubr.msk.f32.vlgmr.msra.gmra.mxu0 %vm54_vm0, %v5127_v39  ;;  %v1543_v38 = vld [vmem:[%s6810_s8 + $0x110] sm:$0xff] }
 0x11f   :  { %3992 = vmatprep.subr.mxu1 %v1540_v40  ;;  %4027 = vmatprep.subr.mxu0 %v1572_v41  ;;  %v1526_v40 = vld [vmem:[%s6810_s8 + $0x88] sm:$0xff] }
 0x120   :  { %3993 = vmatpush3.msra.mxu1 %v1524_v24  ;;  %4028 = vmatpush3.msra.mxu0 %v1556_v42  ;;  %v1558_v41 = vld [vmem:[%s6810_s8 + $0x188] sm:$0xff] }
 0x121   :  { %3994 = vmatprep.subr.mxu1 %v1539_v43  ;;  %4029 = vmatprep.subr.mxu0 %v1571_v44  ;;  %v1510_v24 = vld [vmem:[%s6810_s8 + $0x8] sm:$0xff]  ;;  %v1525_v43 = vld [vmem:[%s6810_s8 + $0x80] sm:$0xff] }
 0x122   :  { %3995 = vmatpush3.msra.mxu1 %v1523_v45  ;;  %4030 = vmatpush3.msra.mxu0 %v1555_v32  ;;  %v1542_v42 = vld [vmem:[%s6810_s8 + $0x108] sm:$0xff]  ;;  %v1557_v44 = vld [vmem:[%s6810_s8 + $0x180] sm:$0xff] }
 0x123   :  { %3996 = vmatprep.subr.mxu1 %v1538_v47  ;;  %4031 = vmatprep.subr.mxu0 %v1570_v48  ;;  %v1509_v45 = vld [vmem:[%s6810_s8] sm:$0xff]  ;;  %v3541_v47 = vld [vmem:[%s6810_s8 + $0x2f8] sm:$0xff] }
 0x124   :  { %3997 = vmatpush3.msra.mxu1 %v1522_v49  ;;  %4032 = vmatpush3.msra.mxu0 %v1554_v34  ;;  %v1541_v32 = vld [vmem:[%s6810_s8 + $0x100] sm:$0xff]  ;;  %v3573_v48 = vld [vmem:[%s6810_s8 + $0x3f8] sm:$0xff] }
 0x125   :  { %3998 = vmatprep.subr.mxu1 %v1537_v50  ;;  %4033 = vmatprep.subr.mxu0 %v1569_v51 }
 0x126   :  { %3999 = vmatpush3.msra.mxu1 %v1521_v52  ;;  %4034 = vmatpush3.msra.mxu0 %v1553_v53 }
 0x127   :  { %4000 = vmatprep.subr.mxu1 %v1536_v54  ;;  %4035 = vmatprep.subr.mxu0 %v1568_v55 }
 0x128   :  { %4001 = vmatpush3.msra.mxu1 %v1520_v56  ;;  %4036 = vmatpush3.msra.mxu0 %v1552_v57 }
 0x129   :  { %4002 = vmatprep.subr.mxu1 %v1535_v58  ;;  %4037 = vmatprep.subr.mxu0 %v1567_v59 }
 0x12a   :  { %4003 = vmatpush3.msra.mxu1 %v1519_v60  ;;  %4038 = vmatpush3.msra.mxu0 %v1551_v61 }
 0x12b   :  { %4004 = vmatprep.subr.mxu1 %v1534_v63  ;;  %4039 = vmatprep.subr.mxu0 %v1566_v0 }
 0x12c   :  { %4005 = vmatpush3.msra.mxu1 %v1518_v1  ;;  %4040 = vmatpush3.msra.mxu0 %v1550_v2 }
 0x12d   :  { %4006 = vmatprep.subr.mxu1 %v1533_v4  ;;  %4041 = vmatprep.subr.mxu0 %v1565_v5 }
 0x12e   :  { %4007 = vmatpush3.msra.mxu1 %v1517_v6  ;;  %4042 = vmatpush3.msra.mxu0 %v1549_v7 }
 0x12f   :  { %4008 = vmatprep.subr.mxu1 %v1532_v8  ;;  %4043 = vmatprep.subr.mxu0 %v1564_v9  ;;  %v1481_v8 = vlaneseq }
 0x130   :  { %4009 = vmatpush3.msra.mxu1 %v1516_v10  ;;  %4044 = vmatpush3.msra.mxu0 %v1548_v11 }
 0x131   :  { %4010 = vmatprep.subr.mxu1 %v1531_v12  ;;  %4045 = vmatprep.subr.mxu0 %v1563_v13 }
 0x132   :  { %4011 = vmatpush3.msra.mxu1 %v1515_v14  ;;  %4046 = vmatpush3.msra.mxu0 %v1547_v15 }
 0x133   :  { %4012 = vmatprep.subr.mxu1 %v1530_v17  ;;  %4047 = vmatprep.subr.mxu0 %v1562_v18  ;;  %v1482_v18 = vshrl.u32 %v1481_v8, 7 }
 0x134   :  { %4013 = vmatpush3.msra.mxu1 %v1514_v19  ;;  %4048 = vmatpush3.msra.mxu0 %v1546_v20 }
 0x135   :  { %4014 = vmatprep.subr.mxu1 %v1529_v21  ;;  %4049 = vmatprep.subr.mxu0 %v1561_v22 }
 0x136   :  { %4015 = vmatpush3.msra.mxu1 %v1513_v25  ;;  %4050 = vmatpush3.msra.mxu0 %v1545_v26 }
 0x137   :  { %4016 = vmatprep.subr.mxu1 %v1528_v27  ;;  %4051 = vmatprep.subr.mxu0 %v1560_v28 }
 0x138   :  { %4017 = vmatpush3.msra.mxu1 %v1512_v29  ;;  %4052 = vmatpush3.msra.mxu0 %v1544_v30 }
 0x139   :  { %4018 = vmatprep.subr.mxu1 %v1527_v31  ;;  %4053 = vmatprep.subr.mxu0 %v1559_v33  ;;  %v1483_v31 = vsub.s32 0, %v1482_v18  ;;  %v1491_v33 = vsub.s32 2, %v1482_v18 }
 0x13a   :  { %4019 = vmatpush3.msra.mxu1 %v1511_v37  ;;  %4054 = vmatpush3.msra.mxu0 %v1543_v38  ;;  %v1487_v37 = vsub.s32 1, %v1482_v18  ;;  %v1495_v38 = vsub.s32 3, %v1482_v18  ;;  %v3523_v18 = vld [vmem:[%s6810_s8 + $0x268] sm:$0xff] }
 0x13b   :  { %4020 = vmatprep.subr.mxu1 %v1526_v40  ;;  %4055 = vmatprep.subr.mxu0 %v1558_v41 }
 0x13c   :  { %4021 = vmatpush3.msra.mxu1 %v1510_v24  ;;  %4056 = vmatpush3.msra.mxu0 %v1542_v42 }
 0x13d   :  { %4022 = vmatprep.subr.mxu1 %v1525_v43  ;;  %4057 = vmatprep.subr.mxu0 %v1557_v44  ;;  %v1479_v43 = vld [vmem:[%s6811_s7] sm:$0xf] }
 0x13e   :  { %4023 = vmatpush3.msra.mxu1 %v1509_v45  ;;  %4058 = vmatpush3.msra.mxu0 %v1541_v32 }
 0x13f   :  { %4062 = vmatprep.subr.mxu1 %v3541_v47  ;;  %4097 = vmatprep.subr.mxu0 %v3573_v48 }
 0x199   :  { %v263_v49 = vpop.f32.mrf.mxu1  ;;  %v334_v34 = vpop.f32.mrf.mxu0 }
 0x19b   :  { %v265_v50 = vpop.f32.mrf.mxu1  ;;  %v336_v51 = vpop.f32.mrf.mxu0 }
 0x1a2   :  { %v407_v52 = vpop.f32.mrf.mxu1  ;;  %v478_v53 = vpop.f32.mrf.mxu0 }
 0x1a3   :  { %v408_v9 = vadd.f32 %v407_v52, %v263_v49  ;;  %v479_v10 = vadd.f32 %v478_v53, %v334_v34  ;;  %v1492_v52 = vrot.slane %v1479_v43, %v1491_v33  ;;  %v1488_v53 = vrot.slane %v1479_v43, %v1487_v37  ;;  %v3520_v33 = vld [vmem:[%s6810_s8 + $0x250] sm:$0xff] }
 0x1a4   :  { %v409_v54 = vpop.f32.mrf.mxu1  ;;  %v480_v55 = vpop.f32.mrf.mxu0  ;;  %v3552_v37 = vld [vmem:[%s6810_s8 + $0x350] sm:$0xff] }
 0x1a5   :  { %v410_v11 = vadd.f32 %v409_v54, %v265_v50  ;;  %v481_v12 = vadd.f32 %v480_v55, %v336_v51  ;;  %v1484_v50 = vrot.slane %v1479_v43, %v1483_v31  ;;  %v1496_v54 = vrot.slane %v1479_v43, %v1495_v38  ;;  %v3568_v31 = vld [vmem:[%s6810_s8 + $0x3d0] sm:$0xff]  ;;  %v3535_v38 = vld [vmem:[%s6810_s8 + $0x2c8] sm:$0xff]  ;;  %v3566_v43 = vld [vmem:[%s6810_s8 + $0x3c0] sm:$0xff] }
 0x1ac   :  { %v569_v56 = vpop.f32.mrf.mxu1  ;;  %v640_v57 = vpop.f32.mrf.mxu0 }
 0x1ad   :  { %v645_v13 = vadd.f32 %v569_v56, %v408_v9  ;;  %v647_v14 = vadd.f32 %v640_v57, %v479_v10  ;;  %v3525_v9 = vld [vmem:[%s6810_s8 + $0x278] sm:$0xff] }
 0x1ae   :  { %v571_v58 = vpop.f32.mrf.mxu1  ;;  %v642_v59 = vpop.f32.mrf.mxu0  ;;  %v3557_v10 = vld [vmem:[%s6810_s8 + $0x378] sm:$0xff] }
 0x1af   :  { %v646_v19 = vadd.f32 %v571_v58, %v410_v11  ;;  %v648_v20 = vadd.f32 %v642_v59, %v481_v12  ;;  %v3540_v11 = vld [vmem:[%s6810_s8 + $0x2f0] sm:$0xff] }
 0x1b0   :  { %v3572_v12 = vld [vmem:[%s6810_s8 + $0x3f0] sm:$0xff] }
 0x1b6   :  { %v735_v60 = vpop.f32.mrf.mxu1  ;;  %v806_v61 = vpop.f32.mrf.mxu0 }
 0x1b7   :  { %v811_v21 = vadd.f32 %v735_v60, %v645_v13  ;;  %v813_v22 = vadd.f32 %v806_v61, %v647_v14  ;;  %v3524_v13 = vld [vmem:[%s6810_s8 + $0x270] sm:$0xff] }
 0x1b8   :  { %v737_v63 = vpop.f32.mrf.mxu1  ;;  %v808_v0 = vpop.f32.mrf.mxu0  ;;  %v3556_v14 = vld [vmem:[%s6810_s8 + $0x370] sm:$0xff] }
 0x1b9   :  { %v812_v27 = vadd.f32 %v737_v63, %v646_v19  ;;  %v814_v28 = vadd.f32 %v808_v0, %v648_v20  ;;  %v3555_v19 = vld [vmem:[%s6810_s8 + $0x368] sm:$0xff]  ;;  %v3538_v20 = vld [vmem:[%s6810_s8 + $0x2e0] sm:$0xff] }
 0x1c0   :  { %v901_v1 = vpop.f32.mrf.mxu1  ;;  %v972_v2 = vpop.f32.mrf.mxu0 }
 0x1c1   :  { %v977_v29 = vadd.f32 %v901_v1, %v811_v21  ;;  %v979_v30 = vadd.f32 %v972_v2, %v813_v22  ;;  %v3570_v21 = vld [vmem:[%s6810_s8 + $0x3e0] sm:$0xff] }
 0x1c2   :  { %v903_v4 = vpop.f32.mrf.mxu1  ;;  %v974_v5 = vpop.f32.mrf.mxu0  ;;  %v3522_v22 = vld [vmem:[%s6810_s8 + $0x260] sm:$0xff] }
 0x1c3   :  { %v978_v40 = vadd.f32 %v903_v4, %v812_v27  ;;  %v980_v41 = vadd.f32 %v974_v5, %v814_v28  ;;  %v3569_v27 = vld [vmem:[%s6810_s8 + $0x3d8] sm:$0xff] }
 0x1c4   :  { %v3521_v28 = vld [vmem:[%s6810_s8 + $0x258] sm:$0xff] }
 0x1ca   :  { %v1067_v6 = vpop.f32.mrf.mxu1  ;;  %v1138_v7 = vpop.f32.mrf.mxu0 }
 0x1cb   :  { %v1143_v24 = vadd.f32 %v1067_v6, %v977_v29  ;;  %v1145_v42 = vadd.f32 %v1138_v7, %v979_v30  ;;  %v3553_v29 = vld [vmem:[%s6810_s8 + $0x358] sm:$0xff]  ;;  %v3536_v30 = vld [vmem:[%s6810_s8 + $0x2d0] sm:$0xff] }
 0x1cc   :  { %v1069_v15 = vpop.f32.mrf.mxu1  ;;  %v1140_v17 = vpop.f32.mrf.mxu0 }
 0x1cd   :  { %v1144_v32 = vadd.f32 %v1069_v15, %v978_v40  ;;  %v1146_v47 = vadd.f32 %v1140_v17, %v980_v41  ;;  %v3539_v15 = vld [vmem:[%s6810_s8 + $0x2e8] sm:$0xff] }
 0x1ce   :  { %v3571_v17 = vld [vmem:[%s6810_s8 + $0x3e8] sm:$0xff] }
 0x1cf   :  { %v3567_v40 = vld [vmem:[%s6810_s8 + $0x3c8] sm:$0xff] }
 0x1d0   :  { %v3519_v41 = vld [vmem:[%s6810_s8 + $0x248] sm:$0xff] }
 0x1d4   :  { %v1233_v25 = vpop.f32.mrf.mxu1  ;;  %v1304_v26 = vpop.f32.mrf.mxu0 }
 0x1d5   :  { %v1309_v48 = vadd.f32 %v1233_v25, %v1143_v24  ;;  %v1311_v49 = vadd.f32 %v1304_v26, %v1145_v42  ;;  %v3554_v25 = vld [vmem:[%s6810_s8 + $0x360] sm:$0xff]  ;;  %v3537_v26 = vld [vmem:[%s6810_s8 + $0x2d8] sm:$0xff]  ;;  %v3551_v24 = vld [vmem:[%s6810_s8 + $0x348] sm:$0xff] }
 0x1d6   :  { %v1235_v44 = vpop.f32.mrf.mxu1  ;;  %v1306_v45 = vpop.f32.mrf.mxu0  ;;  %v3534_v42 = vld [vmem:[%s6810_s8 + $0x2c0] sm:$0xff] }
 0x1d7   :  { %v1310_v55 = vadd.f32 %v1235_v44, %v1144_v32  ;;  %v1312_v56 = vadd.f32 %v1306_v45, %v1146_v47  ;;  %v3518_v44 = vld [vmem:[%s6810_s8 + $0x240] sm:$0xff]  ;;  %v3533_v32 = vld [vmem:[%s6810_s8 + $0x2b8] sm:$0xff] }
 0x1d8   :  { %v3550_v45 = vld [vmem:[%s6810_s8 + $0x340] sm:$0xff]  ;;  %v3565_v47 = vld [vmem:[%s6810_s8 + $0x3b8] sm:$0xff] }
 0x1de   :  { %v1399_v34 = vpop.f32.mrf.mxu1  ;;  %v1470_v51 = vpop.f32.mrf.mxu0 }
 0x1df   :  { %v1475_v57 = vadd.f32 %v1399_v34, %v1309_v48  ;;  %v1477_v58 = vadd.f32 %v1470_v51, %v1311_v49  ;;  %v3517_v48 = vld [vmem:[%s6810_s8 + $0x238] sm:$0xff]  ;;  %v3532_v34 = vld [vmem:[%s6810_s8 + $0x2b0] sm:$0xff] }
 0x1e0   :  { %v1401_v59 = vpop.f32.mrf.mxu1  ;;  %v1472_v60 = vpop.f32.mrf.mxu0  ;;  %v3549_v49 = vld [vmem:[%s6810_s8 + $0x338] sm:$0xff]  ;;  %v3516_v51 = vld [vmem:[%s6810_s8 + $0x230] sm:$0xff] }
 0x1e1   :  { %v1476_v61 = vadd.f32 %v1401_v59, %v1310_v55  ;;  %v1478_v63 = vadd.f32 %v1472_v60, %v1312_v56  ;;  %v1501_v0 = vadd.f32 %v1484_v50, %v1475_v57  ;;  %v1503_v1 = vadd.f32 %v1492_v52, %v1477_v58  ;;  %v3564_v50 = vld [vmem:[%s6810_s8 + $0x3b0] sm:$0xff]  ;;  %v3515_v55 = vld [vmem:[%s6810_s8 + $0x228] sm:$0xff]  ;;  %v3530_v57 = vld [vmem:[%s6810_s8 + $0x2a0] sm:$0xff] }
 0x1e2   :  { %v3548_v52 = vld [vmem:[%s6810_s8 + $0x330] sm:$0xff]  ;;  %v3547_v56 = vld [vmem:[%s6810_s8 + $0x328] sm:$0xff]  ;;  %v3562_v58 = vld [vmem:[%s6810_s8 + $0x3a0] sm:$0xff] }
 0x1e3   :  { %v1502_v2 = vadd.f32 %v1488_v53, %v1476_v61  ;;  %v1504_v4 = vadd.f32 %v1496_v54, %v1478_v63  ;;  %v5339_v7 = vmax.f32 %v1501_v0, 0.0  ;;  %v5341_v8 = vmax.f32 %v1503_v1, 0.0  ;;  %v3531_v53 = vld [vmem:[%s6810_s8 + $0x2a8] sm:$0xff]  ;;  %v3514_v59 = vld [vmem:[%s6810_s8 + $0x220] sm:$0xff]  ;;  %v3529_v61 = vld [vmem:[%s6810_s8 + $0x298] sm:$0xff] }
 0x1e4   :  { %v3563_v54 = vld [vmem:[%s6810_s8 + $0x3a8] sm:$0xff]  ;;  %v3546_v60 = vld [vmem:[%s6810_s8 + $0x320] sm:$0xff]  ;;  %v3561_v63 = vld [vmem:[%s6810_s8 + $0x398] sm:$0xff] }
 0x1e5   :  { %v5335_v5 = vmax.f32 %v1502_v2, 0.0  ;;  %v5337_v6 = vmax.f32 %v1504_v4, 0.0  ;;  %v3513_v0 = vld [vmem:[%s6810_s8 + $0x218] sm:$0xff]  ;;  %v3528_v2 = vld [vmem:[%s6810_s8 + $0x290] sm:$0xff] }
 0x1e6   :  { %v3545_v1 = vld [vmem:[%s6810_s8 + $0x318] sm:$0xff]  ;;  %v3560_v4 = vld [vmem:[%s6810_s8 + $0x390] sm:$0xff] }
 0x1e7   :  { %1644 = vmatprep.mubr.f32.mxu1 %v5335_v5  ;;  %1714 = vmatprep.mubr.f32.mxu0 %v5337_v6 }
 0x1e8   :  { %1645 = vmatmul.mubr.f32.vlgmr.msra.gmra.mxu1 %v5339_v7  ;;  %1715 = vmatmul.mubr.f32.vlgmr.msra.gmra.mxu0 %v5341_v8 }
 0x1e9   :  { %4063 = vmatpush3.msra.mxu1 %v3525_v9  ;;  %4098 = vmatpush3.msra.mxu0 %v3557_v10  ;;  %v3512_v9 = vld [vmem:[%s6810_s8 + $0x210] sm:$0xff] }
 0x1ea   :  { %4064 = vmatprep.subr.mxu1 %v3540_v11  ;;  %1877 = vmatprep.mubr.f32.mxu1 %v5335_v5  ;;  %v3544_v10 = vld [vmem:[%s6810_s8 + $0x310] sm:$0xff]  ;;  %v3527_v11 = vld [vmem:[%s6810_s8 + $0x288] sm:$0xff] }
 0x1eb   :  { %4099 = vmatprep.subr.mxu0 %v3572_v12  ;;  %1947 = vmatprep.mubr.f32.mxu0 %v5337_v6  ;;  %v3559_v12 = vld [vmem:[%s6810_s8 + $0x388] sm:$0xff] }
 0x1ec   :  { %4065 = vmatpush3.msra.mxu1 %v3524_v13  ;;  %4100 = vmatpush3.msra.mxu0 %v3556_v14  ;;  %v3511_v13 = vld [vmem:[%s6810_s8 + $0x208] sm:$0xff] }
 0x1ed   :  { %4066 = vmatprep.subr.mxu1 %v3539_v15  ;;  %4101 = vmatprep.subr.mxu0 %v3571_v17  ;;  %v3543_v14 = vld [vmem:[%s6810_s8 + $0x308] sm:$0xff]  ;;  %v3526_v15 = vld [vmem:[%s6810_s8 + $0x280] sm:$0xff] }
 0x1ee   :  { %4067 = vmatpush3.msra.mxu1 %v3523_v18  ;;  %4102 = vmatpush3.msra.mxu0 %v3555_v19  ;;  %v3558_v17 = vld [vmem:[%s6810_s8 + $0x380] sm:$0xff] }
 0x1ef   :  { %4068 = vmatprep.subr.mxu1 %v3538_v20  ;;  %4103 = vmatprep.subr.mxu0 %v3570_v21  ;;  %v3510_v18 = vld [vmem:[%s6810_s8 + $0x200] sm:$0xff]  ;;  %v3609_v20 = vld [vmem:[%s6810_s8 + $0x4f8] sm:$0xff] }
 0x1f0   :  { %4069 = vmatpush3.msra.mxu1 %v3522_v22  ;;  %4104 = vmatpush3.msra.mxu0 %v3554_v25  ;;  %v3542_v19 = vld [vmem:[%s6810_s8 + $0x300] sm:$0xff]  ;;  %v3641_v21 = vld [vmem:[%s6810_s8 + $0x5f8] sm:$0xff] }
 0x1f1   :  { %4070 = vmatprep.subr.mxu1 %v3537_v26  ;;  %4105 = vmatprep.subr.mxu0 %v3569_v27  ;;  %v3593_v22 = vld [vmem:[%s6810_s8 + $0x478] sm:$0xff]  ;;  %v3608_v26 = vld [vmem:[%s6810_s8 + $0x4f0] sm:$0xff] }
 0x1f2   :  { %4071 = vmatpush3.msra.mxu1 %v3521_v28  ;;  %4106 = vmatpush3.msra.mxu0 %v3553_v29  ;;  %v3625_v25 = vld [vmem:[%s6810_s8 + $0x578] sm:$0xff]  ;;  %v3640_v27 = vld [vmem:[%s6810_s8 + $0x5f0] sm:$0xff] }
 0x1f3   :  { %4072 = vmatprep.subr.mxu1 %v3536_v30  ;;  %4107 = vmatprep.subr.mxu0 %v3568_v31  ;;  %v3592_v28 = vld [vmem:[%s6810_s8 + $0x470] sm:$0xff]  ;;  %v3607_v30 = vld [vmem:[%s6810_s8 + $0x4e8] sm:$0xff] }
 0x1f4   :  { %4073 = vmatpush3.msra.mxu1 %v3520_v33  ;;  %4108 = vmatpush3.msra.mxu0 %v3552_v37  ;;  %v3624_v29 = vld [vmem:[%s6810_s8 + $0x570] sm:$0xff]  ;;  %v3639_v31 = vld [vmem:[%s6810_s8 + $0x5e8] sm:$0xff] }
 0x1f5   :  { %4074 = vmatprep.subr.mxu1 %v3535_v38  ;;  %4109 = vmatprep.subr.mxu0 %v3567_v40  ;;  %v3591_v33 = vld [vmem:[%s6810_s8 + $0x468] sm:$0xff]  ;;  %v3606_v38 = vld [vmem:[%s6810_s8 + $0x4e0] sm:$0xff] }
 0x1f6   :  { %4075 = vmatpush3.msra.mxu1 %v3519_v41  ;;  %4110 = vmatpush3.msra.mxu0 %v3551_v24  ;;  %v3623_v37 = vld [vmem:[%s6810_s8 + $0x568] sm:$0xff]  ;;  %v3638_v40 = vld [vmem:[%s6810_s8 + $0x5e0] sm:$0xff] }
 0x1f7   :  { %4076 = vmatprep.subr.mxu1 %v3534_v42  ;;  %4111 = vmatprep.subr.mxu0 %v3566_v43  ;;  %v3590_v41 = vld [vmem:[%s6810_s8 + $0x460] sm:$0xff]  ;;  %v3605_v42 = vld [vmem:[%s6810_s8 + $0x4d8] sm:$0xff] }
 0x1f8   :  { %4077 = vmatpush3.msra.mxu1 %v3518_v44  ;;  %4112 = vmatpush3.msra.mxu0 %v3550_v45  ;;  %v3622_v24 = vld [vmem:[%s6810_s8 + $0x560] sm:$0xff]  ;;  %v3637_v43 = vld [vmem:[%s6810_s8 + $0x5d8] sm:$0xff] }
 0x1f9   :  { %4078 = vmatprep.subr.mxu1 %v3533_v32  ;;  %4113 = vmatprep.subr.mxu0 %v3565_v47  ;;  %v3589_v44 = vld [vmem:[%s6810_s8 + $0x458] sm:$0xff]  ;;  %v3604_v32 = vld [vmem:[%s6810_s8 + $0x4d0] sm:$0xff] }
 0x1fa   :  { %4079 = vmatpush3.msra.mxu1 %v3517_v48  ;;  %4114 = vmatpush3.msra.mxu0 %v3549_v49  ;;  %v3621_v45 = vld [vmem:[%s6810_s8 + $0x558] sm:$0xff]  ;;  %v3636_v47 = vld [vmem:[%s6810_s8 + $0x5d0] sm:$0xff] }
 0x1fb   :  { %4080 = vmatprep.subr.mxu1 %v3532_v34  ;;  %4115 = vmatprep.subr.mxu0 %v3564_v50  ;;  %v3588_v48 = vld [vmem:[%s6810_s8 + $0x450] sm:$0xff]  ;;  %v3603_v34 = vld [vmem:[%s6810_s8 + $0x4c8] sm:$0xff] }
 0x1fc   :  { %4081 = vmatpush3.msra.mxu1 %v3516_v51  ;;  %4116 = vmatpush3.msra.mxu0 %v3548_v52  ;;  %v3620_v49 = vld [vmem:[%s6810_s8 + $0x550] sm:$0xff]  ;;  %v3635_v50 = vld [vmem:[%s6810_s8 + $0x5c8] sm:$0xff] }
 0x1fd   :  { %4082 = vmatprep.subr.mxu1 %v3531_v53  ;;  %4117 = vmatprep.subr.mxu0 %v3563_v54  ;;  %v3587_v51 = vld [vmem:[%s6810_s8 + $0x448] sm:$0xff]  ;;  %v3602_v53 = vld [vmem:[%s6810_s8 + $0x4c0] sm:$0xff] }
 0x1fe   :  { %4083 = vmatpush3.msra.mxu1 %v3515_v55  ;;  %4118 = vmatpush3.msra.mxu0 %v3547_v56  ;;  %v3619_v52 = vld [vmem:[%s6810_s8 + $0x548] sm:$0xff]  ;;  %v3634_v54 = vld [vmem:[%s6810_s8 + $0x5c0] sm:$0xff] }
 0x1ff   :  { %4084 = vmatprep.subr.mxu1 %v3530_v57  ;;  %4119 = vmatprep.subr.mxu0 %v3562_v58  ;;  %v3586_v55 = vld [vmem:[%s6810_s8 + $0x440] sm:$0xff]  ;;  %v3601_v57 = vld [vmem:[%s6810_s8 + $0x4b8] sm:$0xff] }
 0x200   :  { %4085 = vmatpush3.msra.mxu1 %v3514_v59  ;;  %4120 = vmatpush3.msra.mxu0 %v3546_v60  ;;  %v3618_v56 = vld [vmem:[%s6810_s8 + $0x540] sm:$0xff]  ;;  %v3633_v58 = vld [vmem:[%s6810_s8 + $0x5b8] sm:$0xff] }
 0x201   :  { %4086 = vmatprep.subr.mxu1 %v3529_v61  ;;  %4121 = vmatprep.subr.mxu0 %v3561_v63  ;;  %v3585_v59 = vld [vmem:[%s6810_s8 + $0x438] sm:$0xff]  ;;  %v3600_v61 = vld [vmem:[%s6810_s8 + $0x4b0] sm:$0xff] }
 0x202   :  { %4087 = vmatpush3.msra.mxu1 %v3513_v0  ;;  %4122 = vmatpush3.msra.mxu0 %v3545_v1  ;;  %v3617_v60 = vld [vmem:[%s6810_s8 + $0x538] sm:$0xff]  ;;  %v3632_v63 = vld [vmem:[%s6810_s8 + $0x5b0] sm:$0xff] }
 0x203   :  { %4088 = vmatprep.subr.mxu1 %v3528_v2  ;;  %4123 = vmatprep.subr.mxu0 %v3560_v4  ;;  %v3584_v0 = vld [vmem:[%s6810_s8 + $0x430] sm:$0xff]  ;;  %v3599_v2 = vld [vmem:[%s6810_s8 + $0x4a8] sm:$0xff] }
 0x204   :  { %4089 = vmatpush3.msra.mxu1 %v3512_v9  ;;  %4124 = vmatpush3.msra.mxu0 %v3544_v10  ;;  %v3616_v1 = vld [vmem:[%s6810_s8 + $0x530] sm:$0xff]  ;;  %v3631_v4 = vld [vmem:[%s6810_s8 + $0x5a8] sm:$0xff] }
 0x205   :  { %4090 = vmatprep.subr.mxu1 %v3527_v11  ;;  %4125 = vmatprep.subr.mxu0 %v3559_v12  ;;  %v3583_v9 = vld [vmem:[%s6810_s8 + $0x428] sm:$0xff]  ;;  %v3598_v11 = vld [vmem:[%s6810_s8 + $0x4a0] sm:$0xff] }
 0x206   :  { %4091 = vmatpush3.msra.mxu1 %v3511_v13  ;;  %4126 = vmatpush3.msra.mxu0 %v3543_v14  ;;  %v3615_v10 = vld [vmem:[%s6810_s8 + $0x528] sm:$0xff]  ;;  %v3630_v12 = vld [vmem:[%s6810_s8 + $0x5a0] sm:$0xff] }
 0x207   :  { %4092 = vmatprep.subr.mxu1 %v3526_v15  ;;  %4127 = vmatprep.subr.mxu0 %v3558_v17  ;;  %v3582_v13 = vld [vmem:[%s6810_s8 + $0x420] sm:$0xff]  ;;  %v3597_v15 = vld [vmem:[%s6810_s8 + $0x498] sm:$0xff] }
 0x208   :  { %4093 = vmatpush3.msra.mxu1 %v3510_v18  ;;  %4128 = vmatpush3.msra.mxu0 %v3542_v19  ;;  %v3614_v14 = vld [vmem:[%s6810_s8 + $0x520] sm:$0xff]  ;;  %v3629_v17 = vld [vmem:[%s6810_s8 + $0x598] sm:$0xff] }
 0x209   :  { %1878 = vmatmul.mubr.f32.vlgmr.msra.gmra.mxu1 %v5339_v7  ;;  %1948 = vmatmul.mubr.f32.vlgmr.msra.gmra.mxu0 %v5341_v8  ;;  %v3581_v18 = vld [vmem:[%s6810_s8 + $0x418] sm:$0xff] }
 0x20a   :  { %4132 = vmatprep.subr.mxu1 %v3609_v20  ;;  %4167 = vmatprep.subr.mxu0 %v3641_v21  ;;  %v3613_v19 = vld [vmem:[%s6810_s8 + $0x518] sm:$0xff]  ;;  %v3596_v20 = vld [vmem:[%s6810_s8 + $0x490] sm:$0xff] }
 0x20b   :  { %4133 = vmatpush3.msra.mxu1 %v3593_v22  ;;  %2110 = vmatprep.mubr.f32.mxu1 %v5335_v5  ;;  %v3628_v21 = vld [vmem:[%s6810_s8 + $0x590] sm:$0xff] }
 0x20c   :  { %4168 = vmatpush3.msra.mxu0 %v3625_v25  ;;  %2180 = vmatprep.mubr.f32.mxu0 %v5337_v6  ;;  %v3580_v22 = vld [vmem:[%s6810_s8 + $0x410] sm:$0xff] }
 0x20d   :  { %4134 = vmatprep.subr.mxu1 %v3608_v26  ;;  %4169 = vmatprep.subr.mxu0 %v3640_v27  ;;  %v3612_v25 = vld [vmem:[%s6810_s8 + $0x510] sm:$0xff]  ;;  %v3595_v26 = vld [vmem:[%s6810_s8 + $0x488] sm:$0xff] }
 0x20e   :  { %4135 = vmatpush3.msra.mxu1 %v3592_v28  ;;  %4170 = vmatpush3.msra.mxu0 %v3624_v29  ;;  %v3627_v27 = vld [vmem:[%s6810_s8 + $0x588] sm:$0xff] }
 0x20f   :  { %4136 = vmatprep.subr.mxu1 %v3607_v30  ;;  %4171 = vmatprep.subr.mxu0 %v3639_v31  ;;  %v3579_v28 = vld [vmem:[%s6810_s8 + $0x408] sm:$0xff]  ;;  %v3594_v30 = vld [vmem:[%s6810_s8 + $0x480] sm:$0xff] }
 0x210   :  { %4137 = vmatpush3.msra.mxu1 %v3591_v33  ;;  %4172 = vmatpush3.msra.mxu0 %v3623_v37  ;;  %v3611_v29 = vld [vmem:[%s6810_s8 + $0x508] sm:$0xff]  ;;  %v3626_v31 = vld [vmem:[%s6810_s8 + $0x580] sm:$0xff] }
 0x211   :  { %4138 = vmatprep.subr.mxu1 %v3606_v38  ;;  %4173 = vmatprep.subr.mxu0 %v3638_v40  ;;  %v3578_v33 = vld [vmem:[%s6810_s8 + $0x400] sm:$0xff]  ;;  %v3677_v38 = vld [vmem:[%s6810_s8 + $0x6f8] sm:$0xff] }
 0x212   :  { %4139 = vmatpush3.msra.mxu1 %v3590_v41  ;;  %4174 = vmatpush3.msra.mxu0 %v3622_v24  ;;  %v3610_v37 = vld [vmem:[%s6810_s8 + $0x500] sm:$0xff]  ;;  %v3709_v40 = vld [vmem:[%s6810_s8 + $0x7f8] sm:$0xff] }
 0x213   :  { %4140 = vmatprep.subr.mxu1 %v3605_v42  ;;  %4175 = vmatprep.subr.mxu0 %v3637_v43  ;;  %v3661_v41 = vld [vmem:[%s6810_s8 + $0x678] sm:$0xff]  ;;  %v3676_v42 = vld [vmem:[%s6810_s8 + $0x6f0] sm:$0xff] }
 0x214   :  { %4141 = vmatpush3.msra.mxu1 %v3589_v44  ;;  %4176 = vmatpush3.msra.mxu0 %v3621_v45  ;;  %v3693_v24 = vld [vmem:[%s6810_s8 + $0x778] sm:$0xff]  ;;  %v3708_v43 = vld [vmem:[%s6810_s8 + $0x7f0] sm:$0xff] }
 0x215   :  { %4142 = vmatprep.subr.mxu1 %v3604_v32  ;;  %4177 = vmatprep.subr.mxu0 %v3636_v47  ;;  %v3660_v44 = vld [vmem:[%s6810_s8 + $0x670] sm:$0xff]  ;;  %v3675_v32 = vld [vmem:[%s6810_s8 + $0x6e8] sm:$0xff] }
 0x216   :  { %4143 = vmatpush3.msra.mxu1 %v3588_v48  ;;  %4178 = vmatpush3.msra.mxu0 %v3620_v49  ;;  %v3692_v45 = vld [vmem:[%s6810_s8 + $0x770] sm:$0xff]  ;;  %v3707_v47 = vld [vmem:[%s6810_s8 + $0x7e8] sm:$0xff] }
 0x217   :  { %4144 = vmatprep.subr.mxu1 %v3603_v34  ;;  %4179 = vmatprep.subr.mxu0 %v3635_v50  ;;  %v3659_v48 = vld [vmem:[%s6810_s8 + $0x668] sm:$0xff]  ;;  %v3674_v34 = vld [vmem:[%s6810_s8 + $0x6e0] sm:$0xff] }
 0x218   :  { %4145 = vmatpush3.msra.mxu1 %v3587_v51  ;;  %4180 = vmatpush3.msra.mxu0 %v3619_v52  ;;  %v3691_v49 = vld [vmem:[%s6810_s8 + $0x768] sm:$0xff]  ;;  %v3706_v50 = vld [vmem:[%s6810_s8 + $0x7e0] sm:$0xff] }
 0x219   :  { %4146 = vmatprep.subr.mxu1 %v3602_v53  ;;  %4181 = vmatprep.subr.mxu0 %v3634_v54  ;;  %v3658_v51 = vld [vmem:[%s6810_s8 + $0x660] sm:$0xff]  ;;  %v3673_v53 = vld [vmem:[%s6810_s8 + $0x6d8] sm:$0xff] }
 0x21a   :  { %4147 = vmatpush3.msra.mxu1 %v3586_v55  ;;  %4182 = vmatpush3.msra.mxu0 %v3618_v56  ;;  %v3690_v52 = vld [vmem:[%s6810_s8 + $0x760] sm:$0xff]  ;;  %v3705_v54 = vld [vmem:[%s6810_s8 + $0x7d8] sm:$0xff] }
 0x21b   :  { %4148 = vmatprep.subr.mxu1 %v3601_v57  ;;  %4183 = vmatprep.subr.mxu0 %v3633_v58  ;;  %v3657_v55 = vld [vmem:[%s6810_s8 + $0x658] sm:$0xff]  ;;  %v3672_v57 = vld [vmem:[%s6810_s8 + $0x6d0] sm:$0xff] }
 0x21c   :  { %4149 = vmatpush3.msra.mxu1 %v3585_v59  ;;  %4184 = vmatpush3.msra.mxu0 %v3617_v60  ;;  %v3689_v56 = vld [vmem:[%s6810_s8 + $0x758] sm:$0xff]  ;;  %v3704_v58 = vld [vmem:[%s6810_s8 + $0x7d0] sm:$0xff] }
 0x21d   :  { %4150 = vmatprep.subr.mxu1 %v3600_v61  ;;  %4185 = vmatprep.subr.mxu0 %v3632_v63  ;;  %v3656_v59 = vld [vmem:[%s6810_s8 + $0x650] sm:$0xff]  ;;  %v3671_v61 = vld [vmem:[%s6810_s8 + $0x6c8] sm:$0xff] }
 0x21e   :  { %4151 = vmatpush3.msra.mxu1 %v3584_v0  ;;  %4186 = vmatpush3.msra.mxu0 %v3616_v1  ;;  %v3688_v60 = vld [vmem:[%s6810_s8 + $0x750] sm:$0xff]  ;;  %v3703_v63 = vld [vmem:[%s6810_s8 + $0x7c8] sm:$0xff] }
 0x21f   :  { %4152 = vmatprep.subr.mxu1 %v3599_v2  ;;  %4187 = vmatprep.subr.mxu0 %v3631_v4  ;;  %v3655_v0 = vld [vmem:[%s6810_s8 + $0x648] sm:$0xff]  ;;  %v3670_v2 = vld [vmem:[%s6810_s8 + $0x6c0] sm:$0xff] }
 0x220   :  { %4153 = vmatpush3.msra.mxu1 %v3583_v9  ;;  %4188 = vmatpush3.msra.mxu0 %v3615_v10  ;;  %v3687_v1 = vld [vmem:[%s6810_s8 + $0x748] sm:$0xff]  ;;  %v3702_v4 = vld [vmem:[%s6810_s8 + $0x7c0] sm:$0xff] }
 0x221   :  { %4154 = vmatprep.subr.mxu1 %v3598_v11  ;;  %4189 = vmatprep.subr.mxu0 %v3630_v12  ;;  %v3654_v9 = vld [vmem:[%s6810_s8 + $0x640] sm:$0xff]  ;;  %v3669_v11 = vld [vmem:[%s6810_s8 + $0x6b8] sm:$0xff] }
 0x222   :  { %4155 = vmatpush3.msra.mxu1 %v3582_v13  ;;  %4190 = vmatpush3.msra.mxu0 %v3614_v14  ;;  %v3686_v10 = vld [vmem:[%s6810_s8 + $0x740] sm:$0xff]  ;;  %v3701_v12 = vld [vmem:[%s6810_s8 + $0x7b8] sm:$0xff] }
 0x223   :  { %4156 = vmatprep.subr.mxu1 %v3597_v15  ;;  %4191 = vmatprep.subr.mxu0 %v3629_v17  ;;  %v3653_v13 = vld [vmem:[%s6810_s8 + $0x638] sm:$0xff]  ;;  %v3668_v15 = vld [vmem:[%s6810_s8 + $0x6b0] sm:$0xff] }
 0x224   :  { %4157 = vmatpush3.msra.mxu1 %v3581_v18  ;;  %4192 = vmatpush3.msra.mxu0 %v3613_v19  ;;  %v3685_v14 = vld [vmem:[%s6810_s8 + $0x738] sm:$0xff]  ;;  %v3700_v17 = vld [vmem:[%s6810_s8 + $0x7b0] sm:$0xff] }
 0x225   :  { %4158 = vmatprep.subr.mxu1 %v3596_v20  ;;  %4193 = vmatprep.subr.mxu0 %v3628_v21  ;;  %v3652_v18 = vld [vmem:[%s6810_s8 + $0x630] sm:$0xff]  ;;  %v3667_v20 = vld [vmem:[%s6810_s8 + $0x6a8] sm:$0xff] }
 0x226   :  { %4159 = vmatpush3.msra.mxu1 %v3580_v22  ;;  %4194 = vmatpush3.msra.mxu0 %v3612_v25  ;;  %v3684_v19 = vld [vmem:[%s6810_s8 + $0x730] sm:$0xff]  ;;  %v3699_v21 = vld [vmem:[%s6810_s8 + $0x7a8] sm:$0xff] }
 0x227   :  { %4160 = vmatprep.subr.mxu1 %v3595_v26  ;;  %4195 = vmatprep.subr.mxu0 %v3627_v27  ;;  %v3651_v22 = vld [vmem:[%s6810_s8 + $0x628] sm:$0xff]  ;;  %v3666_v26 = vld [vmem:[%s6810_s8 + $0x6a0] sm:$0xff] }
 0x228   :  { %4161 = vmatpush3.msra.mxu1 %v3579_v28  ;;  %4196 = vmatpush3.msra.mxu0 %v3611_v29  ;;  %v3683_v25 = vld [vmem:[%s6810_s8 + $0x728] sm:$0xff]  ;;  %v3698_v27 = vld [vmem:[%s6810_s8 + $0x7a0] sm:$0xff] }
 0x229   :  { %4162 = vmatprep.subr.mxu1 %v3594_v30  ;;  %4197 = vmatprep.subr.mxu0 %v3626_v31  ;;  %v3650_v28 = vld [vmem:[%s6810_s8 + $0x620] sm:$0xff]  ;;  %v3665_v30 = vld [vmem:[%s6810_s8 + $0x698] sm:$0xff] }
 0x22a   :  { %4163 = vmatpush3.msra.mxu1 %v3578_v33  ;;  %4198 = vmatpush3.msra.mxu0 %v3610_v37  ;;  %v3682_v29 = vld [vmem:[%s6810_s8 + $0x720] sm:$0xff]  ;;  %v3697_v31 = vld [vmem:[%s6810_s8 + $0x798] sm:$0xff] }
 0x22b   :  { %2111 = vmatmul.mubr.f32.vlgmr.msra.gmra.mxu1 %v5339_v7  ;;  %2181 = vmatmul.mubr.f32.vlgmr.msra.gmra.mxu0 %v5341_v8  ;;  %v3649_v33 = vld [vmem:[%s6810_s8 + $0x618] sm:$0xff] }
 0x22c   :  { %4202 = vmatprep.subr.mxu1 %v3677_v38  ;;  %4237 = vmatprep.subr.mxu0 %v3709_v40  ;;  %v3681_v37 = vld [vmem:[%s6810_s8 + $0x718] sm:$0xff]  ;;  %v3664_v38 = vld [vmem:[%s6810_s8 + $0x690] sm:$0xff] }
 0x22d   :  { %4203 = vmatpush3.msra.mxu1 %v3661_v41  ;;  %2343 = vmatprep.mubr.f32.mxu1 %v5335_v5  ;;  %v3696_v40 = vld [vmem:[%s6810_s8 + $0x790] sm:$0xff] }
 0x22e   :  { %4238 = vmatpush3.msra.mxu0 %v3693_v24  ;;  %2413 = vmatprep.mubr.f32.mxu0 %v5337_v6  ;;  %v3648_v41 = vld [vmem:[%s6810_s8 + $0x610] sm:$0xff] }
 0x22f   :  { %4204 = vmatprep.subr.mxu1 %v3676_v42  ;;  %4239 = vmatprep.subr.mxu0 %v3708_v43  ;;  %v3680_v24 = vld [vmem:[%s6810_s8 + $0x710] sm:$0xff]  ;;  %v3663_v42 = vld [vmem:[%s6810_s8 + $0x688] sm:$0xff] }
 0x230   :  { %4205 = vmatpush3.msra.mxu1 %v3660_v44  ;;  %4240 = vmatpush3.msra.mxu0 %v3692_v45  ;;  %v3695_v43 = vld [vmem:[%s6810_s8 + $0x788] sm:$0xff] }
 0x231   :  { %4206 = vmatprep.subr.mxu1 %v3675_v32  ;;  %4241 = vmatprep.subr.mxu0 %v3707_v47  ;;  %v3647_v44 = vld [vmem:[%s6810_s8 + $0x608] sm:$0xff]  ;;  %v3662_v32 = vld [vmem:[%s6810_s8 + $0x680] sm:$0xff] }
 0x232   :  { %4207 = vmatpush3.msra.mxu1 %v3659_v48  ;;  %4242 = vmatpush3.msra.mxu0 %v3691_v49  ;;  %v3679_v45 = vld [vmem:[%s6810_s8 + $0x708] sm:$0xff]  ;;  %v3694_v47 = vld [vmem:[%s6810_s8 + $0x780] sm:$0xff] }
 0x233   :  { %4208 = vmatprep.subr.mxu1 %v3674_v34  ;;  %4243 = vmatprep.subr.mxu0 %v3706_v50  ;;  %v3646_v48 = vld [vmem:[%s6810_s8 + $0x600] sm:$0xff]  ;;  %v3745_v34 = vld [vmem:[%s6810_s8 + $0x8f8] sm:$0xff] }
 0x234   :  { %4209 = vmatpush3.msra.mxu1 %v3658_v51  ;;  %4244 = vmatpush3.msra.mxu0 %v3690_v52  ;;  %v3678_v49 = vld [vmem:[%s6810_s8 + $0x700] sm:$0xff]  ;;  %v3777_v50 = vld [vmem:[%s6810_s8 + $0x9f8] sm:$0xff] }
 0x235   :  { %4210 = vmatprep.subr.mxu1 %v3673_v53  ;;  %4245 = vmatprep.subr.mxu0 %v3705_v54  ;;  %v3729_v51 = vld [vmem:[%s6810_s8 + $0x878] sm:$0xff]  ;;  %v3744_v53 = vld [vmem:[%s6810_s8 + $0x8f0] sm:$0xff] }
 0x236   :  { %4211 = vmatpush3.msra.mxu1 %v3657_v55  ;;  %4246 = vmatpush3.msra.mxu0 %v3689_v56  ;;  %v3761_v52 = vld [vmem:[%s6810_s8 + $0x978] sm:$0xff]  ;;  %v3776_v54 = vld [vmem:[%s6810_s8 + $0x9f0] sm:$0xff] }
 0x237   :  { %4212 = vmatprep.subr.mxu1 %v3672_v57  ;;  %4247 = vmatprep.subr.mxu0 %v3704_v58  ;;  %v3728_v55 = vld [vmem:[%s6810_s8 + $0x870] sm:$0xff]  ;;  %v3743_v57 = vld [vmem:[%s6810_s8 + $0x8e8] sm:$0xff] }
 0x238   :  { %4213 = vmatpush3.msra.mxu1 %v3656_v59  ;;  %4248 = vmatpush3.msra.mxu0 %v3688_v60  ;;  %v3760_v56 = vld [vmem:[%s6810_s8 + $0x970] sm:$0xff]  ;;  %v3775_v58 = vld [vmem:[%s6810_s8 + $0x9e8] sm:$0xff] }
 0x239   :  { %4214 = vmatprep.subr.mxu1 %v3671_v61  ;;  %4249 = vmatprep.subr.mxu0 %v3703_v63  ;;  %v3727_v59 = vld [vmem:[%s6810_s8 + $0x868] sm:$0xff]  ;;  %v3742_v61 = vld [vmem:[%s6810_s8 + $0x8e0] sm:$0xff] }
 0x23a   :  { %4215 = vmatpush3.msra.mxu1 %v3655_v0  ;;  %4250 = vmatpush3.msra.mxu0 %v3687_v1  ;;  %v3759_v60 = vld [vmem:[%s6810_s8 + $0x968] sm:$0xff]  ;;  %v3774_v63 = vld [vmem:[%s6810_s8 + $0x9e0] sm:$0xff] }
 0x23b   :  { %4216 = vmatprep.subr.mxu1 %v3670_v2  ;;  %4251 = vmatprep.subr.mxu0 %v3702_v4  ;;  %v3726_v0 = vld [vmem:[%s6810_s8 + $0x860] sm:$0xff]  ;;  %v3741_v2 = vld [vmem:[%s6810_s8 + $0x8d8] sm:$0xff] }
 0x23c   :  { %4217 = vmatpush3.msra.mxu1 %v3654_v9  ;;  %4252 = vmatpush3.msra.mxu0 %v3686_v10  ;;  %v3758_v1 = vld [vmem:[%s6810_s8 + $0x960] sm:$0xff]  ;;  %v3773_v4 = vld [vmem:[%s6810_s8 + $0x9d8] sm:$0xff] }
 0x23d   :  { %4218 = vmatprep.subr.mxu1 %v3669_v11  ;;  %4253 = vmatprep.subr.mxu0 %v3701_v12  ;;  %v3725_v9 = vld [vmem:[%s6810_s8 + $0x858] sm:$0xff]  ;;  %v3740_v11 = vld [vmem:[%s6810_s8 + $0x8d0] sm:$0xff] }
 0x23e   :  { %4219 = vmatpush3.msra.mxu1 %v3653_v13  ;;  %4254 = vmatpush3.msra.mxu0 %v3685_v14  ;;  %v3757_v10 = vld [vmem:[%s6810_s8 + $0x958] sm:$0xff]  ;;  %v3772_v12 = vld [vmem:[%s6810_s8 + $0x9d0] sm:$0xff] }
 0x23f   :  { %4220 = vmatprep.subr.mxu1 %v3668_v15  ;;  %4255 = vmatprep.subr.mxu0 %v3700_v17  ;;  %v3724_v13 = vld [vmem:[%s6810_s8 + $0x850] sm:$0xff]  ;;  %v3739_v15 = vld [vmem:[%s6810_s8 + $0x8c8] sm:$0xff] }
 0x240   :  { %4221 = vmatpush3.msra.mxu1 %v3652_v18  ;;  %4256 = vmatpush3.msra.mxu0 %v3684_v19  ;;  %v3756_v14 = vld [vmem:[%s6810_s8 + $0x950] sm:$0xff]  ;;  %v3771_v17 = vld [vmem:[%s6810_s8 + $0x9c8] sm:$0xff] }
 0x241   :  { %4222 = vmatprep.subr.mxu1 %v3667_v20  ;;  %4257 = vmatprep.subr.mxu0 %v3699_v21  ;;  %v3723_v18 = vld [vmem:[%s6810_s8 + $0x848] sm:$0xff]  ;;  %v3738_v20 = vld [vmem:[%s6810_s8 + $0x8c0] sm:$0xff] }
 0x242   :  { %4223 = vmatpush3.msra.mxu1 %v3651_v22  ;;  %4258 = vmatpush3.msra.mxu0 %v3683_v25  ;;  %v3755_v19 = vld [vmem:[%s6810_s8 + $0x948] sm:$0xff]  ;;  %v3770_v21 = vld [vmem:[%s6810_s8 + $0x9c0] sm:$0xff] }
 0x243   :  { %4224 = vmatprep.subr.mxu1 %v3666_v26  ;;  %4259 = vmatprep.subr.mxu0 %v3698_v27  ;;  %v3722_v22 = vld [vmem:[%s6810_s8 + $0x840] sm:$0xff]  ;;  %v3737_v26 = vld [vmem:[%s6810_s8 + $0x8b8] sm:$0xff] }
 0x244   :  { %4225 = vmatpush3.msra.mxu1 %v3650_v28  ;;  %4260 = vmatpush3.msra.mxu0 %v3682_v29  ;;  %v3754_v25 = vld [vmem:[%s6810_s8 + $0x940] sm:$0xff]  ;;  %v3769_v27 = vld [vmem:[%s6810_s8 + $0x9b8] sm:$0xff] }
 0x245   :  { %4226 = vmatprep.subr.mxu1 %v3665_v30  ;;  %4261 = vmatprep.subr.mxu0 %v3697_v31  ;;  %v3721_v28 = vld [vmem:[%s6810_s8 + $0x838] sm:$0xff]  ;;  %v3736_v30 = vld [vmem:[%s6810_s8 + $0x8b0] sm:$0xff] }
 0x246   :  { %4227 = vmatpush3.msra.mxu1 %v3649_v33  ;;  %4262 = vmatpush3.msra.mxu0 %v3681_v37  ;;  %v3753_v29 = vld [vmem:[%s6810_s8 + $0x938] sm:$0xff]  ;;  %v3768_v31 = vld [vmem:[%s6810_s8 + $0x9b0] sm:$0xff] }
 0x247   :  { %4228 = vmatprep.subr.mxu1 %v3664_v38  ;;  %4263 = vmatprep.subr.mxu0 %v3696_v40  ;;  %v3720_v33 = vld [vmem:[%s6810_s8 + $0x830] sm:$0xff]  ;;  %v3735_v38 = vld [vmem:[%s6810_s8 + $0x8a8] sm:$0xff] }
 0x248   :  { %4229 = vmatpush3.msra.mxu1 %v3648_v41  ;;  %4264 = vmatpush3.msra.mxu0 %v3680_v24  ;;  %v3752_v37 = vld [vmem:[%s6810_s8 + $0x930] sm:$0xff]  ;;  %v3767_v40 = vld [vmem:[%s6810_s8 + $0x9a8] sm:$0xff] }
 0x249   :  { %4230 = vmatprep.subr.mxu1 %v3663_v42  ;;  %4265 = vmatprep.subr.mxu0 %v3695_v43  ;;  %v3719_v41 = vld [vmem:[%s6810_s8 + $0x828] sm:$0xff]  ;;  %v3734_v42 = vld [vmem:[%s6810_s8 + $0x8a0] sm:$0xff] }
 0x24a   :  { %4231 = vmatpush3.msra.mxu1 %v3647_v44  ;;  %4266 = vmatpush3.msra.mxu0 %v3679_v45  ;;  %v3751_v24 = vld [vmem:[%s6810_s8 + $0x928] sm:$0xff]  ;;  %v3766_v43 = vld [vmem:[%s6810_s8 + $0x9a0] sm:$0xff] }
 0x24b   :  { %4232 = vmatprep.subr.mxu1 %v3662_v32  ;;  %4267 = vmatprep.subr.mxu0 %v3694_v47  ;;  %v3718_v44 = vld [vmem:[%s6810_s8 + $0x820] sm:$0xff]  ;;  %v3733_v32 = vld [vmem:[%s6810_s8 + $0x898] sm:$0xff] }
 0x24c   :  { %4233 = vmatpush3.msra.mxu1 %v3646_v48  ;;  %4268 = vmatpush3.msra.mxu0 %v3678_v49  ;;  %v3750_v45 = vld [vmem:[%s6810_s8 + $0x920] sm:$0xff]  ;;  %v3765_v47 = vld [vmem:[%s6810_s8 + $0x998] sm:$0xff] }
 0x24d   :  { %2344 = vmatmul.mubr.f32.vlgmr.msra.gmra.mxu1 %v5339_v7  ;;  %2414 = vmatmul.mubr.f32.vlgmr.msra.gmra.mxu0 %v5341_v8  ;;  %v3717_v48 = vld [vmem:[%s6810_s8 + $0x818] sm:$0xff] }
 0x24e   :  { %4272 = vmatprep.subr.mxu1 %v3745_v34  ;;  %4307 = vmatprep.subr.mxu0 %v3777_v50  ;;  %v3749_v49 = vld [vmem:[%s6810_s8 + $0x918] sm:$0xff]  ;;  %v3732_v34 = vld [vmem:[%s6810_s8 + $0x890] sm:$0xff] }
 0x24f   :  { %4273 = vmatpush3.msra.mxu1 %v3729_v51  ;;  %2576 = vmatprep.mubr.f32.mxu1 %v5335_v5  ;;  %v3764_v50 = vld [vmem:[%s6810_s8 + $0x990] sm:$0xff] }
 0x250   :  { %4308 = vmatpush3.msra.mxu0 %v3761_v52  ;;  %2646 = vmatprep.mubr.f32.mxu0 %v5337_v6  ;;  %v3716_v51 = vld [vmem:[%s6810_s8 + $0x810] sm:$0xff] }
 0x251   :  { %4274 = vmatprep.subr.mxu1 %v3744_v53  ;;  %4309 = vmatprep.subr.mxu0 %v3776_v54  ;;  %v3748_v52 = vld [vmem:[%s6810_s8 + $0x910] sm:$0xff]  ;;  %v3731_v53 = vld [vmem:[%s6810_s8 + $0x888] sm:$0xff] }
 0x252   :  { %4275 = vmatpush3.msra.mxu1 %v3728_v55  ;;  %4310 = vmatpush3.msra.mxu0 %v3760_v56  ;;  %v3763_v54 = vld [vmem:[%s6810_s8 + $0x988] sm:$0xff] }
 0x253   :  { %4276 = vmatprep.subr.mxu1 %v3743_v57  ;;  %4311 = vmatprep.subr.mxu0 %v3775_v58  ;;  %v3715_v55 = vld [vmem:[%s6810_s8 + $0x808] sm:$0xff]  ;;  %v3730_v57 = vld [vmem:[%s6810_s8 + $0x880] sm:$0xff] }
 0x254   :  { %4277 = vmatpush3.msra.mxu1 %v3727_v59  ;;  %4312 = vmatpush3.msra.mxu0 %v3759_v60  ;;  %v3747_v56 = vld [vmem:[%s6810_s8 + $0x908] sm:$0xff]  ;;  %v3762_v58 = vld [vmem:[%s6810_s8 + $0x980] sm:$0xff] }
 0x255   :  { %4278 = vmatprep.subr.mxu1 %v3742_v61  ;;  %4313 = vmatprep.subr.mxu0 %v3774_v63  ;;  %v3714_v59 = vld [vmem:[%s6810_s8 + $0x800] sm:$0xff]  ;;  %v3813_v61 = vld [vmem:[%s6810_s8 + $0xaf8] sm:$0xff] }
 0x256   :  { %4279 = vmatpush3.msra.mxu1 %v3726_v0  ;;  %4314 = vmatpush3.msra.mxu0 %v3758_v1  ;;  %v3746_v60 = vld [vmem:[%s6810_s8 + $0x900] sm:$0xff]  ;;  %v3845_v63 = vld [vmem:[%s6810_s8 + $0xbf8] sm:$0xff] }
 0x257   :  { %4280 = vmatprep.subr.mxu1 %v3741_v2  ;;  %4315 = vmatprep.subr.mxu0 %v3773_v4  ;;  %v3797_v0 = vld [vmem:[%s6810_s8 + $0xa78] sm:$0xff]  ;;  %v3812_v2 = vld [vmem:[%s6810_s8 + $0xaf0] sm:$0xff] }
 0x258   :  { %4281 = vmatpush3.msra.mxu1 %v3725_v9  ;;  %4316 = vmatpush3.msra.mxu0 %v3757_v10  ;;  %v3829_v1 = vld [vmem:[%s6810_s8 + $0xb78] sm:$0xff]  ;;  %v3844_v4 = vld [vmem:[%s6810_s8 + $0xbf0] sm:$0xff] }
 0x259   :  { %4282 = vmatprep.subr.mxu1 %v3740_v11  ;;  %4317 = vmatprep.subr.mxu0 %v3772_v12  ;;  %v3796_v9 = vld [vmem:[%s6810_s8 + $0xa70] sm:$0xff]  ;;  %v3811_v11 = vld [vmem:[%s6810_s8 + $0xae8] sm:$0xff] }
 0x25a   :  { %4283 = vmatpush3.msra.mxu1 %v3724_v13  ;;  %4318 = vmatpush3.msra.mxu0 %v3756_v14  ;;  %v3828_v10 = vld [vmem:[%s6810_s8 + $0xb70] sm:$0xff]  ;;  %v3843_v12 = vld [vmem:[%s6810_s8 + $0xbe8] sm:$0xff] }
 0x25b   :  { %4284 = vmatprep.subr.mxu1 %v3739_v15  ;;  %4319 = vmatprep.subr.mxu0 %v3771_v17  ;;  %v3795_v13 = vld [vmem:[%s6810_s8 + $0xa68] sm:$0xff]  ;;  %v3810_v15 = vld [vmem:[%s6810_s8 + $0xae0] sm:$0xff] }
 0x25c   :  { %4285 = vmatpush3.msra.mxu1 %v3723_v18  ;;  %4320 = vmatpush3.msra.mxu0 %v3755_v19  ;;  %v3827_v14 = vld [vmem:[%s6810_s8 + $0xb68] sm:$0xff]  ;;  %v3842_v17 = vld [vmem:[%s6810_s8 + $0xbe0] sm:$0xff] }
 0x25d   :  { %4286 = vmatprep.subr.mxu1 %v3738_v20  ;;  %4321 = vmatprep.subr.mxu0 %v3770_v21  ;;  %v3794_v18 = vld [vmem:[%s6810_s8 + $0xa60] sm:$0xff]  ;;  %v3809_v20 = vld [vmem:[%s6810_s8 + $0xad8] sm:$0xff] }
 0x25e   :  { %4287 = vmatpush3.msra.mxu1 %v3722_v22  ;;  %4322 = vmatpush3.msra.mxu0 %v3754_v25  ;;  %v3826_v19 = vld [vmem:[%s6810_s8 + $0xb60] sm:$0xff]  ;;  %v3841_v21 = vld [vmem:[%s6810_s8 + $0xbd8] sm:$0xff] }
 0x25f   :  { %4288 = vmatprep.subr.mxu1 %v3737_v26  ;;  %4323 = vmatprep.subr.mxu0 %v3769_v27  ;;  %v3793_v22 = vld [vmem:[%s6810_s8 + $0xa58] sm:$0xff]  ;;  %v3808_v26 = vld [vmem:[%s6810_s8 + $0xad0] sm:$0xff] }
 0x260   :  { %4289 = vmatpush3.msra.mxu1 %v3721_v28  ;;  %4324 = vmatpush3.msra.mxu0 %v3753_v29  ;;  %v3825_v25 = vld [vmem:[%s6810_s8 + $0xb58] sm:$0xff]  ;;  %v3840_v27 = vld [vmem:[%s6810_s8 + $0xbd0] sm:$0xff] }
 0x261   :  { %4290 = vmatprep.subr.mxu1 %v3736_v30  ;;  %4325 = vmatprep.subr.mxu0 %v3768_v31  ;;  %v3792_v28 = vld [vmem:[%s6810_s8 + $0xa50] sm:$0xff]  ;;  %v3807_v30 = vld [vmem:[%s6810_s8 + $0xac8] sm:$0xff] }
 0x262   :  { %4291 = vmatpush3.msra.mxu1 %v3720_v33  ;;  %4326 = vmatpush3.msra.mxu0 %v3752_v37  ;;  %v3824_v29 = vld [vmem:[%s6810_s8 + $0xb50] sm:$0xff]  ;;  %v3839_v31 = vld [vmem:[%s6810_s8 + $0xbc8] sm:$0xff] }
 0x263   :  { %4292 = vmatprep.subr.mxu1 %v3735_v38  ;;  %4327 = vmatprep.subr.mxu0 %v3767_v40  ;;  %v3791_v33 = vld [vmem:[%s6810_s8 + $0xa48] sm:$0xff]  ;;  %v3806_v38 = vld [vmem:[%s6810_s8 + $0xac0] sm:$0xff] }
 0x264   :  { %4293 = vmatpush3.msra.mxu1 %v3719_v41  ;;  %4328 = vmatpush3.msra.mxu0 %v3751_v24  ;;  %v3823_v37 = vld [vmem:[%s6810_s8 + $0xb48] sm:$0xff]  ;;  %v3838_v40 = vld [vmem:[%s6810_s8 + $0xbc0] sm:$0xff] }
 0x265   :  { %4294 = vmatprep.subr.mxu1 %v3734_v42  ;;  %4329 = vmatprep.subr.mxu0 %v3766_v43  ;;  %v3790_v41 = vld [vmem:[%s6810_s8 + $0xa40] sm:$0xff]  ;;  %v3805_v42 = vld [vmem:[%s6810_s8 + $0xab8] sm:$0xff] }
 0x266   :  { %4295 = vmatpush3.msra.mxu1 %v3718_v44  ;;  %4330 = vmatpush3.msra.mxu0 %v3750_v45  ;;  %v3822_v24 = vld [vmem:[%s6810_s8 + $0xb40] sm:$0xff]  ;;  %v3837_v43 = vld [vmem:[%s6810_s8 + $0xbb8] sm:$0xff] }
 0x267   :  { %4296 = vmatprep.subr.mxu1 %v3733_v32  ;;  %4331 = vmatprep.subr.mxu0 %v3765_v47  ;;  %v3789_v44 = vld [vmem:[%s6810_s8 + $0xa38] sm:$0xff]  ;;  %v3804_v32 = vld [vmem:[%s6810_s8 + $0xab0] sm:$0xff] }
 0x268   :  { %4297 = vmatpush3.msra.mxu1 %v3717_v48  ;;  %4332 = vmatpush3.msra.mxu0 %v3749_v49  ;;  %v3821_v45 = vld [vmem:[%s6810_s8 + $0xb38] sm:$0xff]  ;;  %v3836_v47 = vld [vmem:[%s6810_s8 + $0xbb0] sm:$0xff] }
 0x269   :  { %4298 = vmatprep.subr.mxu1 %v3732_v34  ;;  %4333 = vmatprep.subr.mxu0 %v3764_v50  ;;  %v3788_v48 = vld [vmem:[%s6810_s8 + $0xa30] sm:$0xff]  ;;  %v3803_v34 = vld [vmem:[%s6810_s8 + $0xaa8] sm:$0xff] }
 0x26a   :  { %4299 = vmatpush3.msra.mxu1 %v3716_v51  ;;  %4334 = vmatpush3.msra.mxu0 %v3748_v52  ;;  %v3820_v49 = vld [vmem:[%s6810_s8 + $0xb30] sm:$0xff]  ;;  %v3835_v50 = vld [vmem:[%s6810_s8 + $0xba8] sm:$0xff] }
 0x26b   :  { %4300 = vmatprep.subr.mxu1 %v3731_v53  ;;  %4335 = vmatprep.subr.mxu0 %v3763_v54  ;;  %v3787_v51 = vld [vmem:[%s6810_s8 + $0xa28] sm:$0xff]  ;;  %v3802_v53 = vld [vmem:[%s6810_s8 + $0xaa0] sm:$0xff] }
 0x26c   :  { %4301 = vmatpush3.msra.mxu1 %v3715_v55  ;;  %4336 = vmatpush3.msra.mxu0 %v3747_v56  ;;  %v3819_v52 = vld [vmem:[%s6810_s8 + $0xb28] sm:$0xff]  ;;  %v3834_v54 = vld [vmem:[%s6810_s8 + $0xba0] sm:$0xff] }
 0x26d   :  { %4302 = vmatprep.subr.mxu1 %v3730_v57  ;;  %4337 = vmatprep.subr.mxu0 %v3762_v58  ;;  %v3786_v55 = vld [vmem:[%s6810_s8 + $0xa20] sm:$0xff]  ;;  %v3801_v57 = vld [vmem:[%s6810_s8 + $0xa98] sm:$0xff] }
 0x26e   :  { %4303 = vmatpush3.msra.mxu1 %v3714_v59  ;;  %4338 = vmatpush3.msra.mxu0 %v3746_v60  ;;  %v3818_v56 = vld [vmem:[%s6810_s8 + $0xb20] sm:$0xff]  ;;  %v3833_v58 = vld [vmem:[%s6810_s8 + $0xb98] sm:$0xff] }
 0x26f   :  { %2577 = vmatmul.mubr.f32.vlgmr.msra.gmra.mxu1 %v5339_v7  ;;  %2647 = vmatmul.mubr.f32.vlgmr.msra.gmra.mxu0 %v5341_v8  ;;  %v3785_v59 = vld [vmem:[%s6810_s8 + $0xa18] sm:$0xff] }
 0x270   :  { %4342 = vmatprep.subr.mxu1 %v3813_v61  ;;  %4377 = vmatprep.subr.mxu0 %v3845_v63  ;;  %v3817_v60 = vld [vmem:[%s6810_s8 + $0xb18] sm:$0xff]  ;;  %v3800_v61 = vld [vmem:[%s6810_s8 + $0xa90] sm:$0xff] }
 0x271   :  { %4343 = vmatpush3.msra.mxu1 %v3797_v0  ;;  %2808 = vmatprep.mubr.f32.mxu1 %v5335_v5  ;;  %v3832_v63 = vld [vmem:[%s6810_s8 + $0xb90] sm:$0xff] }
 0x272   :  { %4378 = vmatpush3.msra.mxu0 %v3829_v1  ;;  %2878 = vmatprep.mubr.f32.mxu0 %v5337_v6  ;;  %v3784_v0 = vld [vmem:[%s6810_s8 + $0xa10] sm:$0xff] }
 0x273   :  { %4344 = vmatprep.subr.mxu1 %v3812_v2  ;;  %4379 = vmatprep.subr.mxu0 %v3844_v4  ;;  %v3816_v1 = vld [vmem:[%s6810_s8 + $0xb10] sm:$0xff]  ;;  %v3799_v2 = vld [vmem:[%s6810_s8 + $0xa88] sm:$0xff] }
 0x274   :  { %4345 = vmatpush3.msra.mxu1 %v3796_v9  ;;  %4380 = vmatpush3.msra.mxu0 %v3828_v10  ;;  %v3831_v4 = vld [vmem:[%s6810_s8 + $0xb88] sm:$0xff] }
 0x275   :  { %4346 = vmatprep.subr.mxu1 %v3811_v11  ;;  %4381 = vmatprep.subr.mxu0 %v3843_v12  ;;  %v3783_v9 = vld [vmem:[%s6810_s8 + $0xa08] sm:$0xff]  ;;  %v3798_v11 = vld [vmem:[%s6810_s8 + $0xa80] sm:$0xff] }
 0x276   :  { %4347 = vmatpush3.msra.mxu1 %v3795_v13  ;;  %4382 = vmatpush3.msra.mxu0 %v3827_v14  ;;  %v3815_v10 = vld [vmem:[%s6810_s8 + $0xb08] sm:$0xff]  ;;  %v3830_v12 = vld [vmem:[%s6810_s8 + $0xb80] sm:$0xff] }
 0x277   :  { %4348 = vmatprep.subr.mxu1 %v3810_v15  ;;  %4383 = vmatprep.subr.mxu0 %v3842_v17  ;;  %v3782_v13 = vld [vmem:[%s6810_s8 + $0xa00] sm:$0xff]  ;;  %v3881_v15 = vld [vmem:[%s6810_s8 + $0xcf8] sm:$0xff] }
 0x278   :  { %4349 = vmatpush3.msra.mxu1 %v3794_v18  ;;  %4384 = vmatpush3.msra.mxu0 %v3826_v19  ;;  %v3814_v14 = vld [vmem:[%s6810_s8 + $0xb00] sm:$0xff]  ;;  %v3913_v17 = vld [vmem:[%s6810_s8 + $0xdf8] sm:$0xff] }
 0x279   :  { %4350 = vmatprep.subr.mxu1 %v3809_v20  ;;  %4385 = vmatprep.subr.mxu0 %v3841_v21  ;;  %v3865_v18 = vld [vmem:[%s6810_s8 + $0xc78] sm:$0xff]  ;;  %v3880_v20 = vld [vmem:[%s6810_s8 + $0xcf0] sm:$0xff] }
 0x27a   :  { %4351 = vmatpush3.msra.mxu1 %v3793_v22  ;;  %4386 = vmatpush3.msra.mxu0 %v3825_v25  ;;  %v3897_v19 = vld [vmem:[%s6810_s8 + $0xd78] sm:$0xff]  ;;  %v3912_v21 = vld [vmem:[%s6810_s8 + $0xdf0] sm:$0xff] }
 0x27b   :  { %4352 = vmatprep.subr.mxu1 %v3808_v26  ;;  %4387 = vmatprep.subr.mxu0 %v3840_v27  ;;  %v3864_v22 = vld [vmem:[%s6810_s8 + $0xc70] sm:$0xff]  ;;  %v3879_v26 = vld [vmem:[%s6810_s8 + $0xce8] sm:$0xff] }
 0x27c   :  { %4353 = vmatpush3.msra.mxu1 %v3792_v28  ;;  %4388 = vmatpush3.msra.mxu0 %v3824_v29  ;;  %v3896_v25 = vld [vmem:[%s6810_s8 + $0xd70] sm:$0xff]  ;;  %v3911_v27 = vld [vmem:[%s6810_s8 + $0xde8] sm:$0xff] }
 0x27d   :  { %4354 = vmatprep.subr.mxu1 %v3807_v30  ;;  %4389 = vmatprep.subr.mxu0 %v3839_v31  ;;  %v3863_v28 = vld [vmem:[%s6810_s8 + $0xc68] sm:$0xff]  ;;  %v3878_v30 = vld [vmem:[%s6810_s8 + $0xce0] sm:$0xff] }
 0x27e   :  { %4355 = vmatpush3.msra.mxu1 %v3791_v33  ;;  %4390 = vmatpush3.msra.mxu0 %v3823_v37  ;;  %v3895_v29 = vld [vmem:[%s6810_s8 + $0xd68] sm:$0xff]  ;;  %v3910_v31 = vld [vmem:[%s6810_s8 + $0xde0] sm:$0xff] }
 0x27f   :  { %4356 = vmatprep.subr.mxu1 %v3806_v38  ;;  %4391 = vmatprep.subr.mxu0 %v3838_v40  ;;  %v3862_v33 = vld [vmem:[%s6810_s8 + $0xc60] sm:$0xff]  ;;  %v3877_v38 = vld [vmem:[%s6810_s8 + $0xcd8] sm:$0xff] }
 0x280   :  { %4357 = vmatpush3.msra.mxu1 %v3790_v41  ;;  %4392 = vmatpush3.msra.mxu0 %v3822_v24  ;;  %v3894_v37 = vld [vmem:[%s6810_s8 + $0xd60] sm:$0xff]  ;;  %v3909_v40 = vld [vmem:[%s6810_s8 + $0xdd8] sm:$0xff] }
 0x281   :  { %4358 = vmatprep.subr.mxu1 %v3805_v42  ;;  %4393 = vmatprep.subr.mxu0 %v3837_v43  ;;  %v3861_v41 = vld [vmem:[%s6810_s8 + $0xc58] sm:$0xff]  ;;  %v3876_v42 = vld [vmem:[%s6810_s8 + $0xcd0] sm:$0xff] }
 0x282   :  { %4359 = vmatpush3.msra.mxu1 %v3789_v44  ;;  %4394 = vmatpush3.msra.mxu0 %v3821_v45  ;;  %v3893_v24 = vld [vmem:[%s6810_s8 + $0xd58] sm:$0xff]  ;;  %v3908_v43 = vld [vmem:[%s6810_s8 + $0xdd0] sm:$0xff] }
 0x283   :  { %4360 = vmatprep.subr.mxu1 %v3804_v32  ;;  %4395 = vmatprep.subr.mxu0 %v3836_v47  ;;  %v3860_v44 = vld [vmem:[%s6810_s8 + $0xc50] sm:$0xff]  ;;  %v3875_v32 = vld [vmem:[%s6810_s8 + $0xcc8] sm:$0xff] }
 0x284   :  { %4361 = vmatpush3.msra.mxu1 %v3788_v48  ;;  %4396 = vmatpush3.msra.mxu0 %v3820_v49  ;;  %v3892_v45 = vld [vmem:[%s6810_s8 + $0xd50] sm:$0xff]  ;;  %v3907_v47 = vld [vmem:[%s6810_s8 + $0xdc8] sm:$0xff] }
 0x285   :  { %4362 = vmatprep.subr.mxu1 %v3803_v34  ;;  %4397 = vmatprep.subr.mxu0 %v3835_v50  ;;  %v3859_v48 = vld [vmem:[%s6810_s8 + $0xc48] sm:$0xff]  ;;  %v3874_v34 = vld [vmem:[%s6810_s8 + $0xcc0] sm:$0xff] }
 0x286   :  { %4363 = vmatpush3.msra.mxu1 %v3787_v51  ;;  %4398 = vmatpush3.msra.mxu0 %v3819_v52  ;;  %v3891_v49 = vld [vmem:[%s6810_s8 + $0xd48] sm:$0xff]  ;;  %v3906_v50 = vld [vmem:[%s6810_s8 + $0xdc0] sm:$0xff] }
 0x287   :  { %4364 = vmatprep.subr.mxu1 %v3802_v53  ;;  %4399 = vmatprep.subr.mxu0 %v3834_v54  ;;  %v3858_v51 = vld [vmem:[%s6810_s8 + $0xc40] sm:$0xff]  ;;  %v3873_v53 = vld [vmem:[%s6810_s8 + $0xcb8] sm:$0xff] }
 0x288   :  { %4365 = vmatpush3.msra.mxu1 %v3786_v55  ;;  %4400 = vmatpush3.msra.mxu0 %v3818_v56  ;;  %v3890_v52 = vld [vmem:[%s6810_s8 + $0xd40] sm:$0xff]  ;;  %v3905_v54 = vld [vmem:[%s6810_s8 + $0xdb8] sm:$0xff] }
 0x289   :  { %4366 = vmatprep.subr.mxu1 %v3801_v57  ;;  %4401 = vmatprep.subr.mxu0 %v3833_v58  ;;  %v3857_v55 = vld [vmem:[%s6810_s8 + $0xc38] sm:$0xff]  ;;  %v3872_v57 = vld [vmem:[%s6810_s8 + $0xcb0] sm:$0xff] }
 0x28a   :  { %4367 = vmatpush3.msra.mxu1 %v3785_v59  ;;  %4402 = vmatpush3.msra.mxu0 %v3817_v60  ;;  %v3889_v56 = vld [vmem:[%s6810_s8 + $0xd38] sm:$0xff]  ;;  %v3904_v58 = vld [vmem:[%s6810_s8 + $0xdb0] sm:$0xff] }
 0x28b   :  { %4368 = vmatprep.subr.mxu1 %v3800_v61  ;;  %4403 = vmatprep.subr.mxu0 %v3832_v63  ;;  %v3856_v59 = vld [vmem:[%s6810_s8 + $0xc30] sm:$0xff]  ;;  %v3871_v61 = vld [vmem:[%s6810_s8 + $0xca8] sm:$0xff] }
 0x28c   :  { %4369 = vmatpush3.msra.mxu1 %v3784_v0  ;;  %4404 = vmatpush3.msra.mxu0 %v3816_v1  ;;  %v3888_v60 = vld [vmem:[%s6810_s8 + $0xd30] sm:$0xff]  ;;  %v3903_v63 = vld [vmem:[%s6810_s8 + $0xda8] sm:$0xff] }
 0x28d   :  { %4370 = vmatprep.subr.mxu1 %v3799_v2  ;;  %4405 = vmatprep.subr.mxu0 %v3831_v4  ;;  %v3855_v0 = vld [vmem:[%s6810_s8 + $0xc28] sm:$0xff]  ;;  %v3870_v2 = vld [vmem:[%s6810_s8 + $0xca0] sm:$0xff] }
 0x28e   :  { %4371 = vmatpush3.msra.mxu1 %v3783_v9  ;;  %4406 = vmatpush3.msra.mxu0 %v3815_v10  ;;  %v3887_v1 = vld [vmem:[%s6810_s8 + $0xd28] sm:$0xff]  ;;  %v3902_v4 = vld [vmem:[%s6810_s8 + $0xda0] sm:$0xff] }
 0x28f   :  { %4372 = vmatprep.subr.mxu1 %v3798_v11  ;;  %4407 = vmatprep.subr.mxu0 %v3830_v12  ;;  %v3854_v9 = vld [vmem:[%s6810_s8 + $0xc20] sm:$0xff]  ;;  %v3869_v11 = vld [vmem:[%s6810_s8 + $0xc98] sm:$0xff] }
 0x290   :  { %4373 = vmatpush3.msra.mxu1 %v3782_v13  ;;  %4408 = vmatpush3.msra.mxu0 %v3814_v14  ;;  %v3886_v10 = vld [vmem:[%s6810_s8 + $0xd20] sm:$0xff]  ;;  %v3901_v12 = vld [vmem:[%s6810_s8 + $0xd98] sm:$0xff] }
 0x291   :  { %2809 = vmatmul.mubr.f32.vlgmr.msra.gmra.mxu1 %v5339_v7  ;;  %2879 = vmatmul.mubr.f32.vlgmr.msra.gmra.mxu0 %v5341_v8 }
 0x292   :  { %4412 = vmatprep.subr.mxu1 %v3881_v15  ;;  %4447 = vmatprep.subr.mxu0 %v3913_v17  ;;  %v3853_v15 = vld [vmem:[%s6810_s8 + $0xc18] sm:$0xff] }
 0x293   :  { %4413 = vmatpush3.msra.mxu1 %v3865_v18  ;;  %3041 = vmatprep.mubr.f32.mxu1 %v5335_v5  ;;  %v3885_v17 = vld [vmem:[%s6810_s8 + $0xd18] sm:$0xff]  ;;  %v3868_v18 = vld [vmem:[%s6810_s8 + $0xc90] sm:$0xff] }
 0x294   :  { %4448 = vmatpush3.msra.mxu0 %v3897_v19  ;;  %3111 = vmatprep.mubr.f32.mxu0 %v5337_v6  ;;  %v3900_v19 = vld [vmem:[%s6810_s8 + $0xd90] sm:$0xff] }
 0x295   :  { %4414 = vmatprep.subr.mxu1 %v3880_v20  ;;  %4449 = vmatprep.subr.mxu0 %v3912_v21  ;;  %v3507_v20 = vld [vmem:[%s6812_s9] ss:$0 sm:$0xff] }
 0x296   :  { %4415 = vmatpush3.msra.mxu1 %v3864_v22  ;;  %4450 = vmatpush3.msra.mxu0 %v3896_v25  ;;  %v3852_v25 = vld [vmem:[%s6810_s8 + $0xc10] sm:$0xff] }
 0x297   :  { %4416 = vmatprep.subr.mxu1 %v3879_v26  ;;  %4451 = vmatprep.subr.mxu0 %v3911_v27  ;;  %v3884_v26 = vld [vmem:[%s6810_s8 + $0xd10] sm:$0xff] }
 0x298   :  { %4417 = vmatpush3.msra.mxu1 %v3863_v28  ;;  %4452 = vmatpush3.msra.mxu0 %v3895_v29  ;;  %v3867_v28 = vld [vmem:[%s6810_s8 + $0xc88] sm:$0xff] }
 0x299   :  { %4418 = vmatprep.subr.mxu1 %v3878_v30  ;;  %4453 = vmatprep.subr.mxu0 %v3910_v31  ;;  %v3899_v29 = vld [vmem:[%s6810_s8 + $0xd88] sm:$0xff] }
 0x29a   :  { %4419 = vmatpush3.msra.mxu1 %v3862_v33  ;;  %4454 = vmatpush3.msra.mxu0 %v3894_v37  ;;  %v3851_v30 = vld [vmem:[%s6810_s8 + $0xc08] sm:$0xff] }
 0x29b   :  { %4420 = vmatprep.subr.mxu1 %v3877_v38  ;;  %4455 = vmatprep.subr.mxu0 %v3909_v40  ;;  %v3883_v31 = vld [vmem:[%s6810_s8 + $0xd08] sm:$0xff]  ;;  %v3866_v38 = vld [vmem:[%s6810_s8 + $0xc80] sm:$0xff] }
 0x29c   :  { %4421 = vmatpush3.msra.mxu1 %v3861_v41  ;;  %4456 = vmatpush3.msra.mxu0 %v3893_v24  ;;  %v3898_v40 = vld [vmem:[%s6810_s8 + $0xd80] sm:$0xff] }
 0x29d   :  { %4422 = vmatprep.subr.mxu1 %v3876_v42  ;;  %4457 = vmatprep.subr.mxu0 %v3908_v43  ;;  %v3850_v41 = vld [vmem:[%s6810_s8 + $0xc00] sm:$0xff]  ;;  %v3949_v43 = vld [vmem:[%s6810_s8 + $0xef8] sm:$0xff] }
 0x29e   :  { %4423 = vmatpush3.msra.mxu1 %v3860_v44  ;;  %4458 = vmatpush3.msra.mxu0 %v3892_v45  ;;  %v3882_v24 = vld [vmem:[%s6810_s8 + $0xd00] sm:$0xff]  ;;  %v3981_v44 = vld [vmem:[%s6810_s8 + $0xff8] sm:$0xff] }
 0x29f   :  { %4424 = vmatprep.subr.mxu1 %v3875_v32  ;;  %4459 = vmatprep.subr.mxu0 %v3907_v47  ;;  %v3933_v32 = vld [vmem:[%s6810_s8 + $0xe78] sm:$0xff]  ;;  %v6530_v47 = vld [vmem:[%s6813_s10] ss:$0 sm:$0xff] }
 0x2a0   :  { %4425 = vmatpush3.msra.mxu1 %v3859_v48  ;;  %4460 = vmatpush3.msra.mxu0 %v3891_v49  ;;  %v3965_v48 = vld [vmem:[%s6810_s8 + $0xf78] sm:$0xff] }
 0x2a1   :  { %4426 = vmatprep.subr.mxu1 %v3874_v34  ;;  %4461 = vmatprep.subr.mxu0 %v3906_v50  ;;  %v3948_v34 = vld [vmem:[%s6810_s8 + $0xef0] sm:$0xff] }
 0x2a2   :  { %4427 = vmatpush3.msra.mxu1 %v3858_v51  ;;  %4462 = vmatpush3.msra.mxu0 %v3890_v52  ;;  %v3980_v50 = vld [vmem:[%s6810_s8 + $0xff0] sm:$0xff]  ;;  %v6547_v51 = vld [vmem:[%s6814_s11] ss:$0 sm:$0xff] }
 0x2a3   :  { %4428 = vmatprep.subr.mxu1 %v3873_v53  ;;  %4463 = vmatprep.subr.mxu0 %v3905_v54  ;;  %v3932_v52 = vld [vmem:[%s6810_s8 + $0xe70] sm:$0xff]  ;;  %v3947_v54 = vld [vmem:[%s6810_s8 + $0xee8] sm:$0xff] }
 0x2a4   :  { %4429 = vmatpush3.msra.mxu1 %v3857_v55  ;;  %4464 = vmatpush3.msra.mxu0 %v3889_v56  ;;  %v3964_v53 = vld [vmem:[%s6810_s8 + $0xf70] sm:$0xff]  ;;  %v3931_v56 = vld [vmem:[%s6810_s8 + $0xe68] sm:$0xff] }
 0x2a5   :  { %4430 = vmatprep.subr.mxu1 %v3872_v57  ;;  %4465 = vmatprep.subr.mxu0 %v3904_v58  ;;  %v3946_v57 = vld [vmem:[%s6810_s8 + $0xee0] sm:$0xff] }
 0x2a6   :  { %4431 = vmatpush3.msra.mxu1 %v3856_v59  ;;  %4466 = vmatpush3.msra.mxu0 %v3888_v60  ;;  %v3978_v58 = vld [vmem:[%s6810_s8 + $0xfe0] sm:$0xff] }
 0x2a7   :  { %4432 = vmatprep.subr.mxu1 %v3871_v61  ;;  %4467 = vmatprep.subr.mxu0 %v3903_v63  ;;  %v3930_v59 = vld [vmem:[%s6810_s8 + $0xe60] sm:$0xff]  ;;  %v3945_v61 = vld [vmem:[%s6810_s8 + $0xed8] sm:$0xff] }
 0x2a8   :  { %4433 = vmatpush3.msra.mxu1 %v3855_v0  ;;  %4468 = vmatpush3.msra.mxu0 %v3887_v1  ;;  %v4024_v13 = vpop.f32.mrf.mxu1  ;;  %v4059_v14 = vpop.f32.mrf.mxu0  ;;  %v3962_v60 = vld [vmem:[%s6810_s8 + $0xf60] sm:$0xff]  ;;  %v3977_v63 = vld [vmem:[%s6810_s8 + $0xfd8] sm:$0xff] }
 0x2a9   :  { %4434 = vmatprep.subr.mxu1 %v3870_v2  ;;  %4469 = vmatprep.subr.mxu0 %v3902_v4  ;;  %v3929_v0 = vld [vmem:[%s6810_s8 + $0xe58] sm:$0xff]  ;;  %v3944_v2 = vld [vmem:[%s6810_s8 + $0xed0] sm:$0xff] }
 0x2aa   :  { %4435 = vmatpush3.msra.mxu1 %v3854_v9  ;;  %4470 = vmatpush3.msra.mxu0 %v3886_v10  ;;  %v4025_v21 = vpop.f32.mrf.mxu1  ;;  %v4060_v22 = vpop.f32.mrf.mxu0  ;;  %v3961_v1 = vld [vmem:[%s6810_s8 + $0xf58] sm:$0xff]  ;;  %v3976_v4 = vld [vmem:[%s6810_s8 + $0xfd0] sm:$0xff] }
 0x2ab   :  { %4436 = vmatprep.subr.mxu1 %v3869_v11  ;;  %4471 = vmatprep.subr.mxu0 %v3901_v12  ;;  %v4026_v27 = vadd.f32 %v4025_v21, %v4024_v13  ;;  %v4061_v37 = vadd.f32 %v4060_v22, %v4059_v14  ;;  %v3928_v9 = vld [vmem:[%s6810_s8 + $0xe50] sm:$0xff]  ;;  %v3943_v11 = vld [vmem:[%s6810_s8 + $0xec8] sm:$0xff]  ;;  %v3973_v21 = vld [vmem:[%s6810_s8 + $0xfb8] sm:$0xff] }
 0x2ac   :  { %4437 = vmatpush3.msra.mxu1 %v3853_v15  ;;  %4472 = vmatpush3.msra.mxu0 %v3885_v17  ;;  %v3960_v10 = vld [vmem:[%s6810_s8 + $0xf50] sm:$0xff]  ;;  %v3975_v12 = vld [vmem:[%s6810_s8 + $0xfc8] sm:$0xff]  ;;  %v3942_v15 = vld [vmem:[%s6810_s8 + $0xec0] sm:$0xff] }
 0x2ad   :  { %4438 = vmatprep.subr.mxu1 %v3868_v18  ;;  %4473 = vmatprep.subr.mxu0 %v3900_v19  ;;  %v1647_v33 = vadd.f32 %v4026_v27, %v3507_v20  ;;  %v3927_v13 = vld [vmem:[%s6810_s8 + $0xe48] sm:$0xff]  ;;  %v3974_v17 = vld [vmem:[%s6810_s8 + $0xfc0] sm:$0xff]  ;;  %v3941_v20 = vld [vmem:[%s6810_s8 + $0xeb8] sm:$0xff] }
 0x2ae   :  { %4439 = vmatpush3.msra.mxu1 %v3852_v25  ;;  %4474 = vmatpush3.msra.mxu0 %v3884_v26  ;;  %v3959_v14 = vld [vmem:[%s6810_s8 + $0xf48] sm:$0xff]  ;;  %v3926_v18 = vld [vmem:[%s6810_s8 + $0xe40] sm:$0xff]  ;;  %v3925_v22 = vld [vmem:[%s6810_s8 + $0xe38] sm:$0xff] }
 0x2af   :  { %4440 = vmatprep.subr.mxu1 %v3867_v28  ;;  %4475 = vmatprep.subr.mxu0 %v3899_v29  ;;  %v1717_v42 = vadd.f32 %v4061_v37, %v1647_v33  ;;  %v3958_v19 = vld [vmem:[%s6810_s8 + $0xf40] sm:$0xff]  ;;  %v3957_v25 = vld [vmem:[%s6810_s8 + $0xf38] sm:$0xff]  ;;  %v3940_v26 = vld [vmem:[%s6810_s8 + $0xeb0] sm:$0xff] }
 0x2b0   :  { %4441 = vmatpush3.msra.mxu1 %v3851_v30  ;;  %4476 = vmatpush3.msra.mxu0 %v3883_v31  ;;  %v3972_v27 = vld [vmem:[%s6810_s8 + $0xfb0] sm:$0xff]  ;;  %v3939_v30 = vld [vmem:[%s6810_s8 + $0xea8] sm:$0xff] }
 0x2b1   :  { %4442 = vmatprep.subr.mxu1 %v3866_v38  ;;  %4477 = vmatprep.subr.mxu0 %v3898_v40  ;;  %v1720_v45 = vmax.f32 %v1717_v42, 0.0  ;;  %v3924_v28 = vld [vmem:[%s6810_s8 + $0xe30] sm:$0xff]  ;;  %v3971_v31 = vld [vmem:[%s6810_s8 + $0xfa8] sm:$0xff]  ;;  %v3938_v38 = vld [vmem:[%s6810_s8 + $0xea0] sm:$0xff] }
 0x2b2   :  { %4443 = vmatpush3.msra.mxu1 %v3850_v41  ;;  %4478 = vmatpush3.msra.mxu0 %v3882_v24  ;;  %v3956_v29 = vld [vmem:[%s6810_s8 + $0xf30] sm:$0xff]  ;;  %v3923_v33 = vld [vmem:[%s6810_s8 + $0xe28] sm:$0xff]  ;;  %v3970_v40 = vld [vmem:[%s6810_s8 + $0xfa0] sm:$0xff] }
 0x2b3   :  { %3042 = vmatmul.mubr.f32.vlgmr.msra.gmra.mxu1 %v5339_v7  ;;  %3112 = vmatmul.mubr.f32.vlgmr.msra.gmra.mxu0 %v5341_v8  ;;  %v1721_v49 = vadd.f32 %v1720_v45, %v4729_v35  ;;  %v3955_v37 = vld [vmem:[%s6810_s8 + $0xf28] sm:$0xff]  ;;  %v3922_v41 = vld [vmem:[%s6810_s8 + $0xe20] sm:$0xff]  ;;  %v3969_v45 = vld [vmem:[%s6810_s8 + $0xf98] sm:$0xff] }
 0x2b4   :  { %4482 = vmatprep.subr.mxu1 %v3949_v43  ;;  %4517 = vmatprep.subr.mxu0 %v3981_v44  ;;  %v3954_v24 = vld [vmem:[%s6810_s8 + $0xf20] sm:$0xff]  ;;  %v3937_v44 = vld [vmem:[%s6810_s8 + $0xe98] sm:$0xff] }
 0x2b5   :  { %4483 = vmatpush3.msra.mxu1 %v3933_v32  ;;  %3274 = vmatprep.mubr.f32.mxu1 %v5335_v5  ;;  %v1729_v35 = vmul.f32 %v6530_v47, %v1721_v49  ;;  %v3979_v5 = vld [vmem:[%s6810_s8 + $0xfe8] sm:$0xff]  ;;  %v3921_v32 = vld [vmem:[%s6810_s8 + $0xe18] sm:$0xff]  ;;  %v3575_v49 = vld [vmem:[%s6812_s9 + $0x1] ss:$0 sm:$0xff] }
 0x2b6   :  { %4518 = vmatpush3.msra.mxu0 %v3965_v48  ;;  %3344 = vmatprep.mubr.f32.mxu0 %v5337_v6  ;;  %v3963_v6 = vld [vmem:[%s6810_s8 + $0xf68] sm:$0xff]  ;;  %v3953_v48 = vld [vmem:[%s6810_s8 + $0xf18] sm:$0xff] }
 0x2b7   :  { %4484 = vmatprep.subr.mxu1 %v3948_v34  ;;  %4519 = vmatprep.subr.mxu0 %v3980_v50  ;;  %v1737_v55 = vadd.f32 %v6547_v51, %v1729_v35  ;;  %v3936_v35 = vld [vmem:[%s6810_s8 + $0xe90] sm:$0xff] }
 0x2b8   :  { %4485 = vmatpush3.msra.mxu1 %v3932_v52  ;;  %4520 = vmatpush3.msra.mxu0 %v3964_v53  ;;  %v3968_v52 = vld [vmem:[%s6810_s8 + $0xf90] sm:$0xff] }
 0x2b9   :  { %1739 = vst.msk [vmem:[%s6815_s12] sm:$0x3] %vm1738_vm1, %v1737_v55  ;;  %4486 = vmatprep.subr.mxu1 %v3947_v54  ;;  %4521 = vmatprep.subr.mxu0 %v3979_v5  ;;  %v3920_v54 = vld [vmem:[%s6810_s8 + $0xe10] sm:$0xff]  ;;  %v3935_v55 = vld [vmem:[%s6810_s8 + $0xe88] sm:$0xff] }
 0x2ba   :  { %4487 = vmatpush3.msra.mxu1 %v3931_v56  ;;  %4522 = vmatpush3.msra.mxu0 %v3963_v6  ;;  %v3952_v5 = vld [vmem:[%s6810_s8 + $0xf10] sm:$0xff]  ;;  %v3967_v56 = vld [vmem:[%s6810_s8 + $0xf88] sm:$0xff] }
 0x2bb   :  { %4488 = vmatprep.subr.mxu1 %v3946_v57  ;;  %4523 = vmatprep.subr.mxu0 %v3978_v58  ;;  %v3919_v58 = vld [vmem:[%s6810_s8 + $0xe08] sm:$0xff] }
 0x2bc   :  { %4489 = vmatpush3.msra.mxu1 %v3930_v59  ;;  %4524 = vmatpush3.msra.mxu0 %v3962_v60  ;;  %v3951_v59 = vld [vmem:[%s6810_s8 + $0xf08] sm:$0xff]  ;;  %v3934_v60 = vld [vmem:[%s6810_s8 + $0xe80] sm:$0xff] }
 0x2bd   :  { %4490 = vmatprep.subr.mxu1 %v3945_v61  ;;  %4525 = vmatprep.subr.mxu0 %v3977_v63  ;;  %v3966_v61 = vld [vmem:[%s6810_s8 + $0xf80] sm:$0xff] }
 0x2be   :  { %4491 = vmatpush3.msra.mxu1 %v3929_v0  ;;  %4526 = vmatpush3.msra.mxu0 %v3961_v1  ;;  %v3918_v0 = vld [vmem:[%s6810_s8 + $0xe00] sm:$0xff] }
 0x2bf   :  { %4492 = vmatprep.subr.mxu1 %v3944_v2  ;;  %4527 = vmatprep.subr.mxu0 %v3976_v4  ;;  %v3950_v1 = vld [vmem:[%s6810_s8 + $0xf00] sm:$0xff] }
 0x2c0   :  { %4493 = vmatpush3.msra.mxu1 %v3928_v9  ;;  %4528 = vmatpush3.msra.mxu0 %v3960_v10 }
 0x2c1   :  { %4494 = vmatprep.subr.mxu1 %v3943_v11  ;;  %4529 = vmatprep.subr.mxu0 %v3975_v12 }
 0x2c2   :  { %4495 = vmatpush3.msra.mxu1 %v3927_v13  ;;  %4530 = vmatpush3.msra.mxu0 %v3959_v14  ;;  %v3643_v13 = vld [vmem:[%s6812_s9 + $0x2] ss:$0 sm:$0xff] }
 0x2c3   :  { %4496 = vmatprep.subr.mxu1 %v3942_v15  ;;  %4531 = vmatprep.subr.mxu0 %v3974_v17 }
 0x2c4   :  { %4497 = vmatpush3.msra.mxu1 %v3926_v18  ;;  %4532 = vmatpush3.msra.mxu0 %v3958_v19 }
 0x2c5   :  { %4498 = vmatprep.subr.mxu1 %v3941_v20  ;;  %4533 = vmatprep.subr.mxu0 %v3973_v21 }
 0x2c6   :  { %4499 = vmatpush3.msra.mxu1 %v3925_v22  ;;  %4534 = vmatpush3.msra.mxu0 %v3957_v25 }
 0x2c7   :  { %4500 = vmatprep.subr.mxu1 %v3940_v26  ;;  %4535 = vmatprep.subr.mxu0 %v3972_v27  ;;  %v3711_v26 = vld [vmem:[%s6812_s9 + $0x3] ss:$0 sm:$0xff] }
 0x2c8   :  { %4501 = vmatpush3.msra.mxu1 %v3924_v28  ;;  %4536 = vmatpush3.msra.mxu0 %v3956_v29 }
 0x2c9   :  { %4502 = vmatprep.subr.mxu1 %v3939_v30  ;;  %4537 = vmatprep.subr.mxu0 %v3971_v31  ;;  %v4094_v42 = vpop.f32.mrf.mxu1  ;;  %v4129_v43 = vpop.f32.mrf.mxu0 }
 0x2ca   :  { %4503 = vmatpush3.msra.mxu1 %v3923_v33  ;;  %4538 = vmatpush3.msra.mxu0 %v3955_v37 }
 0x2cb   :  { %4504 = vmatprep.subr.mxu1 %v3938_v38  ;;  %4539 = vmatprep.subr.mxu0 %v3970_v40  ;;  %v4095_v34 = vpop.f32.mrf.mxu1  ;;  %v4130_v50 = vpop.f32.mrf.mxu0 }
 0x2cc   :  { %4505 = vmatpush3.msra.mxu1 %v3922_v41  ;;  %4540 = vmatpush3.msra.mxu0 %v3954_v24  ;;  %v4096_v53 = vadd.f32 %v4095_v34, %v4094_v42  ;;  %v4131_v57 = vadd.f32 %v4130_v50, %v4129_v43  ;;  %v3779_v42 = vld [vmem:[%s6812_s9 + $0x4] ss:$0 sm:$0xff] }
 0x2cd   :  { %4506 = vmatprep.subr.mxu1 %v3937_v44  ;;  %4541 = vmatprep.subr.mxu0 %v3969_v45 }
 0x2ce   :  { %4507 = vmatpush3.msra.mxu1 %v3921_v32  ;;  %4542 = vmatpush3.msra.mxu0 %v3953_v48  ;;  %v1880_v6 = vadd.f32 %v4096_v53, %v3575_v49 }
 0x2cf   :  { %4508 = vmatprep.subr.mxu1 %v3936_v35  ;;  %4543 = vmatprep.subr.mxu0 %v3968_v52 }
 0x2d0   :  { %4509 = vmatpush3.msra.mxu1 %v3920_v54  ;;  %4544 = vmatpush3.msra.mxu0 %v3952_v5  ;;  %v1950_v63 = vadd.f32 %v4131_v57, %v1880_v6  ;;  %v3847_v54 = vld [vmem:[%s6812_s9 + $0x5] ss:$0 sm:$0xff] }
 0x2d1   :  { %4510 = vmatprep.subr.mxu1 %v3935_v55  ;;  %4545 = vmatprep.subr.mxu0 %v3967_v56 }
 0x2d2   :  { %4511 = vmatpush3.msra.mxu1 %v3919_v58  ;;  %4546 = vmatpush3.msra.mxu0 %v3951_v59  ;;  %v1953_v2 = vmax.f32 %v1950_v63, 0.0 }
 0x2d3   :  { %4512 = vmatprep.subr.mxu1 %v3934_v60  ;;  %4547 = vmatprep.subr.mxu0 %v3966_v61 }
 0x2d4   :  { %4513 = vmatpush3.msra.mxu1 %v3918_v0  ;;  %4548 = vmatpush3.msra.mxu0 %v3950_v1  ;;  %v1955_v4 = vadd.f32 %v1953_v2, %v4732_v36  ;;  %v3915_v1 = vld [vmem:[%s6812_s9 + $0x6] ss:$0 sm:$0xff] }
 0x2d5   :  { %3275 = vmatmul.mubr.f32.vlgmr.msra.gmra.mxu1 %v5339_v7  ;;  %3345 = vmatmul.mubr.f32.vlgmr.msra.gmra.mxu0 %v5341_v8 }
 0x2d6   :  { %v1963_v9 = vmul.f32 %v6530_v47, %v1955_v4 }
 0x2d8   :  { %v1971_v10 = vadd.f32 %v6547_v51, %v1963_v9 }
 0x2da   :  { %1972 = vst.msk [vmem:[%s6815_s12 + $0x2] sm:$0x3] %vm1738_vm1, %v1971_v10 }
 0x2eb   :  { %v4164_v11 = vpop.f32.mrf.mxu1  ;;  %v4199_v12 = vpop.f32.mrf.mxu0 }
 0x2ed   :  { %v4165_v36 = vpop.f32.mrf.mxu1  ;;  %v4200_v14 = vpop.f32.mrf.mxu0 }
 0x2ee   :  { %v4166_v7 = vadd.f32 %v4165_v36, %v4164_v11  ;;  %v4201_v8 = vadd.f32 %v4200_v14, %v4199_v12 }
 0x2f0   :  { %v2113_v15 = vadd.f32 %v4166_v7, %v3643_v13 }
 0x2f2   :  { %v2183_v17 = vadd.f32 %v4201_v8, %v2113_v15  ;;  %v3983_v8 = vld [vmem:[%s6812_s9 + $0x7] ss:$0 sm:$0xff] }
 0x2f4   :  { %v2186_v18 = vmax.f32 %v2183_v17, 0.0 }
 0x2f6   :  { %v2188_v19 = vadd.f32 %v2186_v18, %v4836_v3 }
 0x2f8   :  { %v2196_v20 = vmul.f32 %v6530_v47, %v2188_v19 }
 0x2fa   :  { %v2204_v21 = vadd.f32 %v6547_v51, %v2196_v20 }
 0x2fc   :  { %2205 = vst.msk [vmem:[%s6815_s12 + $0x4] sm:$0x3] %vm1738_vm1, %v2204_v21 }
 0x30d   :  { %v4234_v22 = vpop.f32.mrf.mxu1  ;;  %v4269_v25 = vpop.f32.mrf.mxu0 }
 0x30f   :  { %v4235_v27 = vpop.f32.mrf.mxu1  ;;  %v4270_v28 = vpop.f32.mrf.mxu0 }
 0x310   :  { %v4236_v29 = vadd.f32 %v4235_v27, %v4234_v22  ;;  %v4271_v3 = vadd.f32 %v4270_v28, %v4269_v25 }
 0x312   :  { %v2346_v30 = vadd.f32 %v4236_v29, %v3711_v26 }
 0x314   :  { %v2416_v31 = vadd.f32 %v4271_v3, %v2346_v30 }
 0x316   :  { %v2419_v33 = vmax.f32 %v2416_v31, 0.0 }
 0x318   :  { %v2421_v37 = vadd.f32 %v2419_v33, %v4898_v23 }
 0x31a   :  { %v2429_v38 = vmul.f32 %v6530_v47, %v2421_v37 }
 0x31c   :  { %v2437_v40 = vadd.f32 %v6547_v51, %v2429_v38 }
 0x31e   :  { %2438 = vst.msk [vmem:[%s6815_s12 + $0x6] sm:$0x3] %vm1738_vm1, %v2437_v40 }
 0x32f   :  { %v4304_v41 = vpop.f32.mrf.mxu1  ;;  %v4339_v24 = vpop.f32.mrf.mxu0 }
 0x331   :  { %v4305_v43 = vpop.f32.mrf.mxu1  ;;  %v4340_v44 = vpop.f32.mrf.mxu0 }
 0x332   :  { %v4306_v45 = vadd.f32 %v4305_v43, %v4304_v41  ;;  %v4341_v23 = vadd.f32 %v4340_v44, %v4339_v24 }
 0x334   :  { %v2579_v32 = vadd.f32 %v4306_v45, %v3779_v42 }
 0x336   :  { %v2649_v48 = vadd.f32 %v4341_v23, %v2579_v32 }
 0x338   :  { %v2652_v49 = vmax.f32 %v2649_v48, 0.0 }
 0x33a   :  { %v2653_v34 = vadd.f32 %v2652_v49, %v4955_v46 }
 0x33c   :  { %v2661_v50 = vmul.f32 %v6530_v47, %v2653_v34 }
 0x33e   :  { %v2669_v35 = vadd.f32 %v6547_v51, %v2661_v50 }
 0x340   :  { %2670 = vst.msk [vmem:[%s6815_s12 + $0x8] sm:$0x3] %vm1738_vm1, %v2669_v35 }
 0x351   :  { %v4374_v52 = vpop.f32.mrf.mxu1  ;;  %v4409_v53 = vpop.f32.mrf.mxu0 }
 0x353   :  { %v4375_v5 = vpop.f32.mrf.mxu1  ;;  %v4410_v55 = vpop.f32.mrf.mxu0 }
 0x354   :  { %v4376_v56 = vadd.f32 %v4375_v5, %v4374_v52  ;;  %v4411_v46 = vadd.f32 %v4410_v55, %v4409_v53 }
 0x356   :  { %v2811_v6 = vadd.f32 %v4376_v56, %v3847_v54 }
 0x358   :  { %v2881_v57 = vadd.f32 %v4411_v46, %v2811_v6 }
 0x35a   :  { %v2884_v58 = vmax.f32 %v2881_v57, 0.0 }
 0x35c   :  { %v2886_v59 = vadd.f32 %v2884_v58, %v5013_v62 }
 0x35e   :  { %v2894_v60 = vmul.f32 %v6530_v47, %v2886_v59 }
 0x360   :  { %v2902_v61 = vadd.f32 %v6547_v51, %v2894_v60 }
 0x362   :  { %2903 = vst.msk [vmem:[%s6815_s12 + $0xa] sm:$0x3] %vm1738_vm1, %v2902_v61 }
 0x373   :  { %v4444_v63 = vpop.f32.mrf.mxu1  ;;  %v4479_v0 = vpop.f32.mrf.mxu0 }
 0x375   :  { %v4445_v2 = vpop.f32.mrf.mxu1  ;;  %v4480_v4 = vpop.f32.mrf.mxu0 }
 0x376   :  { %v4446_v9 = vadd.f32 %v4445_v2, %v4444_v63  ;;  %v4481_v62 = vadd.f32 %v4480_v4, %v4479_v0 }
 0x378   :  { %v3044_v10 = vadd.f32 %v4446_v9, %v3915_v1 }
 0x37a   :  { %v3114_v11 = vadd.f32 %v4481_v62, %v3044_v10 }
 0x37c   :  { %v3117_v12 = vmax.f32 %v3114_v11, 0.0 }
 0x37e   :  { %v3119_v13 = vadd.f32 %v3117_v12, %v5070_v16 }
 0x380   :  { %v3127_v36 = vmul.f32 %v6530_v47, %v3119_v13 }
 0x382   :  { %v3135_v14 = vadd.f32 %v6547_v51, %v3127_v36 }
 0x384   :  { %3136 = vst.msk [vmem:[%s6815_s12 + $0xc] sm:$0x3] %vm1738_vm1, %v3135_v14 }
 0x395   :  { %v4514_v7 = vpop.f32.mrf.mxu1  ;;  %v4549_v15 = vpop.f32.mrf.mxu0 }
 0x397   :  { %v4515_v17 = vpop.f32.mrf.mxu1  ;;  %v4550_v18 = vpop.f32.mrf.mxu0 }
 0x398   :  { %v4516_v19 = vadd.f32 %v4515_v17, %v4514_v7  ;;  %v4551_v16 = vadd.f32 %v4550_v18, %v4549_v15 }
 0x39a   :  { %v3277_v20 = vadd.f32 %v4516_v19, %v3983_v8 }
 0x39c   :  { %v3347_v21 = vadd.f32 %v4551_v16, %v3277_v20 }
 0x39e   :  { %v3350_v22 = vmax.f32 %v3347_v21, 0.0 }
 0x3a0   :  { %v3352_v25 = vadd.f32 %v3350_v22, %v5127_v39 }
 0x3a2   :  { %v3360_v26 = vmul.f32 %v6530_v47, %v3352_v25 }
 0x3a4   :  { %v3368_v27 = vadd.f32 %v6547_v51, %v3360_v26 }
 0x3a6   :  { %3369 = vst.msk [vmem:[%s6815_s12 + $0xe] sm:$0x3] %vm1738_vm1, %v3368_v27 }

// kernel: forward_pallas.23
= control target key start
LH: loop header
LB: loop body
LE: loop exit
PB: predicated region body
PF: predicated region fallthrough
CT: control target
= control target key end

     0   :  { %v866_v2 = vmov 0.0   ;;  %vm26_vm0 = vcmask 261120   ;;  %vm867_vm1 = vmmov 0   ;;  %s1071_s0 = inlined_call_operand.vmem [shape: f32[16,32], index: 0, kind: input, shape index: {}]   ;;  %s1072_s1 = inlined_call_operand.vmem [shape: f32[8,32,128], index: 1, kind: input, shape index: {}]   ;;  %s1073_s2 = inlined_call_operand.vmem [shape: f32[1,128], index: 2, kind: input, shape index: {}]   ;;  %s1074_s3 = inlined_call_operand.hbm [shape: f32[2,128], index: 3, kind: output, shape index: {}]  }
   0x1   :  { %v679_v0 = vld [vmem:[%s1072_s1 + $0x38] sm:$0xff]  ;;  %753 = vmatprep.subr.mxu0 %v866_v2  ;;  %764 = vmatprep.subr.mxu1 %v866_v2  ;;  %v678_v3 = vld [vmem:[%s1072_s1 + $0x30] sm:$0xff]  ;;  %v677_v5 = vld [vmem:[%s1072_s1 + $0x28] sm:$0xff] }
   0x2   :  { %v19_v1 = vld [vmem:[%s1072_s1 + $0x18] sm:$0xff]  ;;  %v18_v4 = vld [vmem:[%s1072_s1 + $0x10] sm:$0xff]  ;;  %754 = vmatpush3.msra.mxu0 %v679_v0  ;;  %v17_v6 = vld [vmem:[%s1072_s1 + $0x8] sm:$0xff]  ;;  %761 = vmatprep.mubr.msk.f32.mxu0 %vm867_vm1, %v866_v2 }
   0x3   :  { %765 = vmatpush3.msra.mxu1 %v19_v1  ;;  %755 = vmatprep.subr.mxu0 %v866_v2  ;;  %v676_v7 = vld [vmem:[%s1072_s1 + $0x20] sm:$0xff]  ;;  %v685_v11 = vld [vmem:[%s1072_s1 + $0x58] sm:$0xff]  ;;  %v684_v13 = vld [vmem:[%s1072_s1 + $0x50] sm:$0xff] }
   0x4   :  { %766 = vmatprep.subr.mxu1 %v866_v2  ;;  %756 = vmatpush3.msra.mxu0 %v678_v3  ;;  %v16_v8 = vld [vmem:[%s1072_s1] sm:$0xff]  ;;  %v690_v12 = vld [vmem:[%s1072_s1 + $0x78] sm:$0xff]  ;;  %v689_v14 = vld [vmem:[%s1072_s1 + $0x70] sm:$0xff] }
   0x5   :  { %767 = vmatpush3.msra.mxu1 %v18_v4  ;;  %757 = vmatprep.subr.mxu0 %v866_v2  ;;  %v20_v9 = vld [vmem:[%s1071_s0 + $0x2] sm:$0x3]  ;;  %v15_v10 = vld [vmem:[%s1071_s0] sm:$0x3]  ;;  %v683_v15 = vld [vmem:[%s1072_s1 + $0x48] sm:$0xff] }
   0x6   :  { %768 = vmatprep.subr.mxu1 %v866_v2  ;;  %758 = vmatpush3.msra.mxu0 %v677_v5  ;;  %v688_v16 = vld [vmem:[%s1072_s1 + $0x68] sm:$0xff] }
   0x7   :  { %769 = vmatpush3.msra.mxu1 %v17_v6  ;;  %759 = vmatprep.subr.mxu0 %v866_v2 }
   0x8   :  { %770 = vmatprep.subr.mxu1 %v866_v2  ;;  %760 = vmatpush3.msra.mxu0 %v676_v7 }
   0x9   :  { %771 = vmatpush3.msra.mxu1 %v16_v8  ;;  %762 = vmatmul.mubr.msk.f32.vlgmr.msra.gmra.mxu0 %vm26_vm0, %v20_v9 }
   0xa   :  { %772 = vmatprep.mubr.msk.f32.mxu1 %vm867_vm1, %v866_v2  ;;  %775 = vmatprep.subr.mxu0 %v866_v2 }
   0xb   :  { %786 = vmatprep.subr.mxu1 %v866_v2  ;;  %773 = vmatmul.mubr.msk.f32.vlgmr.msra.gmra.mxu1 %vm26_vm0, %v15_v10 }
   0xc   :  { %776 = vmatpush3.msra.mxu0 %v685_v11  ;;  %787 = vmatpush3.msra.mxu1 %v690_v12 }
   0xd   :  { %777 = vmatprep.subr.mxu0 %v866_v2  ;;  %788 = vmatprep.subr.mxu1 %v866_v2 }
   0xe   :  { %8 = vsyncpa [#allocation3], 0  ;;  %778 = vmatpush3.msra.mxu0 %v684_v13  ;;  %789 = vmatpush3.msra.mxu1 %v689_v14  ;;  %v682_v17 = vld [vmem:[%s1072_s1 + $0x40] sm:$0xff]  ;;  %v695_v21 = vld [vmem:[%s1072_s1 + $0x98] sm:$0xff]  ;;  %s868_s11 = smov [#allocation2]  }
   0xf   :  { %779 = vmatprep.subr.mxu0 %v866_v2  ;;  %790 = vmatprep.subr.mxu1 %v866_v2  ;;  %v687_v18 = vld [vmem:[%s1072_s1 + $0x60] sm:$0xff]  ;;  %v700_v22 = vld [vmem:[%s1072_s1 + $0xb8] sm:$0xff]  ;;  %v694_v23 = vld [vmem:[%s1072_s1 + $0x90] sm:$0xff]  ;;  %s668_s12 = sshll.u32 %s868_s11, 4  ;;  %s669_s12 = int_to_ptr.vmem [resolvable:$true] %s668_s12 }
  0x10   :  { %780 = vmatpush3.msra.mxu0 %v683_v15  ;;  %791 = vmatpush3.msra.mxu1 %v688_v16  ;;  %v173_v19 = vld [vmem:[%s1071_s0 + $0x4] sm:$0x3]  ;;  %v253_v20 = vld [vmem:[%s1071_s0 + $0x6] sm:$0x3]  ;;  %v699_v24 = vld [vmem:[%s1072_s1 + $0xb0] sm:$0xff]  ;;  %s844_s13 = scalar_lea.vmem %s669_s12, 32  ;;  %p849_p1 = scmp.lt.s32.totalorder %s669_s12, %s669_s12 }
  0x11   :  { %781 = vmatprep.subr.mxu0 %v866_v2  ;;  %792 = vmatprep.subr.mxu1 %v866_v2  ;;  %v693_v25 = vld [vmem:[%s1072_s1 + $0x88] sm:$0xff]  ;;  %v692_v27 = vld [vmem:[%s1072_s1 + $0x80] sm:$0xff]  ;;  %v705_v31 = vld [vmem:[%s1072_s1 + $0xd8] sm:$0xff]  ;;  %p845_p0 = scmp.ne.s32.totalorder %s669_s12, %s844_s13  ;;  %p850_p2 = scmp.lt.s32.totalorder %s844_s13, %s844_s13 }
  0x12   :  { %782 = vmatpush3.msra.mxu0 %v682_v17  ;;  %783 = vmatprep.mubr.msk.f32.mxu0 %vm867_vm1, %v866_v2  ;;  %v698_v26 = vld [vmem:[%s1072_s1 + $0xa8] sm:$0xff]  ;;  %v697_v28 = vld [vmem:[%s1072_s1 + $0xa0] sm:$0xff]  ;;  %v710_v32 = vld [vmem:[%s1072_s1 + $0xf8] sm:$0xff] }
  0x13   :  { %793 = vmatpush3.msra.mxu1 %v687_v18  ;;  %784 = vmatmul.mubr.msk.f32.vlgmr.msra.gmra.mxu0 %vm26_vm0, %v173_v19  ;;  %v333_v29 = vld [vmem:[%s1071_s0 + $0x8] sm:$0x3]  ;;  %v413_v30 = vld [vmem:[%s1071_s0 + $0xa] sm:$0x3]  ;;  %v704_v33 = vld [vmem:[%s1072_s1 + $0xd0] sm:$0xff]  ;;  %p851_p3 = por %p850_p2, %p849_p1 }
  0x14   :  { %794 = vmatprep.mubr.msk.f32.mxu1 %vm867_vm1, %v866_v2  ;;  %797 = vmatprep.subr.mxu0 %v866_v2  ;;  %v709_v34 = vld [vmem:[%s1072_s1 + $0xf0] sm:$0xff]  ;;  %v703_v35 = vld [vmem:[%s1072_s1 + $0xc8] sm:$0xff]  ;;  %v702_v37 = vld [vmem:[%s1072_s1 + $0xc0] sm:$0xff] }
  0x15   :  { %808 = vmatprep.subr.mxu1 %v866_v2  ;;  %795 = vmatmul.mubr.msk.f32.vlgmr.msra.gmra.mxu1 %vm26_vm0, %v253_v20  ;;  %v708_v36 = vld [vmem:[%s1072_s1 + $0xe8] sm:$0xff]  ;;  %v707_v38 = vld [vmem:[%s1072_s1 + $0xe0] sm:$0xff]  ;;  %p852_p4 = pnand %p851_p3, %p845_p0 }
  0x16   :  { %798 = vmatpush3.msra.mxu0 %v695_v21  ;;  %809 = vmatpush3.msra.mxu1 %v700_v22  ;;  %v493_v39 = vld [vmem:[%s1071_s0 + $0xc] sm:$0x3]  ;;  %v573_v40 = vld [vmem:[%s1071_s0 + $0xe] sm:$0x3]  ;;  %v712_v63 = vld [vmem:[%s1073_s2] ss:$0 sm:$0xff] }
  0x17   :  { %799 = vmatprep.subr.mxu0 %v866_v2  ;;  %810 = vmatprep.subr.mxu1 %v866_v2 }
  0x18   :  { %800 = vmatpush3.msra.mxu0 %v694_v23  ;;  %811 = vmatpush3.msra.mxu1 %v699_v24 }
  0x19   :  { %801 = vmatprep.subr.mxu0 %v866_v2  ;;  %812 = vmatprep.subr.mxu1 %v866_v2 }
  0x1a   :  { %802 = vmatpush3.msra.mxu0 %v693_v25  ;;  %813 = vmatpush3.msra.mxu1 %v698_v26 }
  0x1b   :  { %803 = vmatprep.subr.mxu0 %v866_v2  ;;  %814 = vmatprep.subr.mxu1 %v866_v2 }
  0x1c   :  { %804 = vmatpush3.msra.mxu0 %v692_v27  ;;  %805 = vmatprep.mubr.msk.f32.mxu0 %vm867_vm1, %v866_v2 }
  0x1d   :  { %815 = vmatpush3.msra.mxu1 %v697_v28  ;;  %806 = vmatmul.mubr.msk.f32.vlgmr.msra.gmra.mxu0 %vm26_vm0, %v333_v29 }
  0x1e   :  { %816 = vmatprep.mubr.msk.f32.mxu1 %vm867_vm1, %v866_v2  ;;  %819 = vmatprep.subr.mxu0 %v866_v2 }
  0x1f   :  { %830 = vmatprep.subr.mxu1 %v866_v2  ;;  %817 = vmatmul.mubr.msk.f32.vlgmr.msra.gmra.mxu1 %vm26_vm0, %v413_v30 }
  0x20   :  { %820 = vmatpush3.msra.mxu0 %v705_v31  ;;  %831 = vmatpush3.msra.mxu1 %v710_v32 }
  0x21   :  { %821 = vmatprep.subr.mxu0 %v866_v2  ;;  %832 = vmatprep.subr.mxu1 %v866_v2 }
  0x22   :  { %822 = vmatpush3.msra.mxu0 %v704_v33  ;;  %833 = vmatpush3.msra.mxu1 %v709_v34 }
  0x23   :  { %823 = vmatprep.subr.mxu0 %v866_v2  ;;  %834 = vmatprep.subr.mxu1 %v866_v2 }
  0x24   :  { %824 = vmatpush3.msra.mxu0 %v703_v35  ;;  %835 = vmatpush3.msra.mxu1 %v708_v36 }
  0x25   :  { %825 = vmatprep.subr.mxu0 %v866_v2  ;;  %836 = vmatprep.subr.mxu1 %v866_v2 }
  0x26   :  { %826 = vmatpush3.msra.mxu0 %v702_v37  ;;  %827 = vmatprep.mubr.msk.f32.mxu0 %vm867_vm1, %v866_v2 }
  0x27   :  { %837 = vmatpush3.msra.mxu1 %v707_v38  ;;  %838 = vmatprep.mubr.msk.f32.mxu1 %vm867_vm1, %v866_v2 }
  0x28   :  { %828 = vmatmul.mubr.msk.f32.vlgmr.msra.gmra.mxu0 %vm26_vm0, %v493_v39  ;;  %839 = vmatmul.mubr.msk.f32.vlgmr.msra.gmra.mxu1 %vm26_vm0, %v573_v40 }
  0xc9   :  { %v96_v41 = vpop.f32.mrf.mxu0 }
  0xcb   :  { %v169_v42 = vpop.f32.mrf.mxu1  ;;  %v763_v43 = vpop.f32.mrf.mxu0 }
  0xcc   :  { %v170_v49 = vadd.f32 %v169_v42, %v96_v41 }
  0xcd   :  { %v774_v44 = vpop.f32.mrf.mxu1 }
  0xd3   :  { %v248_v45 = vpop.f32.mrf.mxu0 }
  0xd4   :  { %v252_v50 = vadd.f32 %v248_v45, %v170_v49 }
  0xd5   :  { %v328_v46 = vpop.f32.mrf.mxu1  ;;  %v785_v47 = vpop.f32.mrf.mxu0 }
  0xd6   :  { %v332_v54 = vadd.f32 %v328_v46, %v252_v50 }
  0xd7   :  { %v796_v48 = vpop.f32.mrf.mxu1 }
  0xdd   :  { %v408_v51 = vpop.f32.mrf.mxu0 }
  0xde   :  { %v412_v56 = vadd.f32 %v408_v51, %v332_v54 }
  0xdf   :  { %v488_v52 = vpop.f32.mrf.mxu1  ;;  %v807_v53 = vpop.f32.mrf.mxu0 }
  0xe0   :  { %v492_v57 = vadd.f32 %v488_v52, %v412_v56 }
  0xe1   :  { %v818_v55 = vpop.f32.mrf.mxu1 }
  0xe8   :  { %v568_v58 = vpop.f32.mrf.mxu0  ;;  %v648_v59 = vpop.f32.mrf.mxu1 }
  0xe9   :  { %v572_v60 = vadd.f32 %v568_v58, %v492_v57 }
  0xea   :  { %v829_v61 = vpop.f32.mrf.mxu0  ;;  %v840_v62 = vpop.f32.mrf.mxu1 }
  0xeb   :  { %v652_v0 = vadd.f32 %v648_v59, %v572_v60 }
  0xed   :  { %v660_v1 = vadd.f32 %v712_v63, %v652_v0 }
  0xef   :  { %661 = vst [vmem:[#allocation2] sm:$0x3] %v660_v1 }
  0xf0   :  { %855 = shalt.err (!%p852_p4)
}
  0xf1   :  { %671 = dma.vmem_to_hbm [thread:$0]  %s669_s12, 32, %s1074_s3, [#allocation3]  }
  0xf2   :  { %864 = dma.done.wait [#allocation3], 32  }
  0xf3   :  { %865 = vsyncadd [#allocation3], 4294967264 }
  0xf4   :  { %675 = vsyncpa [#allocation3], 1 }

</bundles_post_ra>
